<compile_context>
chip_gen: v5e
topology: v5e:2x2
jax: 0.10.0
libtpu: 0.0.40
codegen_flags: <defaults>
</compile_context>

<pallas_src>
import math

import jax
import jax.numpy as jnp
from jax.experimental import pallas as pl
from jax.experimental.pallas import tpu as pltpu

# ----------------------------------------------------------------------------
# Small-scale config mirroring the PyTorch `args` (m=n, hidden=l=m_dash=k, T=3, pad=1)
# ----------------------------------------------------------------------------
BATCH = 2            # data rows
N_NODES = 5          # 1 post + 4 comments  (adjacency is N_NODES x N_NODES)
SEQ = 4              # words per post / comment
D_EMB = 16           # word embedding dim (args.d analogue)
HID = 32             # hidden_lstm_dim == l == m_dash == k
M_CAP = 16           # args.m == args.n  (requires N_NODES*SEQ >= M_CAP)
T_CONV = 3           # Conv1d kernel size
PAD = 1              # Conv1d padding
OUT_PAD = 128        # lane-dense padding of the 2-wide output head
VEC_W = max(8 * HID, OUT_PAD)       # width of the packed row-vector slab
SQRT_300 = math.sqrt(300.0)         # the module hard-codes math.sqrt(300)

f32 = jnp.float32


# ----------------------------------------------------------------------------
# small in-kernel helpers
# ----------------------------------------------------------------------------
def _mm(a, b):      # a @ b
    return jax.lax.dot_general(a, b, (((1,), (0,)), ((), ())),
                               preferred_element_type=f32)


def _mm_nt(a, b):   # a @ b.T
    return jax.lax.dot_general(a, b, (((1,), (1,)), ((), ())),
                               preferred_element_type=f32)


def _sigmoid(x):
    # 1 / (1 + e^-x) with the divide pushed onto the (otherwise idle) EUP slot.
    return pl.reciprocal(1.0 + jnp.exp(-x), approx=True)


def _softmax_rows(x):   # softmax over dim=1 (PyTorch F.softmax default for 2-D)
    m = jnp.max(x, axis=1, keepdims=True)
    e = jnp.exp(x - m)
    return e / jnp.sum(e, axis=1, keepdims=True)   # exact divide (parity)


# ----------------------------------------------------------------------------
# Fused kernel: B_BLK batch rows per grid step.
#   phase 1: LSTM encode, batched over all B_BLK*N sequences (one recurrent
#            matmul per time step over the concatenated post+comment gates)
#   phase 2: per row -- 2-layer GCN, self-attention, co-attention,
#            Conv1d/ReLU/MaxPool, final linear head (lane-dense output)
# ----------------------------------------------------------------------------
def _postcom2dr_kernel(x_ref, a_ref, lstm_ref, sq_ref, mh_ref, wh_ref, vec_ref,
                       out_ref):
    BBLK, N, _ = a_ref.shape
    BN = BBLK * N
    L = N - 1
    SBN, D = x_ref.shape[1], x_ref.shape[2]
    S = SBN // BN
    H = lstm_ref.shape[0] // 8
    H4 = 4 * H
    M = mh_ref.shape[1]
    K = sq_ref.shape[1]                 # conv out channels == H here
    OUTP = wh_ref.shape[0]

    # ---- hoisted weight views (single slab loads, static slices) -------------
    Wih = lstm_ref[:, :D]               # [8H, D]   rows :4H post, 4H: comment
    Whh = lstm_ref[:, D:]               # [8H, H]
    bias = vec_ref[0:1, :8 * H]         # [1, 8H]   post|comment biases
    bh = vec_ref[1:2, :OUTP]            # [1, OUTP] padded bh^T
    WhwT = vec_ref[2:3, :M]             # [1, M]
    WhcT = vec_ref[3:4, :M]             # [1, M]
    conv_b = vec_ref[4:5, :K]           # [1, K]
    W0 = sq_ref[0]
    W1 = sq_ref[1]
    Wcw = sq_ref[2]
    CW0 = sq_ref[3]                     # conv tap t-1   [K, H]
    CW1 = sq_ref[4]                     # conv tap t
    CW2 = sq_ref[5]                     # conv tap t+1
    Ww = mh_ref[0]                      # [M, H]
    Wc = mh_ref[1]                      # [M, H]
    Wh = wh_ref[...]                    # [OUTP, 3H] (rows >=2 are zero)

    # ---- phase 1: LSTM encode, all BBLK*N sequences batched -------------------
    # x rows are time-major across the whole block: row = t*BN + b*N + node.
    xf = x_ref[0]                                        # [S*BN, D]
    g_all = _mm_nt(xf, Wih) + bias                       # [S*BN, 8H] one matmul

    rid = jax.lax.broadcasted_iota(jnp.int32, (BN, H4), 0)
    is_post = (rid % N) == 0            # node 0 of each row uses the post LSTM

    h = jnp.zeros((BN, H), f32)
    c = jnp.zeros((BN, H), f32)
    outs = []
    for t in range(S):                  # fully unrolled (S static and tiny)
        g8 = g_all[t * BN:(t + 1) * BN, :] + _mm_nt(h, Whh)      # [BN, 8H]
        g = jnp.where(is_post, g8[:, :H4], g8[:, H4:])           # [BN, 4H]
        sg = _sigmoid(g)                # one EUP pass over the full 4H lanes
        tg = jnp.tanh(g)                # one EUP pass over the full 4H lanes
        c = sg[:, H:2 * H] * c + sg[:, :H] * tg[:, 2 * H:3 * H]
        h = sg[:, 3 * H:] * jnp.tanh(c)
        outs.append(h)                  # LSTM output at step t for every sequence

    # per-sequence time stack: [BN, S, H]  (node-major ENC built from this below)
    Ot = jnp.stack(outs, axis=1)
    nodes_needed = -(-M // S)           # ceil(M / S)

    # ---- phase 2: per-row graph conv + (co-)attention + conv head -------------
    inv_d = 1.0 / SQRT_300
    for b in range(BBLK):               # static, tiny (<= rows per block)
        A = a_ref[b]                                         # [N, N]
        HS = h[b * N:(b + 1) * N, :]                         # [N, H] final hidden
        # encoded_post_comments[:m], node-major (node = r//S, time = r%S)
        ENC = jnp.concatenate(
            [Ot[b * N + k] for k in range(nodes_needed)], axis=0)[:M, :]   # [M, H]

        # two-layer graph conv
        H1 = jnp.tanh(_mm(A, _mm(HS, W0)))                   # [N, H]
        H2 = jnp.tanh(_mm(A, _mm(H1, W1)))                   # [N, H]
        Xc = H2[1:]                                          # [L, H] comments only

        # self-attention over comment nodes  (SV == C^T of the reference)
        attn = _softmax_rows(_mm_nt(Xc, Xc) * inv_d)         # [L, L]
        SV = _mm(attn, Xc)                                   # [L, H]

        # word / comment co-attention (reassociated; exact rewrite of reference)
        F = jnp.tanh(_mm(SV, _mm_nt(Wcw, ENC)))              # [L, M]
        WwE = _mm_nt(Ww, ENC)                                # [M, M] = Ww @ ENC^T
        WcS = _mm_nt(Wc, SV)                                 # [M, L] = Wc @ C
        Hc = jnp.tanh(WwE + _mm(WcS, F))                     # [M, M]
        Hw = jnp.tanh(WcS + _mm_nt(WwE, F))                  # [M, L]

        ac = _softmax_rows(_mm(WhwT, Hw))                    # [1, L]
        aw = _softmax_rows(_mm(WhcT, Hc))                    # [1, M]
        w_bar = _mm(aw, ENC)                                 # [1, H]
        # NOTE: the reference loop OVERWRITES c_bar each iteration (no +=), so only
        # the last comment column survives -- replicated intentionally.
        c_bar = ac[:, L - 1:L] * SV[L - 1:L, :]              # [1, H]

        # Conv1d(H -> k, T=3, pad=1) over comment hidden states, ReLU, MaxPool
        Zc = HS[1:]                                          # [L, H]
        P0 = _mm_nt(Zc, CW0)                                 # [L, K] tap t-1
        P1 = _mm_nt(Zc, CW1)                                 # [L, K] tap t
        P2 = _mm_nt(Zc, CW2)                                 # [L, K] tap t+1
        rowi = jax.lax.broadcasted_iota(jnp.int32, (L, K), 0)
        s0 = jnp.where(rowi >= 1, pltpu.roll(P0, shift=1, axis=0), 0.0)
        s2 = jnp.where(rowi <= L - 2, pltpu.roll(P2, shift=L - 1, axis=0), 0.0)
        conv = jnp.maximum(s0 + P1 + s2 + conv_b, 0.0)       # [L, K] ReLU
        h_local = jnp.max(conv, axis=0, keepdims=True)       # [1, K] MaxPool

        # final head: y = h_en @ Wh^T + bh^T  (lane-dense, padded to OUTP lanes)
        h_en = jnp.concatenate([w_bar, c_bar, h_local], axis=1)   # [1, 3H]
        out_ref[b] = _mm_nt(h_en, Wh) + bh                        # [1, OUTP]


# ----------------------------------------------------------------------------
# wrapper
# ----------------------------------------------------------------------------
def _pick_rows_per_block(batch):
    """Rows folded into one grid step.

    v7x has 2 TensorCores -> keep the 'parallel' grid >= 2 steps; single-TC
    chips (v5e/v6e) fold everything into one step to amortise per-step overhead
    and fill matmul sublanes.  Falls back to single-step on unknown devices.
    """
    kind = ""
    try:
        kind = jax.devices()[0].device_kind.lower()
    except Exception:
        pass
    n_tc = 2 if "v7" in kind else 1
    blk = max(1, batch // n_tc)
    while batch % blk:
        blk -= 1
    return blk


def run_postcom2dr(x_flat, adj, p, b_blk):
    num_blk, SBN, D = x_flat.shape
    B, N, _ = adj.shape
    BN = b_blk * N
    S = SBN // BN
    H = p["sq"].shape[1]
    M = p["mh"].shape[1]
    L = N - 1

    # rough cost hint so XLA schedules the surrounding layout ops sensibly
    flops = 2 * B * (
        S * N * D * 8 * H + S * N * H * 8 * H                  # LSTM in + recurrence
        + 2 * (N * H * H + N * N * H)                          # 2-layer GCN
        + 2 * L * L * H                                        # self-attention
        + H * H * M + L * H * M                                # Wcw@ENC^T, F
        + M * H * M + M * H * L + M * L * M + M * M * L        # WwE, WcS, Hc, Hw
        + M * L + M * M + M * H                                # ac, aw, w_bar
        + 3 * L * H * H + 3 * H * OUT_PAD)                     # conv taps + head
    transc = B * (2 * S * N * 4 * H + 2 * N * H + L * M + M * M + M * L
                  + L * L + L + M)
    bytes_acc = 4 * (x_flat.size + adj.size + B * OUT_PAD
                     + sum(int(p[k].size) for k in ("lstm", "sq", "mh", "wh", "vec")))
    cost = pl.CostEstimate(flops=int(flops), transcendentals=int(transc),
                           bytes_accessed=int(bytes_acc))

    out = pl.pallas_call(
        _postcom2dr_kernel,
        out_shape=jax.ShapeDtypeStruct((B, 1, OUT_PAD), f32),
        grid=(num_blk,),
        in_specs=[
            pl.BlockSpec((1, SBN, D), lambda i: (i, 0, 0)),        # words (block time-major)
            pl.BlockSpec((b_blk, N, N), lambda i: (i, 0, 0)),      # adjacency
            pl.BlockSpec((8 * H, D + H), lambda i: (0, 0)),        # LSTM slab [W_ih|W_hh]
            pl.BlockSpec((6, H, H), lambda i: (0, 0, 0)),          # W0,W1,Wcw,conv taps
            pl.BlockSpec((2, M, H), lambda i: (0, 0, 0)),          # Ww, Wc
            pl.BlockSpec((OUT_PAD, 3 * H), lambda i: (0, 0)),      # Wh (zero-padded rows)
            pl.BlockSpec((8, VEC_W), lambda i: (0, 0)),            # biases / row vectors
        ],
        out_specs=pl.BlockSpec((b_blk, 1, OUT_PAD), lambda i: (i, 0, 0)),
        compiler_params=pltpu.CompilerParams(
            dimension_semantics=("parallel",)),                    # megacore on v7x
        cost_estimate=cost,
    )(x_flat, adj, p["lstm"], p["sq"], p["mh"], p["wh"], p["vec"])
    return out[:, 0, :2]                                           # unpad the 2 logits


@jax.jit
def postcom2dr_forward(x, adj, p):
    B, N, S, D = x.shape
    assert M_CAP <= N * S
    b_blk = _pick_rows_per_block(B)
    num_blk = B // b_blk
    # time-major flatten across each block of rows so that flat row index is
    # t*(b_blk*N) + b*N + node -> the kernel batches all b_blk*N sequences in a
    # single matmul per LSTM time step, and per-step gate rows are contiguous.
    xb = x.reshape(num_blk, b_blk, N, S, D)
    xb = jnp.transpose(xb, (0, 3, 1, 2, 4))              # [blk, S, b_blk, N, D]
    x_flat = xb.reshape(num_blk, S * b_blk * N, D)
    return run_postcom2dr(x_flat, adj, p, b_blk)


# ----------------------------------------------------------------------------
# parameter init + wrapper-side packing into a few slabs
# ----------------------------------------------------------------------------
def init_params(key):
    ks = jax.random.split(key, 17)
    s = 0.2

    def rnd(k, shape):
        return (s * jax.random.normal(k, shape)).astype(f32)

    H, D, M = HID, D_EMB, M_CAP

    W0 = rnd(ks[0], (H, H))                  # (hidden, m_dash)
    W1 = rnd(ks[1], (H, H))                  # (m_dash, m_dash)
    Wcw = rnd(ks[2], (H, H))                 # (m_dash, hidden)
    Ww = rnd(ks[3], (M, H))                  # (m, l)
    Wc = rnd(ks[4], (M, H))                  # (n, m_dash)
    Whw = rnd(ks[5], (M, 1))
    Whc = rnd(ks[6], (M, 1))
    Wh = rnd(ks[7], (2, 3 * H))              # (2, hidden + m_dash + k)
    bh = rnd(ks[8], (2, 1))
    conv_w = rnd(ks[9], (H, H, T_CONV))      # Conv1d weight (k, hidden, T)
    conv_b = rnd(ks[10], (H,))
    post_w_ih = rnd(ks[11], (4 * H, D))      # PyTorch gate order i, f, g, o
    post_w_hh = rnd(ks[12], (4 * H, H))
    post_b = rnd(ks[13], (1, 4 * H))         # b_ih + b_hh folded
    com_w_ih = rnd(ks[14], (4 * H, D))
    com_w_hh = rnd(ks[15], (4 * H, H))
    com_b = rnd(ks[16], (1, 4 * H))

    p = {}
    # LSTM slab [8H, D+H]: rows :4H = post gates, 4H: = comment gates
    w_ih = jnp.concatenate([post_w_ih, com_w_ih], axis=0)        # [8H, D]
    w_hh = jnp.concatenate([post_w_hh, com_w_hh], axis=0)        # [8H, H]
    p["lstm"] = jnp.concatenate([w_ih, w_hh], axis=1)            # [8H, D+H]
    # HxH slab: W0, W1, Wcw, conv taps (t-1, t, t+1)
    p["sq"] = jnp.stack([W0, W1, Wcw,
                         conv_w[:, :, 0], conv_w[:, :, 1], conv_w[:, :, 2]], axis=0)
    # MxH slab: Ww, Wc
    p["mh"] = jnp.stack([Ww, Wc], axis=0)
    # lane-dense padded final head
    p["wh"] = jnp.zeros((OUT_PAD, 3 * H), f32).at[:2].set(Wh)
    # row-vector slab [8, VEC_W]: LSTM biases | bh^T | Whw^T | Whc^T | conv bias
    vec = jnp.zeros((8, VEC_W), f32)
    vec = vec.at[0, :8 * H].set(jnp.concatenate([post_b, com_b], axis=1)[0])
    vec = vec.at[1, :2].set(bh[:, 0])
    vec = vec.at[2, :M].set(Whw[:, 0])
    vec = vec.at[3, :M].set(Whc[:, 0])
    vec = vec.at[4, :H].set(conv_b)
    p["vec"] = vec
    return p


if __name__ == "__main__":
    key = jax.random.PRNGKey(0)
    k_data, k_adj, k_par = jax.random.split(key, 3)

    # embedded post+comment word vectors and per-row adjacency matrices
    x = 0.5 * jax.random.normal(k_data, (BATCH, N_NODES, SEQ, D_EMB), dtype=f32)
    adj = jax.random.bernoulli(k_adj, 0.5, (BATCH, N_NODES, N_NODES)).astype(f32)
    adj = adj + jnp.eye(N_NODES, dtype=f32)[None]    # self loops

    params = init_params(k_par)

    out = postcom2dr_forward(x, adj, params)
    out = jax.block_until_ready(out)

    assert out.shape == (BATCH, 2), out.shape
    assert bool(jnp.all(jnp.isfinite(out)))
    print("KERNEL_OK")
</pallas_src>

<mosaic_0001>
module attributes {stable_mosaic.version = 11 : i64} {
  func.func @_postcom2dr_kernel(%arg0: i32, %arg1: memref<1x40x16xf32, #tpu.memory_space<vmem>>, %arg2: memref<2x5x5xf32, #tpu.memory_space<vmem>>, %arg3: memref<256x48xf32, #tpu.memory_space<vmem>>, %arg4: memref<6x32x32xf32, #tpu.memory_space<vmem>>, %arg5: memref<2x16x32xf32, #tpu.memory_space<vmem>>, %arg6: memref<128x96xf32, #tpu.memory_space<vmem>>, %arg7: memref<8x256xf32, #tpu.memory_space<vmem>>, %arg8: memref<2x1x128xf32, #tpu.memory_space<vmem>>) attributes {dimension_semantics = [#tpu.dimension_semantics<parallel>], iteration_bounds = array<i64: 1>, scalar_prefetch = 0 : i64, scratch_operands = 0 : i64, tpu.core_type = #tpu.core_type<tc>, window_params = [{transform_indices = @transform_0, window_bounds = array<i64: 1, 40, 16>}, {transform_indices = @transform_1, window_bounds = array<i64: 2, 5, 5>}, {pipeline_mode = #tpu.pipeline_mode<synchronous>, transform_indices = @transform_2, window_bounds = array<i64: 256, 48>}, {pipeline_mode = #tpu.pipeline_mode<synchronous>, transform_indices = @transform_3, window_bounds = array<i64: 6, 32, 32>}, {pipeline_mode = #tpu.pipeline_mode<synchronous>, transform_indices = @transform_4, window_bounds = array<i64: 2, 16, 32>}, {pipeline_mode = #tpu.pipeline_mode<synchronous>, transform_indices = @transform_5, window_bounds = array<i64: 128, 96>}, {pipeline_mode = #tpu.pipeline_mode<synchronous>, transform_indices = @transform_6, window_bounds = array<i64: 8, 256>}, {transform_indices = @transform_7, window_bounds = array<i64: 2, 1, 128>}]} {
    %c0 = arith.constant 0 : index
    %c0_0 = arith.constant 0 : index
    %0 = vector.load %arg3[%c0, %c0_0] : memref<256x48xf32, #tpu.memory_space<vmem>>, vector<256x16xf32>
    %c0_1 = arith.constant 0 : index
    %c16 = arith.constant 16 : index
    %1 = vector.load %arg3[%c0_1, %c16] : memref<256x48xf32, #tpu.memory_space<vmem>>, vector<256x32xf32>
    %c0_2 = arith.constant 0 : index
    %c0_3 = arith.constant 0 : index
    %2 = vector.load %arg7[%c0_2, %c0_3] : memref<8x256xf32, #tpu.memory_space<vmem>>, vector<1x256xf32>
    %c1 = arith.constant 1 : index
    %c0_4 = arith.constant 0 : index
    %3 = vector.load %arg7[%c1, %c0_4] : memref<8x256xf32, #tpu.memory_space<vmem>>, vector<1x128xf32>
    %c2 = arith.constant 2 : index
    %c0_5 = arith.constant 0 : index
    %4 = vector.load %arg7[%c2, %c0_5] : memref<8x256xf32, #tpu.memory_space<vmem>>, vector<1x16xf32>
    %c3 = arith.constant 3 : index
    %c0_6 = arith.constant 0 : index
    %5 = vector.load %arg7[%c3, %c0_6] : memref<8x256xf32, #tpu.memory_space<vmem>>, vector<1x16xf32>
    %c4 = arith.constant 4 : index
    %c0_7 = arith.constant 0 : index
    %6 = vector.load %arg7[%c4, %c0_7] : memref<8x256xf32, #tpu.memory_space<vmem>>, vector<1x32xf32>
    %c0_8 = arith.constant 0 : index
    %c0_9 = arith.constant 0 : index
    %c0_10 = arith.constant 0 : index
    %7 = vector.load %arg4[%c0_8, %c0_9, %c0_10] : memref<6x32x32xf32, #tpu.memory_space<vmem>>, vector<1x32x32xf32>
    %8 = vector.shape_cast %7 : vector<1x32x32xf32> to vector<32x32xf32>
    %c1_11 = arith.constant 1 : index
    %c0_12 = arith.constant 0 : index
    %c0_13 = arith.constant 0 : index
    %9 = vector.load %arg4[%c1_11, %c0_12, %c0_13] : memref<6x32x32xf32, #tpu.memory_space<vmem>>, vector<1x32x32xf32>
    %10 = vector.shape_cast %9 : vector<1x32x32xf32> to vector<32x32xf32>
    %c2_14 = arith.constant 2 : index
    %c0_15 = arith.constant 0 : index
    %c0_16 = arith.constant 0 : index
    %11 = vector.load %arg4[%c2_14, %c0_15, %c0_16] : memref<6x32x32xf32, #tpu.memory_space<vmem>>, vector<1x32x32xf32>
    %12 = vector.shape_cast %11 : vector<1x32x32xf32> to vector<32x32xf32>
    %c3_17 = arith.constant 3 : index
    %c0_18 = arith.constant 0 : index
    %c0_19 = arith.constant 0 : index
    %13 = vector.load %arg4[%c3_17, %c0_18, %c0_19] : memref<6x32x32xf32, #tpu.memory_space<vmem>>, vector<1x32x32xf32>
    %14 = vector.shape_cast %13 : vector<1x32x32xf32> to vector<32x32xf32>
    %c4_20 = arith.constant 4 : index
    %c0_21 = arith.constant 0 : index
    %c0_22 = arith.constant 0 : index
    %15 = vector.load %arg4[%c4_20, %c0_21, %c0_22] : memref<6x32x32xf32, #tpu.memory_space<vmem>>, vector<1x32x32xf32>
    %16 = vector.shape_cast %15 : vector<1x32x32xf32> to vector<32x32xf32>
    %c5 = arith.constant 5 : index
    %c0_23 = arith.constant 0 : index
    %c0_24 = arith.constant 0 : index
    %17 = vector.load %arg4[%c5, %c0_23, %c0_24] : memref<6x32x32xf32, #tpu.memory_space<vmem>>, vector<1x32x32xf32>
    %18 = vector.shape_cast %17 : vector<1x32x32xf32> to vector<32x32xf32>
    %c0_25 = arith.constant 0 : index
    %c0_26 = arith.constant 0 : index
    %c0_27 = arith.constant 0 : index
    %19 = vector.load %arg5[%c0_25, %c0_26, %c0_27] : memref<2x16x32xf32, #tpu.memory_space<vmem>>, vector<1x16x32xf32>
    %20 = vector.shape_cast %19 : vector<1x16x32xf32> to vector<16x32xf32>
    %c1_28 = arith.constant 1 : index
    %c0_29 = arith.constant 0 : index
    %c0_30 = arith.constant 0 : index
    %21 = vector.load %arg5[%c1_28, %c0_29, %c0_30] : memref<2x16x32xf32, #tpu.memory_space<vmem>>, vector<1x16x32xf32>
    %22 = vector.shape_cast %21 : vector<1x16x32xf32> to vector<16x32xf32>
    %c0_31 = arith.constant 0 : index
    %c0_32 = arith.constant 0 : index
    %23 = vector.load %arg6[%c0_31, %c0_32] : memref<128x96xf32, #tpu.memory_space<vmem>>, vector<128x96xf32>
    %c0_33 = arith.constant 0 : index
    %c0_34 = arith.constant 0 : index
    %c0_35 = arith.constant 0 : index
    %24 = vector.load %arg1[%c0_33, %c0_34, %c0_35] : memref<1x40x16xf32, #tpu.memory_space<vmem>>, vector<1x40x16xf32>
    %25 = vector.shape_cast %24 : vector<1x40x16xf32> to vector<40x16xf32>
    %cst = arith.constant dense<0.000000e+00> : vector<40x256xf32>
    %26 = tpu.matmul %25, %0, %cst {dimension_numbers = #tpu.dot_dimension_numbers<[1], [1], [0], [0], [0, 0, 1, 0], [], []>} : vector<40x16xf32>, vector<256x16xf32>, vector<40x256xf32> -> vector<40x256xf32>
    %27 = vector.broadcast %2 : vector<1x256xf32> to vector<40x256xf32>
    %28 = arith.addf %26, %27 : vector<40x256xf32>
    %29 = tpu.iota {dimensions = array<i32: 0>} : vector<10x128xi32>
    %c5_i32 = arith.constant 5 : i32
    %c0_i32 = arith.constant 0 : i32
    %30 = arith.cmpi eq, %c5_i32, %c0_i32 : i32
    %c1_i32 = arith.constant 1 : i32
    %31 = arith.select %30, %c1_i32, %c5_i32 : i32
    %32 = vector.broadcast %31 : i32 to vector<10x128xi32>
    %33 = arith.remsi %29, %32 : vector<10x128xi32>
    %c0_i32_36 = arith.constant 0 : i32
    %34 = vector.broadcast %c0_i32_36 : i32 to vector<10x128xi32>
    %35 = arith.cmpi ne, %33, %34 : vector<10x128xi32>
    %c0_i32_37 = arith.constant 0 : i32
    %36 = vector.broadcast %c0_i32_37 : i32 to vector<10x128xi32>
    %37 = arith.cmpi slt, %33, %36 : vector<10x128xi32>
    %c0_i32_38 = arith.constant 0 : i32
    %38 = arith.cmpi slt, %31, %c0_i32_38 : i32
    %39 = vector.broadcast %38 : i1 to vector<10x128xi1>
    %40 = vector.broadcast %39 : vector<10x128xi1> to vector<10x128xi1>
    %41 = arith.xori %37, %40 : vector<10x128xi1>
    %42 = arith.andi %41, %35 : vector<10x128xi1>
    %43 = vector.broadcast %31 : i32 to vector<10x128xi32>
    %44 = arith.addi %33, %43 : vector<10x128xi32>
    %45 = arith.select %42, %44, %33 : vector<10x128xi1>, vector<10x128xi32>
    %c0_i32_39 = arith.constant 0 : i32
    %46 = vector.broadcast %c0_i32_39 : i32 to vector<10x128xi32>
    %47 = arith.cmpi eq, %45, %46 : vector<10x128xi32>
    %cst_40 = arith.constant 0.000000e+00 : f32
    %48 = vector.broadcast %cst_40 : f32 to vector<10x32xf32>
    %cst_41 = arith.constant 0.000000e+00 : f32
    %49 = vector.broadcast %cst_41 : f32 to vector<10x32xf32>
    %50 = vector.extract_strided_slice %28 {offsets = [0, 0], sizes = [10, 256], strides = [1, 1]} : vector<40x256xf32> to vector<10x256xf32>
    %cst_42 = arith.constant dense<0.000000e+00> : vector<10x256xf32>
    %51 = tpu.matmul %48, %1, %cst_42 {dimension_numbers = #tpu.dot_dimension_numbers<[1], [1], [0], [0], [0, 0, 1, 0], [], []>} : vector<10x32xf32>, vector<256x32xf32>, vector<10x256xf32> -> vector<10x256xf32>
    %52 = arith.addf %50, %51 : vector<10x256xf32>
    %53 = vector.extract_strided_slice %52 {offsets = [0, 0], sizes = [10, 128], strides = [1, 1]} : vector<10x256xf32> to vector<10x128xf32>
    %54 = vector.extract_strided_slice %52 {offsets = [0, 128], sizes = [10, 128], strides = [1, 1]} : vector<10x256xf32> to vector<10x128xf32>
    %55 = arith.select %47, %53, %54 : vector<10x128xi1>, vector<10x128xf32>
    %cst_43 = arith.constant 0.000000e+00 : f32
    %56 = vector.broadcast %cst_43 : f32 to vector<10x128xf32>
    %57 = arith.subf %56, %55 : vector<10x128xf32>
    %58 = math.exp %57 : vector<10x128xf32>
    %cst_44 = arith.constant 1.000000e+00 : f32
    %59 = vector.broadcast %cst_44 : f32 to vector<10x128xf32>
    %60 = arith.addf %59, %58 : vector<10x128xf32>
    %61 = tpu.reciprocal %60 {approx = true} : vector<10x128xf32> -> vector<10x128xf32>
    %62 = math.tanh %55 : vector<10x128xf32>
    %63 = vector.extract_strided_slice %61 {offsets = [0, 32], sizes = [10, 32], strides = [1, 1]} : vector<10x128xf32> to vector<10x32xf32>
    %64 = arith.mulf %63, %49 : vector<10x32xf32>
    %65 = vector.extract_strided_slice %61 {offsets = [0, 0], sizes = [10, 32], strides = [1, 1]} : vector<10x128xf32> to vector<10x32xf32>
    %66 = vector.extract_strided_slice %62 {offsets = [0, 64], sizes = [10, 32], strides = [1, 1]} : vector<10x128xf32> to vector<10x32xf32>
    %67 = arith.mulf %65, %66 : vector<10x32xf32>
    %68 = arith.addf %64, %67 : vector<10x32xf32>
    %69 = vector.extract_strided_slice %61 {offsets = [0, 96], sizes = [10, 32], strides = [1, 1]} : vector<10x128xf32> to vector<10x32xf32>
    %70 = math.tanh %68 : vector<10x32xf32>
    %71 = arith.mulf %69, %70 : vector<10x32xf32>
    %72 = vector.extract_strided_slice %28 {offsets = [10, 0], sizes = [10, 256], strides = [1, 1]} : vector<40x256xf32> to vector<10x256xf32>
    %cst_45 = arith.constant dense<0.000000e+00> : vector<10x256xf32>
    %73 = tpu.matmul %71, %1, %cst_45 {dimension_numbers = #tpu.dot_dimension_numbers<[1], [1], [0], [0], [0, 0, 1, 0], [], []>} : vector<10x32xf32>, vector<256x32xf32>, vector<10x256xf32> -> vector<10x256xf32>
    %74 = arith.addf %72, %73 : vector<10x256xf32>
    %75 = vector.extract_strided_slice %74 {offsets = [0, 0], sizes = [10, 128], strides = [1, 1]} : vector<10x256xf32> to vector<10x128xf32>
    %76 = vector.extract_strided_slice %74 {offsets = [0, 128], sizes = [10, 128], strides = [1, 1]} : vector<10x256xf32> to vector<10x128xf32>
    %77 = arith.select %47, %75, %76 : vector<10x128xi1>, vector<10x128xf32>
    %cst_46 = arith.constant 0.000000e+00 : f32
    %78 = vector.broadcast %cst_46 : f32 to vector<10x128xf32>
    %79 = arith.subf %78, %77 : vector<10x128xf32>
    %80 = math.exp %79 : vector<10x128xf32>
    %cst_47 = arith.constant 1.000000e+00 : f32
    %81 = vector.broadcast %cst_47 : f32 to vector<10x128xf32>
    %82 = arith.addf %81, %80 : vector<10x128xf32>
    %83 = tpu.reciprocal %82 {approx = true} : vector<10x128xf32> -> vector<10x128xf32>
    %84 = math.tanh %77 : vector<10x128xf32>
    %85 = vector.extract_strided_slice %83 {offsets = [0, 32], sizes = [10, 32], strides = [1, 1]} : vector<10x128xf32> to vector<10x32xf32>
    %86 = arith.mulf %85, %68 : vector<10x32xf32>
    %87 = vector.extract_strided_slice %83 {offsets = [0, 0], sizes = [10, 32], strides = [1, 1]} : vector<10x128xf32> to vector<10x32xf32>
    %88 = vector.extract_strided_slice %84 {offsets = [0, 64], sizes = [10, 32], strides = [1, 1]} : vector<10x128xf32> to vector<10x32xf32>
    %89 = arith.mulf %87, %88 : vector<10x32xf32>
    %90 = arith.addf %86, %89 : vector<10x32xf32>
    %91 = vector.extract_strided_slice %83 {offsets = [0, 96], sizes = [10, 32], strides = [1, 1]} : vector<10x128xf32> to vector<10x32xf32>
    %92 = math.tanh %90 : vector<10x32xf32>
    %93 = arith.mulf %91, %92 : vector<10x32xf32>
    %94 = vector.extract_strided_slice %28 {offsets = [20, 0], sizes = [10, 256], strides = [1, 1]} : vector<40x256xf32> to vector<10x256xf32>
    %cst_48 = arith.constant dense<0.000000e+00> : vector<10x256xf32>
    %95 = tpu.matmul %93, %1, %cst_48 {dimension_numbers = #tpu.dot_dimension_numbers<[1], [1], [0], [0], [0, 0, 1, 0], [], []>} : vector<10x32xf32>, vector<256x32xf32>, vector<10x256xf32> -> vector<10x256xf32>
    %96 = arith.addf %94, %95 : vector<10x256xf32>
    %97 = vector.extract_strided_slice %96 {offsets = [0, 0], sizes = [10, 128], strides = [1, 1]} : vector<10x256xf32> to vector<10x128xf32>
    %98 = vector.extract_strided_slice %96 {offsets = [0, 128], sizes = [10, 128], strides = [1, 1]} : vector<10x256xf32> to vector<10x128xf32>
    %99 = arith.select %47, %97, %98 : vector<10x128xi1>, vector<10x128xf32>
    %cst_49 = arith.constant 0.000000e+00 : f32
    %100 = vector.broadcast %cst_49 : f32 to vector<10x128xf32>
    %101 = arith.subf %100, %99 : vector<10x128xf32>
    %102 = math.exp %101 : vector<10x128xf32>
    %cst_50 = arith.constant 1.000000e+00 : f32
    %103 = vector.broadcast %cst_50 : f32 to vector<10x128xf32>
    %104 = arith.addf %103, %102 : vector<10x128xf32>
    %105 = tpu.reciprocal %104 {approx = true} : vector<10x128xf32> -> vector<10x128xf32>
    %106 = math.tanh %99 : vector<10x128xf32>
    %107 = vector.extract_strided_slice %105 {offsets = [0, 32], sizes = [10, 32], strides = [1, 1]} : vector<10x128xf32> to vector<10x32xf32>
    %108 = arith.mulf %107, %90 : vector<10x32xf32>
    %109 = vector.extract_strided_slice %105 {offsets = [0, 0], sizes = [10, 32], strides = [1, 1]} : vector<10x128xf32> to vector<10x32xf32>
    %110 = vector.extract_strided_slice %106 {offsets = [0, 64], sizes = [10, 32], strides = [1, 1]} : vector<10x128xf32> to vector<10x32xf32>
    %111 = arith.mulf %109, %110 : vector<10x32xf32>
    %112 = arith.addf %108, %111 : vector<10x32xf32>
    %113 = vector.extract_strided_slice %105 {offsets = [0, 96], sizes = [10, 32], strides = [1, 1]} : vector<10x128xf32> to vector<10x32xf32>
    %114 = math.tanh %112 : vector<10x32xf32>
    %115 = arith.mulf %113, %114 : vector<10x32xf32>
    %116 = vector.extract_strided_slice %28 {offsets = [30, 0], sizes = [10, 256], strides = [1, 1]} : vector<40x256xf32> to vector<10x256xf32>
    %cst_51 = arith.constant dense<0.000000e+00> : vector<10x256xf32>
    %117 = tpu.matmul %115, %1, %cst_51 {dimension_numbers = #tpu.dot_dimension_numbers<[1], [1], [0], [0], [0, 0, 1, 0], [], []>} : vector<10x32xf32>, vector<256x32xf32>, vector<10x256xf32> -> vector<10x256xf32>
    %118 = arith.addf %116, %117 : vector<10x256xf32>
    %119 = vector.extract_strided_slice %118 {offsets = [0, 0], sizes = [10, 128], strides = [1, 1]} : vector<10x256xf32> to vector<10x128xf32>
    %120 = vector.extract_strided_slice %118 {offsets = [0, 128], sizes = [10, 128], strides = [1, 1]} : vector<10x256xf32> to vector<10x128xf32>
    %121 = arith.select %47, %119, %120 : vector<10x128xi1>, vector<10x128xf32>
    %cst_52 = arith.constant 0.000000e+00 : f32
    %122 = vector.broadcast %cst_52 : f32 to vector<10x128xf32>
    %123 = arith.subf %122, %121 : vector<10x128xf32>
    %124 = math.exp %123 : vector<10x128xf32>
    %cst_53 = arith.constant 1.000000e+00 : f32
    %125 = vector.broadcast %cst_53 : f32 to vector<10x128xf32>
    %126 = arith.addf %125, %124 : vector<10x128xf32>
    %127 = tpu.reciprocal %126 {approx = true} : vector<10x128xf32> -> vector<10x128xf32>
    %128 = math.tanh %121 : vector<10x128xf32>
    %129 = vector.extract_strided_slice %127 {offsets = [0, 32], sizes = [10, 32], strides = [1, 1]} : vector<10x128xf32> to vector<10x32xf32>
    %130 = arith.mulf %129, %112 : vector<10x32xf32>
    %131 = vector.extract_strided_slice %127 {offsets = [0, 0], sizes = [10, 32], strides = [1, 1]} : vector<10x128xf32> to vector<10x32xf32>
    %132 = vector.extract_strided_slice %128 {offsets = [0, 64], sizes = [10, 32], strides = [1, 1]} : vector<10x128xf32> to vector<10x32xf32>
    %133 = arith.mulf %131, %132 : vector<10x32xf32>
    %134 = arith.addf %130, %133 : vector<10x32xf32>
    %135 = vector.extract_strided_slice %127 {offsets = [0, 96], sizes = [10, 32], strides = [1, 1]} : vector<10x128xf32> to vector<10x32xf32>
    %136 = math.tanh %134 : vector<10x32xf32>
    %137 = arith.mulf %135, %136 : vector<10x32xf32>
    %138 = vector.shape_cast %71 : vector<10x32xf32> to vector<10x1x32xf32>
    %139 = vector.shape_cast %93 : vector<10x32xf32> to vector<10x1x32xf32>
    %140 = vector.shape_cast %115 : vector<10x32xf32> to vector<10x1x32xf32>
    %141 = vector.shape_cast %137 : vector<10x32xf32> to vector<10x1x32xf32>
    %142 = tpu.concatenate %138, %139, %140, %141 in 1 : vector<10x1x32xf32>, vector<10x1x32xf32>, vector<10x1x32xf32>, vector<10x1x32xf32> -> vector<10x4x32xf32>
    %c0_54 = arith.constant 0 : index
    %c0_55 = arith.constant 0 : index
    %c0_56 = arith.constant 0 : index
    %143 = vector.load %arg2[%c0_54, %c0_55, %c0_56] : memref<2x5x5xf32, #tpu.memory_space<vmem>>, vector<1x5x5xf32>
    %144 = vector.shape_cast %143 : vector<1x5x5xf32> to vector<5x5xf32>
    %145 = vector.extract_strided_slice %137 {offsets = [0, 0], sizes = [5, 32], strides = [1, 1]} : vector<10x32xf32> to vector<5x32xf32>
    %146 = vector.extract_strided_slice %142 {offsets = [0, 0, 0], sizes = [1, 4, 32], strides = [1, 1, 1]} : vector<10x4x32xf32> to vector<1x4x32xf32>
    %147 = vector.shape_cast %146 : vector<1x4x32xf32> to vector<4x32xf32>
    %148 = vector.extract_strided_slice %142 {offsets = [1, 0, 0], sizes = [1, 4, 32], strides = [1, 1, 1]} : vector<10x4x32xf32> to vector<1x4x32xf32>
    %149 = vector.shape_cast %148 : vector<1x4x32xf32> to vector<4x32xf32>
    %150 = vector.extract_strided_slice %142 {offsets = [2, 0, 0], sizes = [1, 4, 32], strides = [1, 1, 1]} : vector<10x4x32xf32> to vector<1x4x32xf32>
    %151 = vector.shape_cast %150 : vector<1x4x32xf32> to vector<4x32xf32>
    %152 = vector.extract_strided_slice %142 {offsets = [3, 0, 0], sizes = [1, 4, 32], strides = [1, 1, 1]} : vector<10x4x32xf32> to vector<1x4x32xf32>
    %153 = vector.shape_cast %152 : vector<1x4x32xf32> to vector<4x32xf32>
    %154 = tpu.concatenate %147, %149, %151, %153 in 0 : vector<4x32xf32>, vector<4x32xf32>, vector<4x32xf32>, vector<4x32xf32> -> vector<16x32xf32>
    %cst_57 = arith.constant dense<0.000000e+00> : vector<5x32xf32>
    %155 = tpu.matmul %145, %8, %cst_57 {dimension_numbers = #tpu.dot_dimension_numbers<[1], [0], [0], [1], [0, 0, 1, 1], [], []>} : vector<5x32xf32>, vector<32x32xf32>, vector<5x32xf32> -> vector<5x32xf32>
    %cst_58 = arith.constant dense<0.000000e+00> : vector<5x32xf32>
    %156 = tpu.matmul %144, %155, %cst_58 {dimension_numbers = #tpu.dot_dimension_numbers<[1], [0], [0], [1], [0, 0, 1, 1], [], []>} : vector<5x5xf32>, vector<5x32xf32>, vector<5x32xf32> -> vector<5x32xf32>
    %157 = math.tanh %156 : vector<5x32xf32>
    %cst_59 = arith.constant dense<0.000000e+00> : vector<5x32xf32>
    %158 = tpu.matmul %157, %10, %cst_59 {dimension_numbers = #tpu.dot_dimension_numbers<[1], [0], [0], [1], [0, 0, 1, 1], [], []>} : vector<5x32xf32>, vector<32x32xf32>, vector<5x32xf32> -> vector<5x32xf32>
    %cst_60 = arith.constant dense<0.000000e+00> : vector<5x32xf32>
    %159 = tpu.matmul %144, %158, %cst_60 {dimension_numbers = #tpu.dot_dimension_numbers<[1], [0], [0], [1], [0, 0, 1, 1], [], []>} : vector<5x5xf32>, vector<5x32xf32>, vector<5x32xf32> -> vector<5x32xf32>
    %160 = math.tanh %159 : vector<5x32xf32>
    %161 = vector.extract_strided_slice %160 {offsets = [1, 0], sizes = [4, 32], strides = [1, 1]} : vector<5x32xf32> to vector<4x32xf32>
    %cst_61 = arith.constant dense<0.000000e+00> : vector<4x4xf32>
    %162 = tpu.matmul %161, %161, %cst_61 {dimension_numbers = #tpu.dot_dimension_numbers<[1], [1], [0], [0], [0, 0, 1, 0], [], []>} : vector<4x32xf32>, vector<4x32xf32>, vector<4x4xf32> -> vector<4x4xf32>
    %cst_62 = arith.constant 0.0577350259 : f32
    %163 = vector.broadcast %cst_62 : f32 to vector<4x4xf32>
    %164 = arith.mulf %162, %163 : vector<4x4xf32>
    %cst_63 = arith.constant dense<0xFF800000> : vector<4xf32>
    %165 = vector.multi_reduction <maximumf>, %164, %cst_63 [1] : vector<4x4xf32> to vector<4xf32>
    %166 = vector.shape_cast %165 : vector<4xf32> to vector<4x1xf32>
    %167 = vector.broadcast %166 : vector<4x1xf32> to vector<4x4xf32>
    %168 = arith.subf %164, %167 : vector<4x4xf32>
    %169 = math.exp %168 : vector<4x4xf32>
    %cst_64 = arith.constant dense<0.000000e+00> : vector<4xf32>
    %170 = vector.multi_reduction <add>, %169, %cst_64 [1] : vector<4x4xf32> to vector<4xf32>
    %171 = vector.shape_cast %170 : vector<4xf32> to vector<4x1xf32>
    %172 = vector.broadcast %171 : vector<4x1xf32> to vector<4x4xf32>
    %173 = arith.divf %169, %172 : vector<4x4xf32>
    %cst_65 = arith.constant dense<0.000000e+00> : vector<4x32xf32>
    %174 = tpu.matmul %173, %161, %cst_65 {dimension_numbers = #tpu.dot_dimension_numbers<[1], [0], [0], [1], [0, 0, 1, 1], [], []>} : vector<4x4xf32>, vector<4x32xf32>, vector<4x32xf32> -> vector<4x32xf32>
    %cst_66 = arith.constant dense<0.000000e+00> : vector<32x16xf32>
    %175 = tpu.matmul %12, %154, %cst_66 {dimension_numbers = #tpu.dot_dimension_numbers<[1], [1], [0], [0], [0, 0, 1, 0], [], []>} : vector<32x32xf32>, vector<16x32xf32>, vector<32x16xf32> -> vector<32x16xf32>
    %cst_67 = arith.constant dense<0.000000e+00> : vector<4x16xf32>
    %176 = tpu.matmul %174, %175, %cst_67 {dimension_numbers = #tpu.dot_dimension_numbers<[1], [0], [0], [1], [0, 0, 1, 1], [], []>} : vector<4x32xf32>, vector<32x16xf32>, vector<4x16xf32> -> vector<4x16xf32>
    %177 = math.tanh %176 : vector<4x16xf32>
    %cst_68 = arith.constant dense<0.000000e+00> : vector<16x16xf32>
    %178 = tpu.matmul %20, %154, %cst_68 {dimension_numbers = #tpu.dot_dimension_numbers<[1], [1], [0], [0], [0, 0, 1, 0], [], []>} : vector<16x32xf32>, vector<16x32xf32>, vector<16x16xf32> -> vector<16x16xf32>
    %cst_69 = arith.constant dense<0.000000e+00> : vector<16x4xf32>
    %179 = tpu.matmul %22, %174, %cst_69 {dimension_numbers = #tpu.dot_dimension_numbers<[1], [1], [0], [0], [0, 0, 1, 0], [], []>} : vector<16x32xf32>, vector<4x32xf32>, vector<16x4xf32> -> vector<16x4xf32>
    %cst_70 = arith.constant dense<0.000000e+00> : vector<16x16xf32>
    %180 = tpu.matmul %179, %177, %cst_70 {dimension_numbers = #tpu.dot_dimension_numbers<[1], [0], [0], [1], [0, 0, 1, 1], [], []>} : vector<16x4xf32>, vector<4x16xf32>, vector<16x16xf32> -> vector<16x16xf32>
    %181 = arith.addf %178, %180 : vector<16x16xf32>
    %182 = math.tanh %181 : vector<16x16xf32>
    %cst_71 = arith.constant dense<0.000000e+00> : vector<16x4xf32>
    %183 = tpu.matmul %178, %177, %cst_71 {dimension_numbers = #tpu.dot_dimension_numbers<[1], [1], [0], [0], [0, 0, 1, 0], [], []>} : vector<16x16xf32>, vector<4x16xf32>, vector<16x4xf32> -> vector<16x4xf32>
    %184 = arith.addf %179, %183 : vector<16x4xf32>
    %185 = math.tanh %184 : vector<16x4xf32>
    %cst_72 = arith.constant dense<0.000000e+00> : vector<1x4xf32>
    %186 = tpu.matmul %4, %185, %cst_72 {dimension_numbers = #tpu.dot_dimension_numbers<[1], [0], [0], [1], [0, 0, 1, 1], [], []>} : vector<1x16xf32>, vector<16x4xf32>, vector<1x4xf32> -> vector<1x4xf32>
    %cst_73 = arith.constant dense<0xFF800000> : vector<1xf32>
    %187 = vector.multi_reduction <maximumf>, %186, %cst_73 [1] : vector<1x4xf32> to vector<1xf32>
    %188 = vector.shape_cast %187 : vector<1xf32> to vector<1x1xf32>
    %189 = vector.broadcast %188 : vector<1x1xf32> to vector<1x4xf32>
    %190 = arith.subf %186, %189 : vector<1x4xf32>
    %191 = math.exp %190 : vector<1x4xf32>
    %cst_74 = arith.constant dense<0.000000e+00> : vector<1xf32>
    %192 = vector.multi_reduction <add>, %191, %cst_74 [1] : vector<1x4xf32> to vector<1xf32>
    %193 = vector.shape_cast %192 : vector<1xf32> to vector<1x1xf32>
    %194 = vector.broadcast %193 : vector<1x1xf32> to vector<1x4xf32>
    %195 = arith.divf %191, %194 : vector<1x4xf32>
    %cst_75 = arith.constant dense<0.000000e+00> : vector<1x16xf32>
    %196 = tpu.matmul %5, %182, %cst_75 {dimension_numbers = #tpu.dot_dimension_numbers<[1], [0], [0], [1], [0, 0, 1, 1], [], []>} : vector<1x16xf32>, vector<16x16xf32>, vector<1x16xf32> -> vector<1x16xf32>
    %cst_76 = arith.constant dense<0xFF800000> : vector<1xf32>
    %197 = vector.multi_reduction <maximumf>, %196, %cst_76 [1] : vector<1x16xf32> to vector<1xf32>
    %198 = vector.shape_cast %197 : vector<1xf32> to vector<1x1xf32>
    %199 = vector.broadcast %198 : vector<1x1xf32> to vector<1x16xf32>
    %200 = arith.subf %196, %199 : vector<1x16xf32>
    %201 = math.exp %200 : vector<1x16xf32>
    %cst_77 = arith.constant dense<0.000000e+00> : vector<1xf32>
    %202 = vector.multi_reduction <add>, %201, %cst_77 [1] : vector<1x16xf32> to vector<1xf32>
    %203 = vector.shape_cast %202 : vector<1xf32> to vector<1x1xf32>
    %204 = vector.broadcast %203 : vector<1x1xf32> to vector<1x16xf32>
    %205 = arith.divf %201, %204 : vector<1x16xf32>
    %cst_78 = arith.constant dense<0.000000e+00> : vector<1x32xf32>
    %206 = tpu.matmul %205, %154, %cst_78 {dimension_numbers = #tpu.dot_dimension_numbers<[1], [0], [0], [1], [0, 0, 1, 1], [], []>} : vector<1x16xf32>, vector<16x32xf32>, vector<1x32xf32> -> vector<1x32xf32>
    %207 = vector.extract_strided_slice %195 {offsets = [0, 3], sizes = [1, 1], strides = [1, 1]} : vector<1x4xf32> to vector<1x1xf32>
    %208 = vector.extract_strided_slice %174 {offsets = [3, 0], sizes = [1, 32], strides = [1, 1]} : vector<4x32xf32> to vector<1x32xf32>
    %209 = vector.broadcast %207 : vector<1x1xf32> to vector<1x32xf32>
    %210 = arith.mulf %209, %208 : vector<1x32xf32>
    %211 = vector.extract_strided_slice %145 {offsets = [1, 0], sizes = [4, 32], strides = [1, 1]} : vector<5x32xf32> to vector<4x32xf32>
    %cst_79 = arith.constant dense<0.000000e+00> : vector<4x32xf32>
    %212 = tpu.matmul %211, %14, %cst_79 {dimension_numbers = #tpu.dot_dimension_numbers<[1], [1], [0], [0], [0, 0, 1, 0], [], []>} : vector<4x32xf32>, vector<32x32xf32>, vector<4x32xf32> -> vector<4x32xf32>
    %cst_80 = arith.constant dense<0.000000e+00> : vector<4x32xf32>
    %213 = tpu.matmul %211, %16, %cst_80 {dimension_numbers = #tpu.dot_dimension_numbers<[1], [1], [0], [0], [0, 0, 1, 0], [], []>} : vector<4x32xf32>, vector<32x32xf32>, vector<4x32xf32> -> vector<4x32xf32>
    %cst_81 = arith.constant dense<0.000000e+00> : vector<4x32xf32>
    %214 = tpu.matmul %211, %18, %cst_81 {dimension_numbers = #tpu.dot_dimension_numbers<[1], [1], [0], [0], [0, 0, 1, 0], [], []>} : vector<4x32xf32>, vector<32x32xf32>, vector<4x32xf32> -> vector<4x32xf32>
    %215 = tpu.iota {dimensions = array<i32: 0>} : vector<4x32xi32>
    %c1_i32_82 = arith.constant 1 : i32
    %216 = vector.broadcast %c1_i32_82 : i32 to vector<4x32xi32>
    %217 = arith.cmpi sge, %215, %216 : vector<4x32xi32>
    %c1_i32_83 = arith.constant 1 : i32
    %218 = tpu.dynamic_rotate %212 by %c1_i32_83 dim 0 : vector<4x32xf32>, i32 -> vector<4x32xf32>
    %cst_84 = arith.constant 0.000000e+00 : f32
    %219 = vector.broadcast %cst_84 : f32 to vector<4x32xf32>
    %220 = arith.select %217, %218, %219 : vector<4x32xi1>, vector<4x32xf32>
    %c2_i32 = arith.constant 2 : i32
    %221 = vector.broadcast %c2_i32 : i32 to vector<4x32xi32>
    %222 = arith.cmpi sle, %215, %221 : vector<4x32xi32>
    %c3_i32 = arith.constant 3 : i32
    %223 = tpu.dynamic_rotate %214 by %c3_i32 dim 0 : vector<4x32xf32>, i32 -> vector<4x32xf32>
    %cst_85 = arith.constant 0.000000e+00 : f32
    %224 = vector.broadcast %cst_85 : f32 to vector<4x32xf32>
    %225 = arith.select %222, %223, %224 : vector<4x32xi1>, vector<4x32xf32>
    %226 = arith.addf %220, %213 : vector<4x32xf32>
    %227 = arith.addf %226, %225 : vector<4x32xf32>
    %228 = vector.broadcast %6 : vector<1x32xf32> to vector<4x32xf32>
    %229 = arith.addf %227, %228 : vector<4x32xf32>
    %cst_86 = arith.constant 0.000000e+00 : f32
    %230 = vector.broadcast %cst_86 : f32 to vector<4x32xf32>
    %231 = arith.maximumf %229, %230 : vector<4x32xf32>
    %cst_87 = arith.constant dense<0xFF800000> : vector<32xf32>
    %232 = vector.multi_reduction <maximumf>, %231, %cst_87 [0] : vector<4x32xf32> to vector<32xf32>
    %233 = vector.shape_cast %232 : vector<32xf32> to vector<1x32xf32>
    %234 = tpu.concatenate %206, %210, %233 in 1 : vector<1x32xf32>, vector<1x32xf32>, vector<1x32xf32> -> vector<1x96xf32>
    %cst_88 = arith.constant dense<0.000000e+00> : vector<1x128xf32>
    %235 = tpu.matmul %234, %23, %cst_88 {dimension_numbers = #tpu.dot_dimension_numbers<[1], [1], [0], [0], [0, 0, 1, 0], [], []>} : vector<1x96xf32>, vector<128x96xf32>, vector<1x128xf32> -> vector<1x128xf32>
    %236 = arith.addf %235, %3 : vector<1x128xf32>
    %c0_89 = arith.constant 0 : index
    %c0_90 = arith.constant 0 : index
    %c0_91 = arith.constant 0 : index
    %237 = vector.load %arg8[%c0_89, %c0_90, %c0_91] : memref<2x1x128xf32, #tpu.memory_space<vmem>>, vector<1x1x128xf32>
    %238 = vector.shape_cast %237 : vector<1x1x128xf32> to vector<1x128xf32>
    %239 = vector.shape_cast %236 : vector<1x128xf32> to vector<1x1x128xf32>
    tpu.vector_store %arg8[%c0_89, %c0_90, %c0_91], %239 {strides = array<i32>} : memref<2x1x128xf32, #tpu.memory_space<vmem>>, vector<1x1x128xf32>,
    %c1_92 = arith.constant 1 : index
    %c0_93 = arith.constant 0 : index
    %c0_94 = arith.constant 0 : index
    %240 = vector.load %arg2[%c1_92, %c0_93, %c0_94] : memref<2x5x5xf32, #tpu.memory_space<vmem>>, vector<1x5x5xf32>
    %241 = vector.shape_cast %240 : vector<1x5x5xf32> to vector<5x5xf32>
    %242 = vector.extract_strided_slice %137 {offsets = [5, 0], sizes = [5, 32], strides = [1, 1]} : vector<10x32xf32> to vector<5x32xf32>
    %243 = vector.extract_strided_slice %142 {offsets = [5, 0, 0], sizes = [1, 4, 32], strides = [1, 1, 1]} : vector<10x4x32xf32> to vector<1x4x32xf32>
    %244 = vector.shape_cast %243 : vector<1x4x32xf32> to vector<4x32xf32>
    %245 = vector.extract_strided_slice %142 {offsets = [6, 0, 0], sizes = [1, 4, 32], strides = [1, 1, 1]} : vector<10x4x32xf32> to vector<1x4x32xf32>
    %246 = vector.shape_cast %245 : vector<1x4x32xf32> to vector<4x32xf32>
    %247 = vector.extract_strided_slice %142 {offsets = [7, 0, 0], sizes = [1, 4, 32], strides = [1, 1, 1]} : vector<10x4x32xf32> to vector<1x4x32xf32>
    %248 = vector.shape_cast %247 : vector<1x4x32xf32> to vector<4x32xf32>
    %249 = vector.extract_strided_slice %142 {offsets = [8, 0, 0], sizes = [1, 4, 32], strides = [1, 1, 1]} : vector<10x4x32xf32> to vector<1x4x32xf32>
    %250 = vector.shape_cast %249 : vector<1x4x32xf32> to vector<4x32xf32>
    %251 = tpu.concatenate %244, %246, %248, %250 in 0 : vector<4x32xf32>, vector<4x32xf32>, vector<4x32xf32>, vector<4x32xf32> -> vector<16x32xf32>
    %cst_95 = arith.constant dense<0.000000e+00> : vector<5x32xf32>
    %252 = tpu.matmul %242, %8, %cst_95 {dimension_numbers = #tpu.dot_dimension_numbers<[1], [0], [0], [1], [0, 0, 1, 1], [], []>} : vector<5x32xf32>, vector<32x32xf32>, vector<5x32xf32> -> vector<5x32xf32>
    %cst_96 = arith.constant dense<0.000000e+00> : vector<5x32xf32>
    %253 = tpu.matmul %241, %252, %cst_96 {dimension_numbers = #tpu.dot_dimension_numbers<[1], [0], [0], [1], [0, 0, 1, 1], [], []>} : vector<5x5xf32>, vector<5x32xf32>, vector<5x32xf32> -> vector<5x32xf32>
    %254 = math.tanh %253 : vector<5x32xf32>
    %cst_97 = arith.constant dense<0.000000e+00> : vector<5x32xf32>
    %255 = tpu.matmul %254, %10, %cst_97 {dimension_numbers = #tpu.dot_dimension_numbers<[1], [0], [0], [1], [0, 0, 1, 1], [], []>} : vector<5x32xf32>, vector<32x32xf32>, vector<5x32xf32> -> vector<5x32xf32>
    %cst_98 = arith.constant dense<0.000000e+00> : vector<5x32xf32>
    %256 = tpu.matmul %241, %255, %cst_98 {dimension_numbers = #tpu.dot_dimension_numbers<[1], [0], [0], [1], [0, 0, 1, 1], [], []>} : vector<5x5xf32>, vector<5x32xf32>, vector<5x32xf32> -> vector<5x32xf32>
    %257 = math.tanh %256 : vector<5x32xf32>
    %258 = vector.extract_strided_slice %257 {offsets = [1, 0], sizes = [4, 32], strides = [1, 1]} : vector<5x32xf32> to vector<4x32xf32>
    %cst_99 = arith.constant dense<0.000000e+00> : vector<4x4xf32>
    %259 = tpu.matmul %258, %258, %cst_99 {dimension_numbers = #tpu.dot_dimension_numbers<[1], [1], [0], [0], [0, 0, 1, 0], [], []>} : vector<4x32xf32>, vector<4x32xf32>, vector<4x4xf32> -> vector<4x4xf32>
    %cst_100 = arith.constant 0.0577350259 : f32
    %260 = vector.broadcast %cst_100 : f32 to vector<4x4xf32>
    %261 = arith.mulf %259, %260 : vector<4x4xf32>
    %cst_101 = arith.constant dense<0xFF800000> : vector<4xf32>
    %262 = vector.multi_reduction <maximumf>, %261, %cst_101 [1] : vector<4x4xf32> to vector<4xf32>
    %263 = vector.shape_cast %262 : vector<4xf32> to vector<4x1xf32>
    %264 = vector.broadcast %263 : vector<4x1xf32> to vector<4x4xf32>
    %265 = arith.subf %261, %264 : vector<4x4xf32>
    %266 = math.exp %265 : vector<4x4xf32>
    %cst_102 = arith.constant dense<0.000000e+00> : vector<4xf32>
    %267 = vector.multi_reduction <add>, %266, %cst_102 [1] : vector<4x4xf32> to vector<4xf32>
    %268 = vector.shape_cast %267 : vector<4xf32> to vector<4x1xf32>
    %269 = vector.broadcast %268 : vector<4x1xf32> to vector<4x4xf32>
    %270 = arith.divf %266, %269 : vector<4x4xf32>
    %cst_103 = arith.constant dense<0.000000e+00> : vector<4x32xf32>
    %271 = tpu.matmul %270, %258, %cst_103 {dimension_numbers = #tpu.dot_dimension_numbers<[1], [0], [0], [1], [0, 0, 1, 1], [], []>} : vector<4x4xf32>, vector<4x32xf32>, vector<4x32xf32> -> vector<4x32xf32>
    %cst_104 = arith.constant dense<0.000000e+00> : vector<32x16xf32>
    %272 = tpu.matmul %12, %251, %cst_104 {dimension_numbers = #tpu.dot_dimension_numbers<[1], [1], [0], [0], [0, 0, 1, 0], [], []>} : vector<32x32xf32>, vector<16x32xf32>, vector<32x16xf32> -> vector<32x16xf32>
    %cst_105 = arith.constant dense<0.000000e+00> : vector<4x16xf32>
    %273 = tpu.matmul %271, %272, %cst_105 {dimension_numbers = #tpu.dot_dimension_numbers<[1], [0], [0], [1], [0, 0, 1, 1], [], []>} : vector<4x32xf32>, vector<32x16xf32>, vector<4x16xf32> -> vector<4x16xf32>
    %274 = math.tanh %273 : vector<4x16xf32>
    %cst_106 = arith.constant dense<0.000000e+00> : vector<16x16xf32>
    %275 = tpu.matmul %20, %251, %cst_106 {dimension_numbers = #tpu.dot_dimension_numbers<[1], [1], [0], [0], [0, 0, 1, 0], [], []>} : vector<16x32xf32>, vector<16x32xf32>, vector<16x16xf32> -> vector<16x16xf32>
    %cst_107 = arith.constant dense<0.000000e+00> : vector<16x4xf32>
    %276 = tpu.matmul %22, %271, %cst_107 {dimension_numbers = #tpu.dot_dimension_numbers<[1], [1], [0], [0], [0, 0, 1, 0], [], []>} : vector<16x32xf32>, vector<4x32xf32>, vector<16x4xf32> -> vector<16x4xf32>
    %cst_108 = arith.constant dense<0.000000e+00> : vector<16x16xf32>
    %277 = tpu.matmul %276, %274, %cst_108 {dimension_numbers = #tpu.dot_dimension_numbers<[1], [0], [0], [1], [0, 0, 1, 1], [], []>} : vector<16x4xf32>, vector<4x16xf32>, vector<16x16xf32> -> vector<16x16xf32>
    %278 = arith.addf %275, %277 : vector<16x16xf32>
    %279 = math.tanh %278 : vector<16x16xf32>
    %cst_109 = arith.constant dense<0.000000e+00> : vector<16x4xf32>
    %280 = tpu.matmul %275, %274, %cst_109 {dimension_numbers = #tpu.dot_dimension_numbers<[1], [1], [0], [0], [0, 0, 1, 0], [], []>} : vector<16x16xf32>, vector<4x16xf32>, vector<16x4xf32> -> vector<16x4xf32>
    %281 = arith.addf %276, %280 : vector<16x4xf32>
    %282 = math.tanh %281 : vector<16x4xf32>
    %cst_110 = arith.constant dense<0.000000e+00> : vector<1x4xf32>
    %283 = tpu.matmul %4, %282, %cst_110 {dimension_numbers = #tpu.dot_dimension_numbers<[1], [0], [0], [1], [0, 0, 1, 1], [], []>} : vector<1x16xf32>, vector<16x4xf32>, vector<1x4xf32> -> vector<1x4xf32>
    %cst_111 = arith.constant dense<0xFF800000> : vector<1xf32>
    %284 = vector.multi_reduction <maximumf>, %283, %cst_111 [1] : vector<1x4xf32> to vector<1xf32>
    %285 = vector.shape_cast %284 : vector<1xf32> to vector<1x1xf32>
    %286 = vector.broadcast %285 : vector<1x1xf32> to vector<1x4xf32>
    %287 = arith.subf %283, %286 : vector<1x4xf32>
    %288 = math.exp %287 : vector<1x4xf32>
    %cst_112 = arith.constant dense<0.000000e+00> : vector<1xf32>
    %289 = vector.multi_reduction <add>, %288, %cst_112 [1] : vector<1x4xf32> to vector<1xf32>
    %290 = vector.shape_cast %289 : vector<1xf32> to vector<1x1xf32>
    %291 = vector.broadcast %290 : vector<1x1xf32> to vector<1x4xf32>
    %292 = arith.divf %288, %291 : vector<1x4xf32>
    %cst_113 = arith.constant dense<0.000000e+00> : vector<1x16xf32>
    %293 = tpu.matmul %5, %279, %cst_113 {dimension_numbers = #tpu.dot_dimension_numbers<[1], [0], [0], [1], [0, 0, 1, 1], [], []>} : vector<1x16xf32>, vector<16x16xf32>, vector<1x16xf32> -> vector<1x16xf32>
    %cst_114 = arith.constant dense<0xFF800000> : vector<1xf32>
    %294 = vector.multi_reduction <maximumf>, %293, %cst_114 [1] : vector<1x16xf32> to vector<1xf32>
    %295 = vector.shape_cast %294 : vector<1xf32> to vector<1x1xf32>
    %296 = vector.broadcast %295 : vector<1x1xf32> to vector<1x16xf32>
    %297 = arith.subf %293, %296 : vector<1x16xf32>
    %298 = math.exp %297 : vector<1x16xf32>
    %cst_115 = arith.constant dense<0.000000e+00> : vector<1xf32>
    %299 = vector.multi_reduction <add>, %298, %cst_115 [1] : vector<1x16xf32> to vector<1xf32>
    %300 = vector.shape_cast %299 : vector<1xf32> to vector<1x1xf32>
    %301 = vector.broadcast %300 : vector<1x1xf32> to vector<1x16xf32>
    %302 = arith.divf %298, %301 : vector<1x16xf32>
    %cst_116 = arith.constant dense<0.000000e+00> : vector<1x32xf32>
    %303 = tpu.matmul %302, %251, %cst_116 {dimension_numbers = #tpu.dot_dimension_numbers<[1], [0], [0], [1], [0, 0, 1, 1], [], []>} : vector<1x16xf32>, vector<16x32xf32>, vector<1x32xf32> -> vector<1x32xf32>
    %304 = vector.extract_strided_slice %292 {offsets = [0, 3], sizes = [1, 1], strides = [1, 1]} : vector<1x4xf32> to vector<1x1xf32>
    %305 = vector.extract_strided_slice %271 {offsets = [3, 0], sizes = [1, 32], strides = [1, 1]} : vector<4x32xf32> to vector<1x32xf32>
    %306 = vector.broadcast %304 : vector<1x1xf32> to vector<1x32xf32>
    %307 = arith.mulf %306, %305 : vector<1x32xf32>
    %308 = vector.extract_strided_slice %242 {offsets = [1, 0], sizes = [4, 32], strides = [1, 1]} : vector<5x32xf32> to vector<4x32xf32>
    %cst_117 = arith.constant dense<0.000000e+00> : vector<4x32xf32>
    %309 = tpu.matmul %308, %14, %cst_117 {dimension_numbers = #tpu.dot_dimension_numbers<[1], [1], [0], [0], [0, 0, 1, 0], [], []>} : vector<4x32xf32>, vector<32x32xf32>, vector<4x32xf32> -> vector<4x32xf32>
    %cst_118 = arith.constant dense<0.000000e+00> : vector<4x32xf32>
    %310 = tpu.matmul %308, %16, %cst_118 {dimension_numbers = #tpu.dot_dimension_numbers<[1], [1], [0], [0], [0, 0, 1, 0], [], []>} : vector<4x32xf32>, vector<32x32xf32>, vector<4x32xf32> -> vector<4x32xf32>
    %cst_119 = arith.constant dense<0.000000e+00> : vector<4x32xf32>
    %311 = tpu.matmul %308, %18, %cst_119 {dimension_numbers = #tpu.dot_dimension_numbers<[1], [1], [0], [0], [0, 0, 1, 0], [], []>} : vector<4x32xf32>, vector<32x32xf32>, vector<4x32xf32> -> vector<4x32xf32>
    %312 = tpu.iota {dimensions = array<i32: 0>} : vector<4x32xi32>
    %c1_i32_120 = arith.constant 1 : i32
    %313 = vector.broadcast %c1_i32_120 : i32 to vector<4x32xi32>
    %314 = arith.cmpi sge, %312, %313 : vector<4x32xi32>
    %c1_i32_121 = arith.constant 1 : i32
    %315 = tpu.dynamic_rotate %309 by %c1_i32_121 dim 0 : vector<4x32xf32>, i32 -> vector<4x32xf32>
    %cst_122 = arith.constant 0.000000e+00 : f32
    %316 = vector.broadcast %cst_122 : f32 to vector<4x32xf32>
    %317 = arith.select %314, %315, %316 : vector<4x32xi1>, vector<4x32xf32>
    %c2_i32_123 = arith.constant 2 : i32
    %318 = vector.broadcast %c2_i32_123 : i32 to vector<4x32xi32>
    %319 = arith.cmpi sle, %312, %318 : vector<4x32xi32>
    %c3_i32_124 = arith.constant 3 : i32
    %320 = tpu.dynamic_rotate %311 by %c3_i32_124 dim 0 : vector<4x32xf32>, i32 -> vector<4x32xf32>
    %cst_125 = arith.constant 0.000000e+00 : f32
    %321 = vector.broadcast %cst_125 : f32 to vector<4x32xf32>
    %322 = arith.select %319, %320, %321 : vector<4x32xi1>, vector<4x32xf32>
    %323 = arith.addf %317, %310 : vector<4x32xf32>
    %324 = arith.addf %323, %322 : vector<4x32xf32>
    %325 = vector.broadcast %6 : vector<1x32xf32> to vector<4x32xf32>
    %326 = arith.addf %324, %325 : vector<4x32xf32>
    %cst_126 = arith.constant 0.000000e+00 : f32
    %327 = vector.broadcast %cst_126 : f32 to vector<4x32xf32>
    %328 = arith.maximumf %326, %327 : vector<4x32xf32>
    %cst_127 = arith.constant dense<0xFF800000> : vector<32xf32>
    %329 = vector.multi_reduction <maximumf>, %328, %cst_127 [0] : vector<4x32xf32> to vector<32xf32>
    %330 = vector.shape_cast %329 : vector<32xf32> to vector<1x32xf32>
    %331 = tpu.concatenate %303, %307, %330 in 1 : vector<1x32xf32>, vector<1x32xf32>, vector<1x32xf32> -> vector<1x96xf32>
    %cst_128 = arith.constant dense<0.000000e+00> : vector<1x128xf32>
    %332 = tpu.matmul %331, %23, %cst_128 {dimension_numbers = #tpu.dot_dimension_numbers<[1], [1], [0], [0], [0, 0, 1, 0], [], []>} : vector<1x96xf32>, vector<128x96xf32>, vector<1x128xf32> -> vector<1x128xf32>
    %333 = arith.addf %332, %3 : vector<1x128xf32>
    %c1_129 = arith.constant 1 : index
    %c0_130 = arith.constant 0 : index
    %c0_131 = arith.constant 0 : index
    %334 = vector.load %arg8[%c1_129, %c0_130, %c0_131] : memref<2x1x128xf32, #tpu.memory_space<vmem>>, vector<1x1x128xf32>
    %335 = vector.shape_cast %334 : vector<1x1x128xf32> to vector<1x128xf32>
    %336 = vector.shape_cast %333 : vector<1x128xf32> to vector<1x1x128xf32>
    tpu.vector_store %arg8[%c1_129, %c0_130, %c0_131], %336 {strides = array<i32>} : memref<2x1x128xf32, #tpu.memory_space<vmem>>, vector<1x1x128xf32>,
    return
  }
  func.func @transform_0(%arg0: i32) -> (i32, i32, i32) {
    %c0_i32 = arith.constant 0 : i32
    %c0_i32_0 = arith.constant 0 : i32
    %c0_i32_1 = arith.constant 0 : i32
    return %arg0, %c0_i32, %c0_i32_0 : i32, i32, i32
  }
  func.func @transform_1(%arg0: i32) -> (i32, i32, i32) {
    %c0_i32 = arith.constant 0 : i32
    %c0_i32_0 = arith.constant 0 : i32
    %c0_i32_1 = arith.constant 0 : i32
    return %arg0, %c0_i32, %c0_i32_0 : i32, i32, i32
  }
  func.func @transform_2(%arg0: i32) -> (i32, i32) {
    %c0_i32 = arith.constant 0 : i32
    %c0_i32_0 = arith.constant 0 : i32
    %c0_i32_1 = arith.constant 0 : i32
    return %c0_i32, %c0_i32_0 : i32, i32
  }
  func.func @transform_3(%arg0: i32) -> (i32, i32, i32) {
    %c0_i32 = arith.constant 0 : i32
    %c0_i32_0 = arith.constant 0 : i32
    %c0_i32_1 = arith.constant 0 : i32
    %c0_i32_2 = arith.constant 0 : i32
    return %c0_i32, %c0_i32_0, %c0_i32_1 : i32, i32, i32
  }
  func.func @transform_4(%arg0: i32) -> (i32, i32, i32) {
    %c0_i32 = arith.constant 0 : i32
    %c0_i32_0 = arith.constant 0 : i32
    %c0_i32_1 = arith.constant 0 : i32
    %c0_i32_2 = arith.constant 0 : i32
    return %c0_i32, %c0_i32_0, %c0_i32_1 : i32, i32, i32
  }
  func.func @transform_5(%arg0: i32) -> (i32, i32) {
    %c0_i32 = arith.constant 0 : i32
    %c0_i32_0 = arith.constant 0 : i32
    %c0_i32_1 = arith.constant 0 : i32
    return %c0_i32, %c0_i32_0 : i32, i32
  }
  func.func @transform_6(%arg0: i32) -> (i32, i32) {
    %c0_i32 = arith.constant 0 : i32
    %c0_i32_0 = arith.constant 0 : i32
    %c0_i32_1 = arith.constant 0 : i32
    return %c0_i32, %c0_i32_0 : i32, i32
  }
  func.func @transform_7(%arg0: i32) -> (i32, i32, i32) {
    %c0_i32 = arith.constant 0 : i32
    %c0_i32_0 = arith.constant 0 : i32
    %c0_i32_1 = arith.constant 0 : i32
    return %arg0, %c0_i32, %c0_i32_0 : i32, i32, i32
  }
}

</mosaic_0001>

<bundles_post_ra>
// kernel: postcom2dr_forward.1
= control target key start
LH: loop header
LB: loop body
LE: loop exit
PB: predicated region body
PF: predicated region fallthrough
CT: control target
= control target key end

     0   :  { %s2974_s28 = smov 112   ;;  %s4380_s0 = inlined_call_operand.vmem [shape: f32[1,40,16], index: 0, kind: input, shape index: {}]   ;;  %s4381_s1 = inlined_call_operand.vmem [shape: f32[2,5,5], index: 1, kind: input, shape index: {}]   ;;  %s4382_s2 = inlined_call_operand.vmem [shape: f32[256,48], index: 2, kind: input, shape index: {}]   ;;  %s4383_s3 = inlined_call_operand.vmem [shape: f32[6,32,32], index: 3, kind: input, shape index: {}]   ;;  %s4384_s4 = inlined_call_operand.vmem [shape: f32[2,16,32], index: 4, kind: input, shape index: {}]   ;;  %s4385_s5 = inlined_call_operand.vmem [shape: f32[128,96], index: 5, kind: input, shape index: {}]   ;;  %s4386_s6 = inlined_call_operand.vmem [shape: f32[8,256], index: 6, kind: input, shape index: {}]   ;;  %s4387_s7 = inlined_call_operand.hbm [shape: f32[2,1,128], index: 7, kind: output, shape index: {}]  }
   0x1   :  { %v42_v0 = vld [vmem:[%s4382_s2 + $0x78] sm:$0xff]  ;;  %v41_v1 = vld [vmem:[%s4382_s2 + $0x70] sm:$0xff]  ;;  %v40_v2 = vld [vmem:[%s4382_s2 + $0x68] sm:$0xff] }
   0x2   :  { %403 = vrot.lane.b32.xlu0 %v42_v0, %s2974_s28  ;;  %401 = vrot.lane.b32.xlu1 %v41_v1, %s2974_s28 }
   0x3   :  { %399 = vrot.lane.b32.xlu2 %v40_v2, %s2974_s28 }
   0x4   :  { %12 = vsyncpa [#allocation3], 0  ;;  %v58_v3 = vld [vmem:[%s4382_s2 + $0xf8] sm:$0xff]  ;;  %v57_v4 = vld [vmem:[%s4382_s2 + $0xf0] sm:$0xff]  ;;  %vm124_vm0 = vcmask 130048   ;;  %vm437_vm1 = vcmask 261120  }
   0x5   :  { %v56_v5 = vld [vmem:[%s4382_s2 + $0xe8] sm:$0xff]  ;;  %v55_v6 = vld [vmem:[%s4382_s2 + $0xe0] sm:$0xff]  ;;  %v38_v8 = vld [vmem:[%s4382_s2 + $0x58] sm:$0xff]  ;;  %2506 = vmatpush.xpose.msk.msra.mxu0 %vm124_vm0, %v42_v0  ;;  %2527 = vmatpush.xpose.msk.msra.mxu1 %vm124_vm0, %v58_v3  ;;  %s2977_s26 = smov 64   ;;  %s2978_s27 = smov 32   ;;  %vm663_vm14 = vcmask 1041408  }
   0x6   :  { %v39_v7 = vld [vmem:[%s4382_s2 + $0x60] sm:$0xff]  ;;  %v54_v9 = vld [vmem:[%s4382_s2 + $0xd8] sm:$0xff]  ;;  %v37_v10 = vld [vmem:[%s4382_s2 + $0x50] sm:$0xff]  ;;  %vm680_vm15 = vcmask 1045504   ;;  %s2472_s13 = sshll.u32 %s4387_s7, 4  ;;  %s2982_s14 = smov 1   ;;  %s2473_s13 = int_to_ptr.hbm [resolvable:$true] %s2472_s13 }
   0x7   :  { %v53_v11 = vld [vmem:[%s4382_s2 + $0xd0] sm:$0xff]  ;;  %v52_v12 = vld [vmem:[%s4382_s2 + $0xc8] sm:$0xff]  ;;  %v35_v14 = vld [vmem:[%s4382_s2 + $0x40] sm:$0xff] }
   0x8   :  { %v36_v13 = vld [vmem:[%s4382_s2 + $0x48] sm:$0xff]  ;;  %v51_v15 = vld [vmem:[%s4382_s2 + $0xc0] sm:$0xff]  ;;  %v34_v16 = vld [vmem:[%s4382_s2 + $0x38] sm:$0xff] }
   0x9   :  { %2507 = vmatpush.xpose.msk.msra.mxu0 %vm124_vm0, %v41_v1  ;;  %2528 = vmatpush.xpose.msk.msra.mxu1 %vm124_vm0, %v57_v4  ;;  %v50_v17 = vld [vmem:[%s4382_s2 + $0xb8] sm:$0xff]  ;;  %v49_v18 = vld [vmem:[%s4382_s2 + $0xb0] sm:$0xff]  ;;  %v32_v20 = vld [vmem:[%s4382_s2 + $0x28] sm:$0xff] }
   0xa   :  { %435 = vrot.lane.b32.xlu0 %v58_v3, %s2974_s28  ;;  %433 = vrot.lane.b32.xlu1 %v57_v4, %s2974_s28  ;;  %v33_v19 = vld [vmem:[%s4382_s2 + $0x30] sm:$0xff]  ;;  %v48_v21 = vld [vmem:[%s4382_s2 + $0xa8] sm:$0xff]  ;;  %v300_v3 = vlaneseq }
   0xb   :  { %431 = vrot.lane.b32.xlu2 %v56_v5, %s2974_s28  ;;  %v31_v22 = vld [vmem:[%s4382_s2 + $0x20] sm:$0xff]  ;;  %v46_v24 = vld [vmem:[%s4382_s2 + $0x98] sm:$0xff]  ;;  %v29_v26 = vld [vmem:[%s4382_s2 + $0x10] sm:$0xff] }
   0xc   :  { %v47_v23 = vld [vmem:[%s4382_s2 + $0xa0] sm:$0xff]  ;;  %v30_v25 = vld [vmem:[%s4382_s2 + $0x18] sm:$0xff]  ;;  %v45_v27 = vld [vmem:[%s4382_s2 + $0x90] sm:$0xff]  ;;  %v3513_v4 = vshrl.u32 %v300_v3, 7 }
   0xd   :  { %2508 = vmatpush.xpose.msk.msra.mxu0 %vm124_vm0, %v40_v2  ;;  %2529 = vmatpush.xpose.msk.msra.mxu1 %vm124_vm0, %v56_v5  ;;  %v28_v28 = vld [vmem:[%s4382_s2 + $0x8] sm:$0xff]  ;;  %v43_v30 = vld [vmem:[%s4382_s2 + $0x80] sm:$0xff]  ;;  %v2975_v2 = vmov 0.0  }
   0xe   :  { %v44_v29 = vld [vmem:[%s4382_s2 + $0x88] sm:$0xff]  ;;  %v27_v31 = vld [vmem:[%s4382_s2] sm:$0xff]  ;;  %v306_v5 = vand.u32 65535, %v3513_v4 }
   0xf   :  { %v114_v53 = vld [vmem:[%s4380_s0] sm:$0xff]  ;;  %v115_v60 = vld [vmem:[%s4380_s0 + $0x8] sm:$0xff] }
  0x11   :  { %2509 = vmatpush.xpose.msk.msra.mxu0 %vm124_vm0, %v39_v7  ;;  %2530 = vmatpush.xpose.msk.msra.mxu1 %vm124_vm0, %v55_v6 }
  0x12   :  { %429 = vrot.lane.b32.xlu1 %v55_v6, %s2974_s28  ;;  %397 = vrot.lane.b32.xlu0 %v39_v7, %s2974_s28  ;;  %v307_v6 = vshrl.u32 %v3513_v4, 16  ;;  %v310_v7 = vmul.u32 52428, %v306_v5 }
  0x13   :  { %395 = vrot.lane.b32.xlu2 %v38_v8, %s2974_s28 }
  0x15   :  { %2510 = vmatpush.xpose.msk.msra.mxu0 %vm124_vm0, %v38_v8  ;;  %2531 = vmatpush.xpose.msk.msra.mxu1 %vm124_vm0, %v54_v9  ;;  %v309_v8 = vmul.u32 52429, %v306_v5 }
  0x19   :  { %2511 = vmatpush.xpose.msk.msra.mxu0 %vm124_vm0, %v37_v10  ;;  %2532 = vmatpush.xpose.msk.msra.mxu1 %vm124_vm0, %v53_v11 }
  0x1a   :  { %427 = vrot.lane.b32.xlu0 %v54_v9, %s2974_s28  ;;  %393 = vrot.lane.b32.xlu1 %v37_v10, %s2974_s28  ;;  %v311_v9 = vmul.u32 52429, %v307_v6  ;;  %v313_v10 = vshll.u32 %v310_v7, 16 }
  0x1b   :  { %425 = vrot.lane.b32.xlu2 %v53_v11, %s2974_s28  ;;  %v302_v11 = vadd.s32 8, %v3513_v4 }
  0x1c   :  { %vm317_vm2 = vc.u32 %v309_v8, %v313_v10 }
  0x1d   :  { %2512 = vmatpush.xpose.msk.msra.mxu0 %vm124_vm0, %v36_v13  ;;  %2533 = vmatpush.xpose.msk.msra.mxu1 %vm124_vm0, %v52_v12 }
  0x21   :  { %2513 = vmatpush.xpose.msk.msra.mxu0 %vm124_vm0, %v35_v14  ;;  %2534 = vmatpush.xpose.msk.msra.mxu1 %vm124_vm0, %v51_v15 }
  0x22   :  { %423 = vrot.lane.b32.xlu1 %v52_v12, %s2974_s28  ;;  %391 = vrot.lane.b32.xlu0 %v36_v13, %s2974_s28  ;;  %v335_v12 = vand.u32 65535, %v302_v11  ;;  %v315_v13 = vshll.u32 %v311_v9, 16 }
  0x23   :  { %389 = vrot.lane.b32.xlu2 %v35_v14, %s2974_s28  ;;  %v319_v14 = vadd.s32 %v313_v10, %v309_v8 }
  0x25   :  { %2514 = vmatpush.xpose.msk.msra.mxu0 %vm124_vm0, %v34_v16  ;;  %2535 = vmatpush.xpose.msk.msra.mxu1 %vm124_vm0, %v50_v17  ;;  %vm321_vm3 = vc.u32 %v319_v14, %v315_v13 }
  0x29   :  { %2515 = vmatpush.xpose.msk.msra.mxu0 %vm124_vm0, %v33_v19  ;;  %2536 = vmatpush.xpose.msk.msra.mxu1 %vm124_vm0, %v49_v18 }
  0x2a   :  { %421 = vrot.lane.b32.xlu0 %v51_v15, %s2974_s28  ;;  %387 = vrot.lane.b32.xlu1 %v34_v16, %s2974_s28  ;;  %v336_v15 = vshrl.u32 %v302_v11, 16  ;;  %v339_v16 = vmul.u32 52428, %v335_v12 }
  0x2b   :  { %419 = vrot.lane.b32.xlu2 %v50_v17, %s2974_s28  ;;  %v312_v17 = vmul.u32 52428, %v307_v6 }
  0x2d   :  { %2516 = vmatpush.xpose.msk.msra.mxu0 %vm124_vm0, %v32_v20  ;;  %2537 = vmatpush.xpose.msk.msra.mxu1 %vm124_vm0, %v48_v21 }
  0x31   :  { %2517 = vmatpush.xpose.msk.msra.mxu0 %vm124_vm0, %v31_v22  ;;  %2538 = vmatpush.xpose.msk.msra.mxu1 %vm124_vm0, %v47_v23 }
  0x32   :  { %417 = vrot.lane.b32.xlu1 %v49_v18, %s2974_s28  ;;  %385 = vrot.lane.b32.xlu0 %v33_v19, %s2974_s28  ;;  %v2976_v18 = vmov 0  }
  0x33   :  { %383 = vrot.lane.b32.xlu2 %v32_v20, %s2974_s28  ;;  %v318_v19 = vsel %vm317_vm2, 1, %v2976_v18  ;;  %v338_v20 = vmul.u32 52429, %v335_v12  ;;  %vm1094_vm2 = vcmask 1040384  }
  0x35   :  { %2518 = vmatpush.xpose.msk.msra.mxu0 %vm124_vm0, %v30_v25  ;;  %2539 = vmatpush.xpose.msk.msra.mxu1 %vm124_vm0, %v46_v24 }
  0x39   :  { %2519 = vmatpush.xpose.msk.msra.mxu0 %vm124_vm0, %v29_v26  ;;  %2540 = vmatpush.xpose.msk.msra.mxu1 %vm124_vm0, %v45_v27 }
  0x3a   :  { %415 = vrot.lane.b32.xlu0 %v48_v21, %s2974_s28  ;;  %381 = vrot.lane.b32.xlu1 %v31_v22, %s2974_s28  ;;  %v340_v21 = vmul.u32 52429, %v336_v15  ;;  %v342_v22 = vshll.u32 %v339_v16, 16 }
  0x3b   :  { %413 = vrot.lane.b32.xlu2 %v47_v23, %s2974_s28  ;;  %v320_v23 = vadd.s32 %v318_v19, %v312_v17 }
  0x3c   :  { %vm346_vm4 = vc.u32 %v338_v20, %v342_v22 }
  0x3d   :  { %2520 = vmatpush.xpose.msk.msra.mxu0 %vm124_vm0, %v28_v28  ;;  %2541 = vmatpush.xpose.msk.msra.mxu1 %vm124_vm0, %v44_v29 }
  0x41   :  { %2521 = vmatpush.xpose.msk.msra.mxu0 %vm124_vm0, %v27_v31  ;;  %2542 = vmatpush.xpose.msk.msra.mxu1 %vm124_vm0, %v43_v30 }
  0x42   :  { %411 = vrot.lane.b32.xlu1 %v46_v24, %s2974_s28  ;;  %379 = vrot.lane.b32.xlu0 %v30_v25, %s2974_s28  ;;  %v322_v24 = vsel %vm321_vm3, 1, %v2976_v18  ;;  %v344_v25 = vshll.u32 %v340_v21, 16  ;;  %vm801_vm3 = vcmask 1043456  }
  0x43   :  { %377 = vrot.lane.b32.xlu2 %v29_v26, %s2974_s28  ;;  %v348_v26 = vadd.s32 %v342_v22, %v338_v20 }
  0x44   :  { %2522 = vmatmul.msk.f32.vlgmr.msra.gmra.mxu0 %vm124_vm0, %v114_v53  ;;  %2543 = vmatmul.msk.f32.vlgmr.msra.gmra.mxu1 %vm124_vm0, %v114_v53 }
  0x45   :  { %vm350_vm5 = vc.u32 %v348_v26, %v344_v25 }
  0x4a   :  { %409 = vrot.lane.b32.xlu0 %v45_v27, %s2974_s28  ;;  %375 = vrot.lane.b32.xlu1 %v28_v28, %s2974_s28  ;;  %v314_v27 = vshrl.u32 %v310_v7, 16  ;;  %v324_v28 = vadd.s32 %v322_v24, %v320_v23 }
  0x4b   :  { %407 = vrot.lane.b32.xlu2 %v44_v29, %s2974_s28  ;;  %v341_v29 = vmul.u32 52428, %v336_v15 }
  0x4c   :  { %2523 = vmatmul.msk.f32.gmra.mxu0 %vm124_vm0, %v115_v60  ;;  %2544 = vmatmul.msk.f32.gmra.mxu1 %vm124_vm0, %v115_v60 }
  0x52   :  { %405 = vrot.lane.b32.xlu1 %v43_v30, %s2974_s28  ;;  %373 = vrot.lane.b32.xlu0 %v27_v31, %s2974_s28  ;;  %v347_v30 = vsel %vm346_vm4, 1, %v2976_v18  ;;  %v316_v31 = vshrl.u32 %v311_v9, 16  ;;  %vm1111_vm4 = vcmask 1042432  }
  0x5d   :  { %v3183_v32 = vpop.permute.xlu2 %399 }
  0x65   :  { %v3185_v33 = vpop.permute.xlu2 %431 }
  0x6d   :  { %v3195_v36 = vpop.permute.xlu2 %395 }
  0x74   :  { %v3187_v34 = vpop.permute.xlu0 %403  ;;  %v3189_v35 = vpop.permute.xlu1 %401 }
  0x75   :  { %2548 = vmatpush.xpose.msk.msra.mxu2 %vm437_vm1, %v3187_v34  ;;  %2580 = vmatpush.xpose.msk.msrb.mxu0 %vm437_vm1, %v3187_v34  ;;  %v3215_v39 = vpop.permute.xlu2 %425 }
  0x79   :  { %2549 = vmatpush.xpose.msk.msra.mxu2 %vm437_vm1, %v3189_v35  ;;  %2581 = vmatpush.xpose.msk.msrb.mxu0 %vm437_vm1, %v3189_v35 }
  0x7c   :  { %v3201_v37 = vpop.permute.xlu0 %435  ;;  %v3203_v38 = vpop.permute.xlu1 %433 }
  0x7d   :  { %2550 = vmatpush.xpose.msk.msra.mxu2 %vm437_vm1, %v3183_v32  ;;  %2564 = vmatpush.xpose.msk.msra.mxu3 %vm437_vm1, %v3201_v37  ;;  %v3239_v42 = vpop.permute.xlu2 %389 }
  0x7e   :  { %2582 = vmatpush.xpose.msk.msrb.mxu0 %vm437_vm1, %v3183_v32  ;;  %2598 = vmatpush.xpose.msk.msrb.mxu1 %vm437_vm1, %v3201_v37 }
  0x81   :  { %2565 = vmatpush.xpose.msk.msra.mxu3 %vm437_vm1, %v3203_v38 }
  0x82   :  { %2599 = vmatpush.xpose.msk.msrb.mxu1 %vm437_vm1, %v3203_v38 }
  0x84   :  { %v3219_v40 = vpop.permute.xlu1 %429  ;;  %v3221_v41 = vpop.permute.xlu0 %397 }
  0x85   :  { %2551 = vmatpush.xpose.msk.msra.mxu2 %vm437_vm1, %v3221_v41  ;;  %2566 = vmatpush.xpose.msk.msra.mxu3 %vm437_vm1, %v3185_v33  ;;  %v3265_v47 = vpop.permute.xlu2 %419 }
  0x86   :  { %2583 = vmatpush.xpose.msk.msrb.mxu0 %vm437_vm1, %v3221_v41  ;;  %2600 = vmatpush.xpose.msk.msrb.mxu1 %vm437_vm1, %v3185_v33 }
  0x89   :  { %2552 = vmatpush.xpose.msk.msra.mxu2 %vm437_vm1, %v3195_v36  ;;  %2567 = vmatpush.xpose.msk.msra.mxu3 %vm437_vm1, %v3219_v40 }
  0x8a   :  { %2584 = vmatpush.xpose.msk.msrb.mxu0 %vm437_vm1, %v3195_v36  ;;  %2601 = vmatpush.xpose.msk.msrb.mxu1 %vm437_vm1, %v3219_v40 }
  0x8c   :  { %v3241_v43 = vpop.permute.xlu0 %427  ;;  %v3243_v44 = vpop.permute.xlu1 %393 }
  0x8d   :  { %2553 = vmatpush.xpose.msk.msra.mxu2 %vm437_vm1, %v3243_v44  ;;  %2568 = vmatpush.xpose.msk.msra.mxu3 %vm437_vm1, %v3241_v43  ;;  %v3287_v50 = vpop.permute.xlu2 %383 }
  0x8e   :  { %2585 = vmatpush.xpose.msk.msrb.mxu0 %vm437_vm1, %v3243_v44  ;;  %2602 = vmatpush.xpose.msk.msrb.mxu1 %vm437_vm1, %v3241_v43 }
  0x91   :  { %2569 = vmatpush.xpose.msk.msra.mxu3 %vm437_vm1, %v3215_v39 }
  0x92   :  { %2603 = vmatpush.xpose.msk.msrb.mxu1 %vm437_vm1, %v3215_v39 }
  0x94   :  { %v3257_v45 = vpop.permute.xlu1 %423  ;;  %v3259_v46 = vpop.permute.xlu0 %391 }
  0x95   :  { %2554 = vmatpush.xpose.msk.msra.mxu2 %vm437_vm1, %v3259_v46  ;;  %2570 = vmatpush.xpose.msk.msra.mxu3 %vm437_vm1, %v3257_v45  ;;  %v3312_v54 = vpop.permute.xlu2 %413 }
  0x96   :  { %2586 = vmatpush.xpose.msk.msrb.mxu0 %vm437_vm1, %v3259_v46  ;;  %2604 = vmatpush.xpose.msk.msrb.mxu1 %vm437_vm1, %v3257_v45 }
  0x99   :  { %2555 = vmatpush.xpose.msk.msra.mxu2 %vm437_vm1, %v3239_v42 }
  0x9a   :  { %2587 = vmatpush.xpose.msk.msrb.mxu0 %vm437_vm1, %v3239_v42 }
  0x9c   :  { %v3275_v48 = vpop.permute.xlu0 %421  ;;  %v3277_v49 = vpop.permute.xlu1 %387 }
  0x9d   :  { %2556 = vmatpush.xpose.msk.msra.mxu2 %vm437_vm1, %v3277_v49  ;;  %2571 = vmatpush.xpose.msk.msra.mxu3 %vm437_vm1, %v3275_v48  ;;  %v3332_v57 = vpop.permute.xlu2 %377 }
  0x9e   :  { %2588 = vmatpush.xpose.msk.msrb.mxu0 %vm437_vm1, %v3277_v49  ;;  %2605 = vmatpush.xpose.msk.msrb.mxu1 %vm437_vm1, %v3275_v48 }
  0xa1   :  { %2572 = vmatpush.xpose.msk.msra.mxu3 %vm437_vm1, %v3265_v47 }
  0xa2   :  { %2606 = vmatpush.xpose.msk.msrb.mxu1 %vm437_vm1, %v3265_v47 }
  0xa4   :  { %v3293_v51 = vpop.permute.xlu1 %417  ;;  %v3295_v52 = vpop.permute.xlu0 %385 }
  0xa5   :  { %2557 = vmatpush.xpose.msk.msra.mxu2 %vm437_vm1, %v3295_v52  ;;  %2573 = vmatpush.xpose.msk.msra.mxu3 %vm437_vm1, %v3293_v51  ;;  %v3367_v63 = vpop.permute.xlu2 %407 }
  0xa6   :  { %2589 = vmatpush.xpose.msk.msrb.mxu0 %vm437_vm1, %v3295_v52  ;;  %2607 = vmatpush.xpose.msk.msrb.mxu1 %vm437_vm1, %v3293_v51 }
  0xa9   :  { %2558 = vmatpush.xpose.msk.msra.mxu2 %vm437_vm1, %v3287_v50 }
  0xaa   :  { %2590 = vmatpush.xpose.msk.msrb.mxu0 %vm437_vm1, %v3287_v50 }
  0xac   :  { %v3316_v55 = vpop.permute.xlu0 %415  ;;  %v3318_v56 = vpop.permute.xlu1 %381 }
  0xad   :  { %2559 = vmatpush.xpose.msk.msra.mxu2 %vm437_vm1, %v3318_v56  ;;  %2574 = vmatpush.xpose.msk.msra.mxu3 %vm437_vm1, %v3316_v55 }
  0xae   :  { %2591 = vmatpush.xpose.msk.msrb.mxu0 %vm437_vm1, %v3318_v56  ;;  %2608 = vmatpush.xpose.msk.msrb.mxu1 %vm437_vm1, %v3316_v55 }
  0xb1   :  { %2575 = vmatpush.xpose.msk.msra.mxu3 %vm437_vm1, %v3312_v54 }
  0xb2   :  { %2609 = vmatpush.xpose.msk.msrb.mxu1 %vm437_vm1, %v3312_v54 }
  0xb4   :  { %v3334_v58 = vpop.permute.xlu1 %411  ;;  %v3336_v59 = vpop.permute.xlu0 %379 }
  0xb5   :  { %2560 = vmatpush.xpose.msk.msra.mxu2 %vm437_vm1, %v3336_v59  ;;  %2576 = vmatpush.xpose.msk.msra.mxu3 %vm437_vm1, %v3334_v58 }
  0xb6   :  { %2592 = vmatpush.xpose.msk.msrb.mxu0 %vm437_vm1, %v3336_v59  ;;  %2610 = vmatpush.xpose.msk.msrb.mxu1 %vm437_vm1, %v3334_v58 }
  0xb9   :  { %2561 = vmatpush.xpose.msk.msra.mxu2 %vm437_vm1, %v3332_v57 }
  0xba   :  { %2593 = vmatpush.xpose.msk.msrb.mxu0 %vm437_vm1, %v3332_v57 }
  0xbc   :  { %v3355_v61 = vpop.permute.xlu0 %409  ;;  %v3357_v62 = vpop.permute.xlu1 %375 }
  0xbd   :  { %2562 = vmatpush.xpose.msk.msra.mxu2 %vm437_vm1, %v3357_v62  ;;  %2577 = vmatpush.xpose.msk.msra.mxu3 %vm437_vm1, %v3355_v61 }
  0xbe   :  { %2594 = vmatpush.xpose.msk.msrb.mxu0 %vm437_vm1, %v3357_v62  ;;  %2611 = vmatpush.xpose.msk.msrb.mxu1 %vm437_vm1, %v3355_v61 }
  0xc1   :  { %2578 = vmatpush.xpose.msk.msra.mxu3 %vm437_vm1, %v3367_v63 }
  0xc2   :  { %2612 = vmatpush.xpose.msk.msrb.mxu1 %vm437_vm1, %v3367_v63 }
  0xc4   :  { %v3373_v0 = vpop.permute.xlu1 %405  ;;  %v3375_v1 = vpop.permute.xlu0 %373 }
  0xc5   :  { %2563 = vmatpush.xpose.msk.msra.mxu2 %vm437_vm1, %v3375_v1  ;;  %2579 = vmatpush.xpose.msk.msra.mxu3 %vm437_vm1, %v3373_v0 }
  0xc6   :  { %2595 = vmatpush.xpose.msk.msrb.mxu0 %vm437_vm1, %v3375_v1  ;;  %2613 = vmatpush.xpose.msk.msrb.mxu1 %vm437_vm1, %v3373_v0 }
  0xc8   :  { %521 = vmatmul.f32.vlgmr.msra.gmra.mxu2 %v2975_v2  ;;  %544 = vmatmul.f32.vlgmr.msra.gmra.mxu3 %v2975_v2 }
  0xc9   :  { %2616 = vmatpush.xpose.msk.msrb.mxu2 %vm437_vm1, %v3187_v34  ;;  %2634 = vmatpush.xpose.msk.msrb.mxu3 %vm437_vm1, %v3201_v37 }
  0xca   :  { %2652 = vmatpush.xpose.msk.msra.mxu0 %vm437_vm1, %v3187_v34  ;;  %2670 = vmatpush.xpose.msk.msra.mxu1 %vm437_vm1, %v3201_v37  ;;  %v351_v34 = vsel %vm350_vm5, 1, %v2976_v18  ;;  %vm1157_vm5 = vcmask 1044480  }
  0xcd   :  { %2617 = vmatpush.xpose.msk.msrb.mxu2 %vm437_vm1, %v3189_v35  ;;  %2635 = vmatpush.xpose.msk.msrb.mxu3 %vm437_vm1, %v3203_v38 }
  0xce   :  { %2653 = vmatpush.xpose.msk.msra.mxu0 %vm437_vm1, %v3189_v35  ;;  %2671 = vmatpush.xpose.msk.msra.mxu1 %vm437_vm1, %v3203_v38 }
  0xd0   :  { %524 = vmatmul.f32.gmra.mxu2 %v2975_v2  ;;  %547 = vmatmul.f32.gmra.mxu3 %v2975_v2 }
  0xd1   :  { %2618 = vmatpush.xpose.msk.msrb.mxu2 %vm437_vm1, %v3183_v32  ;;  %2636 = vmatpush.xpose.msk.msrb.mxu3 %vm437_vm1, %v3185_v33 }
  0xd2   :  { %2654 = vmatpush.xpose.msk.msra.mxu0 %vm437_vm1, %v3183_v32  ;;  %2672 = vmatpush.xpose.msk.msra.mxu1 %vm437_vm1, %v3185_v33  ;;  %v325_v32 = vadd.s32 %v324_v28, %v314_v27  ;;  %v349_v33 = vadd.s32 %v347_v30, %v341_v29 }
  0xd4   :  { %v326_v35 = vadd.s32 %v325_v32, %v316_v31  ;;  %v353_v37 = vadd.s32 %v351_v34, %v349_v33 }
  0xd5   :  { %2619 = vmatpush.xpose.msk.msrb.mxu2 %vm437_vm1, %v3221_v41  ;;  %2637 = vmatpush.xpose.msk.msrb.mxu3 %vm437_vm1, %v3219_v40 }
  0xd6   :  { %2655 = vmatpush.xpose.msk.msra.mxu0 %vm437_vm1, %v3221_v41  ;;  %2673 = vmatpush.xpose.msk.msra.mxu1 %vm437_vm1, %v3219_v40  ;;  %v327_v38 = vshrl.u32 %v326_v35, 2  ;;  %v116_v35 = vld [vmem:[%s4380_s0 + $0x10] sm:$0xff] }
  0xd7   :  { %2524 = vmatmul.msk.f32.gmra.mxu0 %vm124_vm0, %v116_v35  ;;  %2545 = vmatmul.msk.f32.gmra.mxu1 %vm124_vm0, %v116_v35 }
  0xd8   :  { %v328_v41 = vmul.u32 5, %v327_v38 }
  0xd9   :  { %2620 = vmatpush.xpose.msk.msrb.mxu2 %vm437_vm1, %v3195_v36  ;;  %2638 = vmatpush.xpose.msk.msrb.mxu3 %vm437_vm1, %v3241_v43 }
  0xda   :  { %2656 = vmatpush.xpose.msk.msra.mxu0 %vm437_vm1, %v3195_v36  ;;  %2674 = vmatpush.xpose.msk.msra.mxu1 %vm437_vm1, %v3241_v43  ;;  %v343_v36 = vshrl.u32 %v339_v16, 16  ;;  %v329_v43 = vsub.s32 %v3513_v4, %v328_v41 }
  0xdc   :  { %v354_v40 = vadd.s32 %v353_v37, %v343_v36  ;;  %vm361_vm6 = vcmp.ne.s32.totalorder %v329_v43, 0  ;;  %vm363_vm7 = vcmp.lt.s32.totalorder %v329_v43, 0  ;;  %v117_v36 = vld [vmem:[%s4380_s0 + $0x18] sm:$0xff]  ;;  %v118_v37 = vld [vmem:[%s4380_s0 + $0x20] sm:$0xff] }
  0xdd   :  { %2621 = vmatpush.xpose.msk.msrb.mxu2 %vm437_vm1, %v3243_v44  ;;  %2639 = vmatpush.xpose.msk.msrb.mxu3 %vm437_vm1, %v3215_v39  ;;  %vm365_vm8 = vmand %vm363_vm7, %vm361_vm6  ;;  %vm1153_vm6 = vcmask 39936   ;;  %vm1254_vm7 = vcmask 27648  }
  0xde   :  { %2657 = vmatpush.xpose.msk.msra.mxu0 %vm437_vm1, %v3243_v44  ;;  %2675 = vmatpush.xpose.msk.msra.mxu1 %vm437_vm1, %v3215_v39  ;;  %v345_v39 = vshrl.u32 %v340_v21, 16 }
  0xdf   :  { %2525 = vmatmul.msk.f32.gmra.mxu0 %vm124_vm0, %v117_v36  ;;  %2546 = vmatmul.msk.f32.gmra.mxu1 %vm124_vm0, %v117_v36 }
  0xe1   :  { %2622 = vmatpush.xpose.msk.msrb.mxu2 %vm437_vm1, %v3259_v46  ;;  %2640 = vmatpush.xpose.msk.msrb.mxu3 %vm437_vm1, %v3257_v45 }
  0xe2   :  { %2658 = vmatpush.xpose.msk.msra.mxu0 %vm437_vm1, %v3259_v46  ;;  %2676 = vmatpush.xpose.msk.msra.mxu1 %vm437_vm1, %v3257_v45  ;;  %v59_v45 = vld [vmem:[%s4386_s6] ss:$8 sm:$0x3] }
  0xe5   :  { %2623 = vmatpush.xpose.msk.msrb.mxu2 %vm437_vm1, %v3239_v42  ;;  %2641 = vmatpush.xpose.msk.msrb.mxu3 %vm437_vm1, %v3275_v48 }
  0xe6   :  { %2659 = vmatpush.xpose.msk.msra.mxu0 %vm437_vm1, %v3239_v42  ;;  %2677 = vmatpush.xpose.msk.msra.mxu1 %vm437_vm1, %v3275_v48  ;;  %v355_v42 = vadd.s32 %v354_v40, %v345_v39  ;;  %v285_v48 = vpop.f32.mrf.mxu1 }
  0xe7   :  { %2526 = vmatmul.msk.f32.gmra.mxu0 %vm124_vm0, %v118_v37  ;;  %2547 = vmatmul.msk.f32.gmra.mxu1 %vm124_vm0, %v118_v37 }
  0xe8   :  { %v356_v44 = vshrl.u32 %v355_v42, 2 }
  0xe9   :  { %2624 = vmatpush.xpose.msk.msrb.mxu2 %vm437_vm1, %v3277_v49  ;;  %2642 = vmatpush.xpose.msk.msrb.mxu3 %vm437_vm1, %v3265_v47 }
  0xea   :  { %2660 = vmatpush.xpose.msk.msra.mxu0 %vm437_vm1, %v3277_v49  ;;  %2678 = vmatpush.xpose.msk.msra.mxu1 %vm437_vm1, %v3265_v47  ;;  %v357_v46 = vmul.u32 5, %v356_v44  ;;  %v253_v47 = vpop.f32.mrf.mxu0  ;;  %v3522_v49 = vperm.slane %v59_v45, 0 }
  0xec   :  { %v254_v53 = vadd.f32 %v253_v47, %v3522_v49 }
  0xed   :  { %2625 = vmatpush.xpose.msk.msrb.mxu2 %vm437_vm1, %v3295_v52  ;;  %2643 = vmatpush.xpose.msk.msrb.mxu3 %vm437_vm1, %v3293_v51 }
  0xee   :  { %2661 = vmatpush.xpose.msk.msra.mxu0 %vm437_vm1, %v3295_v52  ;;  %2679 = vmatpush.xpose.msk.msra.mxu1 %vm437_vm1, %v3293_v51  ;;  %v367_v51 = vadd.s32 5, %v329_v43  ;;  %v358_v52 = vsub.s32 %v302_v11, %v357_v46 }
  0xf0   :  { %vm362_vm9 = vcmp.ne.s32.totalorder %v358_v52, 0  ;;  %vm364_vm10 = vcmp.lt.s32.totalorder %v358_v52, 0 }
  0xf1   :  { %2626 = vmatpush.xpose.msk.msrb.mxu2 %vm437_vm1, %v3287_v50  ;;  %2644 = vmatpush.xpose.msk.msrb.mxu3 %vm437_vm1, %v3316_v55  ;;  %vm366_vm12 = vmand %vm364_vm10, %vm362_vm9 }
  0xf2   :  { %2662 = vmatpush.xpose.msk.msra.mxu0 %vm437_vm1, %v3287_v50  ;;  %2680 = vmatpush.xpose.msk.msra.mxu1 %vm437_vm1, %v3316_v55  ;;  %v3524_v50 = vperm.slane %v59_v45, 1  ;;  %v369_v55 = vsel %vm365_vm8, %v367_v51, %v329_v43 }
  0xf3   :  { %vm3528_vm11 = vcmp.eq.s32.totalorder %v369_v55, 0 }
  0xf5   :  { %2627 = vmatpush.xpose.msk.msrb.mxu2 %vm437_vm1, %v3318_v56  ;;  %2645 = vmatpush.xpose.msk.msrb.mxu3 %vm437_vm1, %v3312_v54 }
  0xf6   :  { %2663 = vmatpush.xpose.msk.msra.mxu0 %vm437_vm1, %v3318_v56  ;;  %2681 = vmatpush.xpose.msk.msra.mxu1 %vm437_vm1, %v3312_v54  ;;  %v286_v54 = vadd.f32 %v285_v48, %v3524_v50 }
  0xf9   :  { %2628 = vmatpush.xpose.msk.msrb.mxu2 %vm437_vm1, %v3336_v59  ;;  %2646 = vmatpush.xpose.msk.msrb.mxu3 %vm437_vm1, %v3334_v58 }
  0xfa   :  { %2664 = vmatpush.xpose.msk.msra.mxu0 %vm437_vm1, %v3336_v59  ;;  %2682 = vmatpush.xpose.msk.msra.mxu1 %vm437_vm1, %v3334_v58 }
  0xfd   :  { %2629 = vmatpush.xpose.msk.msrb.mxu2 %vm437_vm1, %v3332_v57  ;;  %2647 = vmatpush.xpose.msk.msrb.mxu3 %vm437_vm1, %v3355_v61 }
  0xfe   :  { %2665 = vmatpush.xpose.msk.msra.mxu0 %vm437_vm1, %v3332_v57  ;;  %2683 = vmatpush.xpose.msk.msra.mxu1 %vm437_vm1, %v3355_v61  ;;  %v368_v61 = vadd.s32 5, %v358_v52 }
 0x100   :  { %v370_v3 = vsel %vm366_vm12, %v368_v61, %v358_v52  ;;  %vm1279_vm12 = vcmask 31744  }
 0x101   :  { %2630 = vmatpush.xpose.msk.msrb.mxu2 %vm437_vm1, %v3357_v62  ;;  %2648 = vmatpush.xpose.msk.msrb.mxu3 %vm437_vm1, %v3367_v63  ;;  %vm3540_vm13 = vcmp.eq.s32.totalorder %v370_v3, 0 }
 0x102   :  { %2666 = vmatpush.xpose.msk.msra.mxu0 %vm437_vm1, %v3357_v62  ;;  %2684 = vmatpush.xpose.msk.msra.mxu1 %vm437_vm1, %v3367_v63  ;;  %v256_v62 = vpop.f32.mrf.mxu0  ;;  %v288_v63 = vpop.f32.mrf.mxu1 }
 0x103   :  { %v3538_v2 = vadd.f32 %v288_v63, %v3524_v50 }
 0x105   :  { %2631 = vmatpush.xpose.msk.msrb.mxu2 %vm437_vm1, %v3375_v1  ;;  %2649 = vmatpush.xpose.msk.msrb.mxu3 %vm437_vm1, %v3373_v0 }
 0x106   :  { %2667 = vmatpush.xpose.msk.msra.mxu0 %vm437_vm1, %v3375_v1  ;;  %2685 = vmatpush.xpose.msk.msra.mxu1 %vm437_vm1, %v3373_v0  ;;  %v3535_v1 = vadd.f32 %v256_v62, %v3522_v49 }
 0x14b   :  { %v522_v56 = vpop.f32.mrf.mxu2  ;;  %v545_v58 = vpop.f32.mrf.mxu3 }
 0x14c   :  { %v551_v59 = vadd.f32 %v522_v56, %v254_v53  ;;  %v552_v60 = vadd.f32 %v545_v58, %v286_v54 }
 0x14e   :  { %v555_v0 = vsel %vm3528_vm11, %v551_v59, %v552_v60 }
 0x14f   :  { %2832 = vtanh.f32 %v555_v0  ;;  %v557_v13 = vsub.f32 0.0, %v555_v0 }
 0x151   :  { %v559_v14 = vmul.f32 1.442695, %v557_v13 }
 0x153   :  { %v525_v5 = vpop.f32.mrf.mxu2  ;;  %v548_v7 = vpop.f32.mrf.mxu3 }
 0x154   :  { %v553_v8 = vadd.f32 %v525_v5, %v3535_v1  ;;  %v554_v9 = vadd.f32 %v548_v7, %v3538_v2  ;;  %v259_v44 = vpop.f32.mrf.mxu0  ;;  %v291_v45 = vpop.f32.mrf.mxu1 }
 0x155   :  { %v2833_v10 = vpop.eup %2832  ;;  %v3596_v61 = vadd.f32 %v259_v44, %v3522_v49  ;;  %v3599_v62 = vadd.f32 %v291_v45, %v3524_v50 }
 0x156   :  { %v556_v11 = vsel %vm3540_vm13, %v553_v8, %v554_v9  ;;  %573 = vrot.lane.b32.xlu2 %v2833_v10, %s2977_s26 }
 0x157   :  { %2834 = vtanh.f32 %v556_v11  ;;  %v558_v20 = vsub.f32 0.0, %v556_v11 }
 0x158   :  { %2836 = vpow2.f32 %v559_v14 }
 0x159   :  { %v561_v21 = vmul.f32 1.442695, %v558_v20 }
 0x15c   :  { %v3587_v46 = vpop.f32.mrf.mxu0  ;;  %v3589_v47 = vpop.f32.mrf.mxu1 }
 0x15d   :  { %v2835_v12 = vpop.eup %2834 }
 0x15e   :  { %575 = vrot.lane.b32.xlu0 %v2835_v12, %s2977_s26  ;;  %v2837_v15 = vpop.eup %2836 }
 0x15f   :  { %v563_v16 = vadd.f32 1.0, %v2837_v15 }
 0x161   :  { %2838 = vrcp.f32 %v563_v16 }
 0x162   :  { %2840 = vpow2.f32 %v561_v21 }
 0x164   :  { %v3591_v48 = vpop.f32.mrf.mxu0  ;;  %v3593_v51 = vpop.f32.mrf.mxu1 }
 0x167   :  { %v2839_v17 = vpop.eup %2838 }
 0x168   :  { %v2841_v22 = vpop.eup %2840  ;;  %v569_v27 = vmul.f32 0.0, %v2839_v17 }
 0x169   :  { %v564_v23 = vadd.f32 1.0, %v2841_v22 }
 0x16b   :  { %2842 = vrcp.f32 %v564_v23 }
 0x171   :  { %v2843_v24 = vpop.eup %2842 }
 0x172   :  { %v570_v30 = vmul.f32 0.0, %v2843_v24 }
 0x1b0   :  { %v574_v18 = vpop.permute.xlu2 %573 }
 0x1b1   :  { %v579_v19 = vmul.f32 %v2839_v17, %v574_v18 }
 0x1b3   :  { %583 = vrot.lane.b32.xlu1 %v579_v19, %s2978_s27 }
 0x1d0   :  { %v576_v25 = vpop.permute.xlu0 %575 }
 0x1d1   :  { %v580_v26 = vmul.f32 %v2843_v24, %v576_v25 }
 0x1d3   :  { %585 = vrot.lane.b32.xlu2 %v580_v26, %s2978_s27 }
 0x225   :  { %v584_v28 = vpop.permute.xlu1 %583 }
 0x226   :  { %v3552_v29 = vadd.f32 %v584_v28, %v569_v27 }
 0x228   :  { %2844 = vtanh.f32 %v3552_v29 }
 0x22d   :  { %v586_v31 = vpop.permute.xlu2 %585 }
 0x22e   :  { %v2845_v32 = vpop.eup %2844  ;;  %v3555_v33 = vadd.f32 %v586_v31, %v570_v30 }
 0x22f   :  { %595 = vrot.lane.b32.xlu0 %v2845_v32, %s2977_s26 }
 0x230   :  { %2846 = vtanh.f32 %v3555_v33 }
 0x236   :  { %v2847_v34 = vpop.eup %2846 }
 0x237   :  { %597 = vrot.lane.b32.xlu1 %v2847_v34, %s2977_s26 }
 0x2a1   :  { %v596_v38 = vpop.permute.xlu0 %595 }
 0x2a2   :  { %v3575_v39 = vmul.f32 %v2839_v17, %v596_v38 }
 0x2a4   :  { %605 = vrot.lane.b32.xlu2 %v3575_v39, %s2978_s27 }
 0x2a9   :  { %v598_v40 = vpop.permute.xlu1 %597 }
 0x2aa   :  { %v3579_v41 = vmul.f32 %v2843_v24, %v598_v40 }
 0x2ac   :  { %607 = vrot.lane.b32.xlu0 %v3579_v41, %s2978_s27 }
 0x2fe   :  { %v606_v42 = vpop.permute.xlu2 %605 }
 0x2ff   :  { %2596 = vmatmul.msk.f32.vlgmr.msrb.gmra.mxu0 %vm437_vm1, %v606_v42  ;;  %2614 = vmatmul.msk.f32.vlgmr.msrb.gmra.mxu1 %vm437_vm1, %v606_v42 }
 0x31e   :  { %v608_v43 = vpop.permute.xlu0 %607 }
 0x31f   :  { %2597 = vmatmul.msk.f32.gmra.mxu0 %vm437_vm1, %v608_v43  ;;  %2615 = vmatmul.msk.f32.gmra.mxu1 %vm437_vm1, %v608_v43 }
 0x37c   :  { %v630_v52 = vpop.f32.mrf.mxu0  ;;  %v653_v53 = vpop.f32.mrf.mxu1 }
 0x37d   :  { %v664_v54 = vrot.slane %v630_v52, 6  ;;  %v665_v55 = vrot.slane %v653_v53, 6 }
 0x37f   :  { %v674_v63 = vadd.f32 %v664_v54, %v3535_v1  ;;  %v675_v0 = vadd.f32 %v665_v55, %v3538_v2 }
 0x381   :  { %v681_v9 = vrot.slane %v674_v63, 2  ;;  %v688_v10 = vrot.slane %v675_v0, 2 }
 0x39c   :  { %v633_v56 = vpop.f32.mrf.mxu0  ;;  %v656_v58 = vpop.f32.mrf.mxu1 }
 0x39d   :  { %v666_v59 = vrot.slane %v633_v56, 6  ;;  %v668_v60 = vrot.slane %v656_v58, 6  ;;  %v1019_v56 = vrot.slane %v3575_v39, 7  ;;  %v1017_v58 = vrot.slane %v3575_v39, 5 }
 0x39f   :  { %v667_v3 = vsel %vm663_vm14, %v664_v54, %v666_v59  ;;  %v669_v5 = vsel %vm663_vm14, %v665_v55, %v668_v60  ;;  %v1018_v60 = vrot.slane %v3575_v39, 6 }
 0x3a0   :  { %v676_v7 = vadd.f32 %v667_v3, %v3596_v61  ;;  %v677_v8 = vadd.f32 %v669_v5, %v3599_v62 }
 0x3a2   :  { %v682_v11 = vrot.slane %v676_v7, 2  ;;  %v689_v12 = vrot.slane %v677_v8, 2 }
 0x3a4   :  { %v683_v13 = vsel %vm680_vm15, %v681_v9, %v682_v11  ;;  %v690_v14 = vsel %vm680_vm15, %v688_v10, %v689_v12  ;;  %v694_v1 = vsel %vm3540_vm13, %v682_v11, %v689_v12 }
 0x3a5   :  { %v693_v2 = vsel %vm3528_vm11, %v683_v13, %v690_v14  ;;  %2848 = vtanh.f32 %v694_v1  ;;  %v696_v17 = vsub.f32 0.0, %v694_v1 }
 0x3a6   :  { %2850 = vtanh.f32 %v693_v2  ;;  %v695_v21 = vsub.f32 0.0, %v693_v2 }
 0x3a7   :  { %v699_v18 = vmul.f32 1.442695, %v696_v17 }
 0x3a8   :  { %v697_v25 = vmul.f32 1.442695, %v695_v21 }
 0x3a9   :  { %2852 = vpow2.f32 %v699_v18 }
 0x3ab   :  { %v2849_v15 = vpop.eup %2848 }
 0x3ac   :  { %v2851_v16 = vpop.eup %2850  ;;  %713 = vrot.lane.b32.xlu2 %v2849_v15, %s2977_s26  ;;  %v3657_v15 = vadd.f32 %v3587_v46, %v3522_v49 }
 0x3ad   :  { %711 = vrot.lane.b32.xlu1 %v2851_v16, %s2977_s26  ;;  %v3661_v16 = vadd.f32 %v3589_v47, %v3524_v50 }
 0x3af   :  { %v2853_v19 = vpop.eup %2852 }
 0x3b0   :  { %v702_v20 = vadd.f32 1.0, %v2853_v19 }
 0x3b2   :  { %2854 = vrcp.f32 %v702_v20 }
 0x3b3   :  { %2856 = vpow2.f32 %v697_v25 }
 0x3b8   :  { %v2855_v22 = vpop.eup %2854 }
 0x3b9   :  { %v2857_v26 = vpop.eup %2856  ;;  %v708_v32 = vmul.f32 %v2855_v22, %v3555_v33 }
 0x3ba   :  { %v701_v27 = vadd.f32 1.0, %v2857_v26 }
 0x3bc   :  { %2858 = vrcp.f32 %v701_v27 }
 0x3c2   :  { %v2859_v28 = vpop.eup %2858 }
 0x3c3   :  { %v707_v37 = vmul.f32 %v2859_v28, %v3552_v29 }
 0x406   :  { %v714_v23 = vpop.permute.xlu2 %713 }
 0x407   :  { %v718_v24 = vmul.f32 %v2855_v22, %v714_v23 }
 0x409   :  { %723 = vrot.lane.b32.xlu1 %v718_v24, %s2978_s27 }
 0x41f   :  { %v712_v30 = vpop.permute.xlu1 %711 }
 0x420   :  { %v717_v31 = vmul.f32 %v2859_v28, %v712_v30 }
 0x422   :  { %721 = vrot.lane.b32.xlu0 %v717_v31, %s2978_s27 }
 0x47b   :  { %v724_v34 = vpop.permute.xlu1 %723 }
 0x47c   :  { %v3618_v35 = vadd.f32 %v724_v34, %v708_v32 }
 0x47e   :  { %2860 = vtanh.f32 %v3618_v35 }
 0x484   :  { %v2861_v36 = vpop.eup %2860 }
 0x485   :  { %735 = vrot.lane.b32.xlu0 %v2861_v36, %s2977_s26 }
 0x494   :  { %v722_v38 = vpop.permute.xlu0 %721 }
 0x495   :  { %v3623_v40 = vadd.f32 %v722_v38, %v707_v37 }
 0x497   :  { %2862 = vtanh.f32 %v3623_v40 }
 0x49d   :  { %v2863_v42 = vpop.eup %2862 }
 0x49e   :  { %733 = vrot.lane.b32.xlu2 %v2863_v42, %s2977_s26 }
 0x4f7   :  { %v736_v43 = vpop.permute.xlu0 %735 }
 0x4f8   :  { %v740_v33 = vmul.f32 %v2855_v22, %v736_v43  ;;  %v734_v44 = vpop.permute.xlu2 %733 }
 0x4f9   :  { %v3627_v45 = vmul.f32 %v2859_v28, %v734_v44 }
 0x4fa   :  { %v1053_v52 = vperm.slane %v740_v33, 0  ;;  %745 = vrot.lane.b32.xlu2 %v740_v33, %s2978_s27 }
 0x4fb   :  { %743 = vrot.lane.b32.xlu1 %v3627_v45, %s2978_s27  ;;  %v1031_v53 = vrot.slane %v3627_v45, 7  ;;  %v1029_v54 = vrot.slane %v3627_v45, 5  ;;  %v1030_v55 = vrot.slane %v3627_v45, 6 }
 0x4fc   :  { %v3634_v29 = vsel %vm1094_vm2, %v3579_v41, %v1053_v52 }
 0x4fd   :  { %v1052_v59 = vperm.slane %v1031_v53, 0  ;;  %v1050_v63 = vperm.slane %v1029_v54, 0  ;;  %v1051_v0 = vperm.slane %v1030_v55, 0 }
 0x4ff   :  { %v3643_v3 = vsel %vm1094_vm2, %v1019_v56, %v1052_v59  ;;  %v3646_v41 = vsel %vm1094_vm2, %v1017_v58, %v1050_v63  ;;  %v3649_v5 = vsel %vm1094_vm2, %v1018_v60, %v1051_v0 }
 0x554   :  { %v746_v8 = vpop.permute.xlu2 %745 }
 0x56d   :  { %v744_v7 = vpop.permute.xlu1 %743 }
 0x56e   :  { %2632 = vmatmul.msk.f32.vlgmr.msrb.gmra.mxu2 %vm437_vm1, %v744_v7  ;;  %2650 = vmatmul.msk.f32.vlgmr.msrb.gmra.mxu3 %vm437_vm1, %v744_v7 }
 0x576   :  { %2633 = vmatmul.msk.f32.gmra.mxu2 %vm437_vm1, %v746_v8  ;;  %2651 = vmatmul.msk.f32.gmra.mxu3 %vm437_vm1, %v746_v8  ;;  %v1028_v8 = vrot.slane %v3627_v45, 3 }
 0x5f1   :  { %v768_v9 = vpop.f32.mrf.mxu2  ;;  %v791_v10 = vpop.f32.mrf.mxu3 }
 0x5f2   :  { %v802_v11 = vrot.slane %v768_v9, 4  ;;  %v803_v12 = vrot.slane %v791_v10, 4  ;;  %v1026_v9 = vrot.slane %v3627_v45, 1 }
 0x5f4   :  { %v812_v17 = vadd.f32 %v802_v11, %v3596_v61  ;;  %v813_v18 = vadd.f32 %v803_v12, %v3599_v62 }
 0x5f6   :  { %v818_v23 = vrot.slane %v812_v17, 4  ;;  %v825_v24 = vrot.slane %v813_v18, 4  ;;  %v1014_v18 = vrot.slane %v3575_v39, 1 }
 0x5f9   :  { %v771_v13 = vpop.f32.mrf.mxu2  ;;  %v794_v14 = vpop.f32.mrf.mxu3 }
 0x5fa   :  { %v804_v1 = vrot.slane %v771_v13, 4  ;;  %v806_v2 = vrot.slane %v794_v14, 4 }
 0x5fc   :  { %v805_v19 = vsel %vm801_vm3, %v802_v11, %v804_v1  ;;  %v807_v20 = vsel %vm801_vm3, %v803_v12, %v806_v2  ;;  %v1049_v11 = vperm.slane %v1028_v8, 0  ;;  %v1046_v12 = vperm.slane %v3627_v45, 0 }
 0x5fd   :  { %v814_v21 = vadd.f32 %v805_v19, %v3657_v15  ;;  %v815_v22 = vadd.f32 %v807_v20, %v3661_v16  ;;  %v1015_v1 = vrot.slane %v3575_v39, 2  ;;  %v1016_v2 = vrot.slane %v3575_v39, 3 }
 0x5fe   :  { %v1047_v19 = vperm.slane %v1026_v9, 0 }
 0x5ff   :  { %v819_v46 = vrot.slane %v814_v21, 4  ;;  %v826_v25 = vrot.slane %v815_v22, 4  ;;  %v1098_v22 = vsel %vm1094_vm2, %v1016_v2, %v1049_v11 }
 0x601   :  { %v820_v26 = vsel %vm801_vm3, %v818_v23, %v819_v46  ;;  %v827_v47 = vsel %vm801_vm3, %v825_v24, %v826_v25  ;;  %v831_v61 = vsel %vm3540_vm13, %v819_v46, %v826_v25 }
 0x602   :  { %v830_v62 = vsel %vm3528_vm11, %v820_v26, %v827_v47  ;;  %2864 = vtanh.f32 %v831_v61  ;;  %v833_v30 = vsub.f32 0.0, %v831_v61 }
 0x603   :  { %2866 = vtanh.f32 %v830_v62  ;;  %v832_v31 = vsub.f32 0.0, %v830_v62 }
 0x604   :  { %v836_v32 = vmul.f32 1.442695, %v833_v30 }
 0x605   :  { %v834_v34 = vmul.f32 1.442695, %v832_v31 }
 0x606   :  { %2868 = vpow2.f32 %v836_v32 }
 0x607   :  { %2870 = vpow2.f32 %v834_v34 }
 0x608   :  { %v2865_v27 = vpop.eup %2864 }
 0x609   :  { %v2867_v28 = vpop.eup %2866  ;;  %850 = vrot.lane.b32.xlu1 %v2865_v27, %s2977_s26 }
 0x60a   :  { %848 = vrot.lane.b32.xlu0 %v2867_v28, %s2977_s26 }
 0x60c   :  { %v2869_v36 = vpop.eup %2868 }
 0x60d   :  { %v2871_v37 = vpop.eup %2870  ;;  %v839_v38 = vadd.f32 1.0, %v2869_v36 }
 0x60e   :  { %v838_v42 = vadd.f32 1.0, %v2871_v37 }
 0x60f   :  { %2872 = vrcp.f32 %v839_v38 }
 0x610   :  { %2874 = vrcp.f32 %v838_v42 }
 0x615   :  { %v2873_v43 = vpop.eup %2872 }
 0x616   :  { %v2875_v44 = vpop.eup %2874  ;;  %v845_v60 = vmul.f32 %v2873_v43, %v3618_v35 }
 0x617   :  { %v844_v55 = vmul.f32 %v2875_v44, %v3623_v40  ;;  %v1027_v40 = vrot.slane %v3627_v45, 2  ;;  %v1095_v45 = vsel %vm1094_vm2, %v3575_v39, %v1046_v12  ;;  %v1096_v39 = vsel %vm1094_vm2, %v1014_v18, %v1047_v19 }
 0x619   :  { %v1048_v10 = vperm.slane %v1027_v40, 0 }
 0x61b   :  { %v1097_v21 = vsel %vm1094_vm2, %v1015_v1, %v1048_v10  ;;  %vm1739_vm2 = vcmask 1047556  }
 0x67b   :  { %v851_v33 = vpop.permute.xlu1 %850 }
 0x67c   :  { %v855_v52 = vmul.f32 %v2873_v43, %v851_v33  ;;  %v849_v53 = vpop.permute.xlu0 %848 }
 0x67d   :  { %v854_v54 = vmul.f32 %v2875_v44, %v849_v53 }
 0x67e   :  { %860 = vrot.lane.b32.xlu0 %v855_v52, %s2978_s27 }
 0x67f   :  { %858 = vrot.lane.b32.xlu2 %v854_v54, %s2978_s27 }
 0x6d9   :  { %v859_v56 = vpop.permute.xlu2 %858 }
 0x6da   :  { %v3680_v58 = vadd.f32 %v859_v56, %v844_v55 }
 0x6dc   :  { %2876 = vtanh.f32 %v3680_v58 }
 0x6e2   :  { %v2877_v59 = vpop.eup %2876 }
 0x6e3   :  { %870 = vrot.lane.b32.xlu1 %v2877_v59, %s2977_s26 }
 0x6f0   :  { %v861_v63 = vpop.permute.xlu0 %860 }
 0x6f1   :  { %v3685_v0 = vadd.f32 %v861_v63, %v845_v60  ;;  %v298_v63 = vadd.f32 %v3593_v51, %v3524_v50 }
 0x6f3   :  { %2878 = vtanh.f32 %v3685_v0 }
 0x6f9   :  { %v2879_v7 = vpop.eup %2878 }
 0x6fa   :  { %872 = vrot.lane.b32.xlu2 %v2879_v7, %s2977_s26 }
 0x754   :  { %v873_v13 = vpop.permute.xlu2 %872 }
 0x755   :  { %v877_v35 = vmul.f32 %v2873_v43, %v873_v13  ;;  %v871_v14 = vpop.permute.xlu1 %870 }
 0x756   :  { %v876_v17 = vmul.f32 %v2875_v44, %v871_v14 }
 0x757   :  { %v1069_v20 = vperm.slane %v877_v35, 0  ;;  %882 = vrot.lane.b32.xlu1 %v877_v35, %s2978_s27 }
 0x758   :  { %880 = vrot.lane.b32.xlu0 %v876_v17, %s2978_s27  ;;  %v1033_v23 = vrot.slane %v876_v17, 2  ;;  %v1034_v24 = vrot.slane %v876_v17, 3  ;;  %v1032_v46 = vrot.slane %v876_v17, 1  ;;  %v1062_v25 = vperm.slane %v876_v17, 0 }
 0x759   :  { %v3704_v26 = vsel %vm663_vm14, %v3634_v29, %v1069_v20  ;;  %v1037_v47 = vrot.slane %v876_v17, 7  ;;  %v1035_v61 = vrot.slane %v876_v17, 5  ;;  %v1036_v62 = vrot.slane %v876_v17, 6 }
 0x75a   :  { %v1064_v27 = vperm.slane %v1033_v23, 0  ;;  %v1065_v28 = vperm.slane %v1034_v24, 0  ;;  %v1063_v30 = vperm.slane %v1032_v46, 0  ;;  %v3707_v31 = vsel %vm663_vm14, %v1095_v45, %v1062_v25  ;;  %v3758_v45 = vld [vmem:[%s4383_s3 + $0x18] sm:$0xff]  ;;  %v3763_v23 = vld [vmem:[%s4383_s3 + $0x10] sm:$0xff]  ;;  %v3775_v24 = vld [vmem:[%s4383_s3] sm:$0xff] }
 0x75b   :  { %v1068_v32 = vperm.slane %v1037_v47, 0  ;;  %v1066_v34 = vperm.slane %v1035_v61, 0  ;;  %v1067_v36 = vperm.slane %v1036_v62, 0  ;;  %1145 = vmatpush.msra.mxu2 %v3758_v45 }
 0x75c   :  { %v3711_v37 = vsel %vm663_vm14, %v1097_v21, %v1064_v27  ;;  %v3714_v29 = vsel %vm663_vm14, %v1098_v22, %v1065_v28  ;;  %v3717_v38 = vsel %vm663_vm14, %v1096_v39, %v1063_v30 }
 0x75d   :  { %v3721_v42 = vsel %vm663_vm14, %v3643_v3, %v1068_v32  ;;  %v3725_v43 = vsel %vm663_vm14, %v3646_v41, %v1066_v34  ;;  %v3729_v33 = vsel %vm663_vm14, %v3649_v5, %v1067_v36  ;;  %v266_v5 = vadd.f32 %v3591_v48, %v3522_v49  ;;  %1146 = vmatpush.msra.mxu2 %v3763_v23 }
 0x7c9   :  { %v883_v52 = vpop.permute.xlu1 %882 }
 0x7ca   :  { %v881_v44 = vpop.permute.xlu0 %880 }
 0x7cb   :  { %2668 = vmatmul.msk.f32.vlgmr.msra.gmra.mxu0 %vm437_vm1, %v881_v44  ;;  %2686 = vmatmul.msk.f32.vlgmr.msra.gmra.mxu1 %vm437_vm1, %v881_v44 }
 0x7d3   :  { %2669 = vmatmul.msk.f32.gmra.mxu0 %vm437_vm1, %v883_v52  ;;  %2687 = vmatmul.msk.f32.gmra.mxu1 %vm437_vm1, %v883_v52 }
 0x848   :  { %v905_v3 = vpop.f32.mrf.mxu0  ;;  %v928_v53 = vpop.f32.mrf.mxu1 }
 0x849   :  { %v938_v54 = vrot.slane %v905_v3, 2  ;;  %v939_v55 = vrot.slane %v928_v53, 2 }
 0x84b   :  { %v948_v7 = vadd.f32 %v938_v54, %v3657_v15  ;;  %v949_v40 = vadd.f32 %v939_v55, %v3661_v16 }
 0x84d   :  { %v954_v12 = vrot.slane %v948_v7, 6  ;;  %v961_v13 = vrot.slane %v949_v40, 6 }
 0x850   :  { %v908_v41 = vpop.f32.mrf.mxu0  ;;  %v931_v56 = vpop.f32.mrf.mxu1 }
 0x851   :  { %v940_v59 = vrot.slane %v908_v41, 2  ;;  %v942_v60 = vrot.slane %v931_v56, 2 }
 0x853   :  { %v941_v8 = vsel %vm680_vm15, %v938_v54, %v940_v59  ;;  %v943_v9 = vsel %vm680_vm15, %v939_v55, %v942_v60  ;;  %vm1780_vm15 = vcmask 785408  }
 0x854   :  { %v950_v10 = vadd.f32 %v941_v8, %v266_v5  ;;  %v951_v11 = vadd.f32 %v943_v9, %v298_v63 }
 0x856   :  { %v955_v35 = vrot.slane %v950_v10, 6  ;;  %v962_v14 = vrot.slane %v951_v11, 6 }
 0x858   :  { %v956_v1 = vsel %vm663_vm14, %v954_v12, %v955_v35  ;;  %v963_v49 = vsel %vm663_vm14, %v961_v13, %v962_v14  ;;  %v3747_v50 = vsel %vm3540_vm13, %v955_v35, %v962_v14  ;;  %vm1532_vm13 = vcmask 24576  }
 0x859   :  { %v966_v48 = vsel %vm3528_vm11, %v956_v1, %v963_v49  ;;  %v1120_v49 = vld [vmem:[%s4381_s1] sm:$0x1f] }
 0x85a   :  { %2880 = vtanh.f32 %v966_v48  ;;  %v968_v15 = vsub.f32 0.0, %v966_v48 }
 0x85c   :  { %v970_v16 = vmul.f32 1.442695, %v968_v15 }
 0x85e   :  { %2882 = vpow2.f32 %v970_v16 }
 0x860   :  { %v2881_v51 = vpop.eup %2880 }
 0x861   :  { %984 = vrot.lane.b32.xlu2 %v2881_v51, %s2977_s26 }
 0x864   :  { %v2883_v2 = vpop.eup %2882 }
 0x865   :  { %v974_v17 = vadd.f32 1.0, %v2883_v2 }
 0x867   :  { %2884 = vrcp.f32 %v974_v17 }
 0x86d   :  { %v2885_v18 = vpop.eup %2884 }
 0x86e   :  { %v980_v6 = vmul.f32 %v2885_v18, %v3680_v58  ;;  %v3769_v58 = vld [vmem:[%s4383_s3 + $0x8] sm:$0xff] }
 0x86f   :  { %1147 = vmatpush.msra.mxu2 %v3769_v58 }
 0x871   :  { %1148 = vmatpush.msra.mxu2 %v3775_v24 }
 0x8bb   :  { %v985_v19 = vpop.permute.xlu2 %984 }
 0x8bc   :  { %v990_v20 = vmul.f32 %v2885_v18, %v985_v19 }
 0x8be   :  { %994 = vrot.lane.b32.xlu0 %v990_v20, %s2978_s27 }
 0x930   :  { %v995_v21 = vpop.permute.xlu0 %994 }
 0x931   :  { %v1000_v57 = vadd.f32 %v995_v21, %v980_v6  ;;  %v3839_v6 = vld [vmem:[%s4383_s3 + $0x38] sm:$0xff]  ;;  %v3844_v21 = vld [vmem:[%s4383_s3 + $0x30] sm:$0xff] }
 0x933   :  { %2886 = vtanh.f32 %v1000_v57  ;;  %v3856_v57 = vld [vmem:[%s4383_s3 + $0x20] sm:$0xff] }
 0x934   :  { %2888 = vtanh.f32 %v3747_v50 }
 0x939   :  { %v2887_v22 = vpop.eup %2886 }
 0x93a   :  { %1006 = vrot.lane.b32.xlu1 %v2887_v22, %s2977_s26 }
 0x9ac   :  { %v1007_v46 = vpop.permute.xlu1 %1006 }
 0x9ad   :  { %v3779_v25 = vmul.f32 %v2885_v18, %v1007_v46 }
 0x9af   :  { %1129 = vrot.lane.b32.xlu2 %v3779_v25, %s2978_s27  ;;  %v1041_v47 = vrot.slane %v3779_v25, 2  ;;  %v1042_v61 = vrot.slane %v3779_v25, 3  ;;  %v1040_v62 = vrot.slane %v3779_v25, 1  ;;  %v1043_v27 = vrot.slane %v3779_v25, 5 }
 0x9b0   :  { %v1045_v28 = vrot.slane %v3779_v25, 7  ;;  %v1044_v30 = vrot.slane %v3779_v25, 6  ;;  %v1078_v34 = vperm.slane %v3779_v25, 0 }
 0x9b1   :  { %v1080_v39 = vperm.slane %v1041_v47, 0  ;;  %v1081_v32 = vperm.slane %v1042_v61, 0  ;;  %v1079_v36 = vperm.slane %v1040_v62, 0  ;;  %v1082_v54 = vperm.slane %v1043_v27, 0 }
 0x9b2   :  { %v1084_v44 = vperm.slane %v1045_v28, 0  ;;  %v1083_v52 = vperm.slane %v1044_v30, 0  ;;  %v1112_v60 = vsel %vm1111_vm4, %v3707_v31, %v1078_v34  ;;  %v2889_v31 = vpop.eup %2888  ;;  %v3875_v28 = vld [vmem:[%s4383_s3 + $0x40] sm:$0xff] }
 0x9b3   :  { %v1115_v3 = vsel %vm1111_vm4, %v3714_v29, %v1081_v32  ;;  %v1113_v53 = vsel %vm1111_vm4, %v3717_v38, %v1079_v36  ;;  %v1114_v59 = vsel %vm1111_vm4, %v3711_v37, %v1080_v39  ;;  %v3890_v36 = vld [vmem:[%s4383_s3 + $0x50] sm:$0xff] }
 0x9b4   :  { %v1125_v55 = vrot.slane %v1115_v3, 4  ;;  %v1122_v41 = vrot.slane %v1113_v53, 4  ;;  %v1118_v56 = vsel %vm1111_vm4, %v3721_v42, %v1084_v44  ;;  %v1117_v5 = vsel %vm1111_vm4, %v3729_v33, %v1083_v52  ;;  %v3897_v44 = vld [vmem:[%s4383_s3 + $0x58] sm:$0xff] }
 0x9b5   :  { %v1856_v38 = vrot.slane %v1117_v5, 4  ;;  %v1116_v42 = vsel %vm1111_vm4, %v3725_v43, %v1082_v54  ;;  %v969_v33 = vsub.f32 0.0, %v3747_v50 }
 0x9b6   :  { %v1128_v29 = vsel %vm801_vm3, %v1114_v59, %v1125_v55  ;;  %v1127_v63 = vsel %vm801_vm3, %v1112_v60, %v1122_v41 }
 0x9b7   :  { %1309 = vrot.lane.b32.xlu1 %v1128_v29, %s2978_s27  ;;  %1307 = vrot.lane.b32.xlu2 %v1127_v63, %s2978_s27  ;;  %v3810_v37 = vsel %vm801_vm3, %v1116_v42, %v1856_v38  ;;  %v972_v7 = vmul.f32 1.442695, %v969_v33 }
 0x9b9   :  { %2890 = vpow2.f32 %v972_v7 }
 0x9bf   :  { %986 = vrot.lane.b32.xlu2 %v2889_v31, %s2977_s26  ;;  %v2891_v8 = vpop.eup %2890 }
 0x9c0   :  { %v975_v9 = vadd.f32 1.0, %v2891_v8 }
 0x9c2   :  { %2892 = vrcp.f32 %v975_v9 }
 0x9c8   :  { %v2893_v43 = vpop.eup %2892 }
 0x9c9   :  { %v981_v13 = vmul.f32 %v2893_v43, %v3685_v0 }
 0xa09   :  { %v1130_v40 = vpop.permute.xlu2 %1129 }
 0xa0a   :  { %2688 = vmatmul.msk.f32.vlgmr.msra.gmra.mxu2 %vm437_vm1, %v1130_v40 }
 0xa11   :  { %v3815_v10 = vpop.permute.xlu2 %1307 }
 0xa19   :  { %v987_v11 = vpop.permute.xlu2 %986 }
 0xa1a   :  { %v991_v12 = vmul.f32 %v2893_v43, %v987_v11 }
 0xa1c   :  { %996 = vrot.lane.b32.xlu2 %v991_v12, %s2978_s27  ;;  %v3916_v12 = vld [vmem:[%s4384_s4] sm:$0xff] }
 0xa76   :  { %v997_v35 = vpop.permute.xlu2 %996 }
 0xa77   :  { %v1001_v14 = vadd.f32 %v997_v35, %v981_v13  ;;  %v3923_v13 = vld [vmem:[%s4384_s4 + $0x8] sm:$0xff]  ;;  %v3930_v35 = vld [vmem:[%s4384_s4 + $0x10] sm:$0xff] }
 0xa79   :  { %2894 = vtanh.f32 %v1001_v14  ;;  %v3937_v14 = vld [vmem:[%s4384_s4 + $0x18] sm:$0xff] }
 0xa7f   :  { %v2895_v1 = vpop.eup %2894 }
 0xa80   :  { %1008 = vrot.lane.b32.xlu2 %v2895_v1, %s2977_s26 }
 0xa88   :  { %1638 = vrot.lane.b32.xlu2 %v1040_v62, %s2978_s27 }
 0xa8d   :  { %v1150_v50 = vpop.f32.mrf.mxu2 }
 0xa8e   :  { %2689 = vmatpush.msk.msrb.mxu2 %vm1157_vm5, %v1150_v50  ;;  %v3949_v50 = vld [vmem:[%s4383_s3 + $0x78] sm:$0xff] }
 0xa8f   :  { %2690 = vmatmul.msk.f32.vlgmr.msrb.gmra.mxu2 %vm1153_vm6, %v1120_v49 }
 0xa90   :  { %1197 = vmatpush.msra.mxu2 %v3839_v6 }
 0xa92   :  { %1198 = vmatpush.msra.mxu2 %v3844_v21 }
 0xada   :  { %v1009_v0 = vpop.permute.xlu2 %1008 }
 0xadb   :  { %v1013_v48 = vmul.f32 %v2893_v43, %v1009_v0 }
 0xadd   :  { %v1085_v51 = vperm.slane %v1013_v48, 0  ;;  %v1863_v15 = vrot.slane %v1013_v48, 5  ;;  %v2338_v16 = vrot.slane %v1013_v48, 6 }
 0xadf   :  { %v1864_v2 = vsel %vm1111_vm4, %v1043_v27, %v1863_v15  ;;  %v1119_v17 = vsel %vm1111_vm4, %v3704_v26, %v1085_v51  ;;  %v3830_v18 = vsel %vm663_vm14, %v1044_v30, %v2338_v16  ;;  %v3850_v26 = vld [vmem:[%s4383_s3 + $0x28] sm:$0xff]  ;;  %v3863_v27 = vpop.permute.xlu1 %1309  ;;  %v3960_v51 = vld [vmem:[%s4383_s3 + $0x90] sm:$0xff]  ;;  %vm1580_vm14 = vcmask 122880  }
 0xae0   :  { %1865 = vrot.lane.b32.xlu2 %v1864_v2, %s2978_s27  ;;  %v1859_v19 = vrot.slane %v1119_v17, 4  ;;  %1199 = vmatpush.msra.mxu2 %v3850_v26  ;;  %v3882_v30 = vld [vmem:[%s4383_s3 + $0x48] sm:$0xff]  ;;  %v3965_v15 = vld [vmem:[%s4383_s3 + $0x70] sm:$0xff]  ;;  %vm1738_vm4 = vcmp.ge.s32.totalorder %v3513_v4, 1 }
 0xae1   :  { %v3975_v16 = vld [vmem:[%s4383_s3 + $0x88] sm:$0xff] }
 0xae2   :  { %v3834_v20 = vsel %vm801_vm3, %v1118_v56, %v1859_v19  ;;  %1200 = vmatpush.msra.mxu2 %v3856_v57  ;;  %v3980_v2 = vld [vmem:[%s4383_s3 + $0x68] sm:$0xff]  ;;  %v3989_v19 = vld [vmem:[%s4383_s3 + $0x80] sm:$0xff] }
 0xb12   :  { %v1178_v22 = vpop.f32.mrf.mxu2 }
 0xb13   :  { %2896 = vtanh.f32 %v1178_v22  ;;  %v3994_v22 = vld [vmem:[%s4383_s3 + $0x60] sm:$0xff] }
 0xb19   :  { %v2897_v46 = vpop.eup %2896 }
 0xb1a   :  { %2691 = vmatmul.msk.f32.vlgmr.msra.gmra.mxu2 %vm437_vm1, %v2897_v46 }
 0xb9d   :  { %v1202_v25 = vpop.f32.mrf.mxu2 }
 0xb9e   :  { %2692 = vmatpush.msk.msra.mxu3 %vm1157_vm5, %v1202_v25  ;;  %v1639_v25 = vpop.permute.xlu2 %1638 }
 0xb9f   :  { %2693 = vmatmul.msk.f32.vlgmr.msra.gmra.mxu3 %vm1153_vm6, %v1120_v49  ;;  %v3944_v49 = vld [vmem:[%s4383_s3 + $0x98] sm:$0xff] }
 0xc22   :  { %v1225_v47 = vpop.f32.mrf.mxu3 }
 0xc23   :  { %2898 = vtanh.f32 %v1225_v47 }
 0xc29   :  { %v2899_v61 = vpop.eup %2898 }
 0xc2a   :  { %v1230_v62 = vrot.slane %v2899_v61, 1 }
 0xc2c   :  { %2694 = vmatpush.xpose.msk.msrb.mxu2 %vm437_vm1, %v1230_v62  ;;  %2696 = vmatpush.msk.msrb.mxu3 %vm801_vm3, %v1230_v62 }
 0xc2f   :  { %2695 = vmatmul.msk.f32.vlgmr.msrb.gmra.mxu2 %vm437_vm1, %v1230_v62 }
 0xc30   :  { %2698 = vmatpush.xpose.msk.msra.mxu2 %vm437_vm1, %v3863_v27 }
 0xc34   :  { %2699 = vmatpush.xpose.msk.msra.mxu2 %vm437_vm1, %v3815_v10 }
 0xc37   :  { %2700 = vmatmul.msk.f32.vlgmr.msra.gmra.mxu2 %vm437_vm1, %v3875_v28 }
 0xc3f   :  { %2701 = vmatmul.msk.f32.gmra.mxu2 %vm437_vm1, %v3882_v30 }
 0xc47   :  { %2702 = vmatmul.msk.f32.gmra.mxu2 %vm437_vm1, %v3890_v36 }
 0xc4f   :  { %2703 = vmatmul.msk.f32.gmra.mxu2 %vm437_vm1, %v3897_v44 }
 0xcb2   :  { %v1250_v39 = vpop.f32.mrf.mxu2 }
 0xcb3   :  { %v1253_v32 = vmul.f32 0.057735026, %v1250_v39 }
 0xcb5   :  { %v1255_v34 = vsel %vm1254_vm7, %v1253_v32, -inf }
 0xcb6   :  { %1256 = vmax.xlane.f32.xlu0 %v1255_v34 }
 0xcba   :  { %v1344_v41 = vpop.f32.mrf.mxu2 }
 0xcc2   :  { %v1347_v56 = vpop.f32.mrf.mxu2 }
 0xcca   :  { %v1350_v59 = vpop.f32.mrf.mxu2 }
 0xcd2   :  { %v1353_v60 = vpop.f32.mrf.mxu2 }
 0xcd3   :  { %1371 = vmatpush.msra.mxu3 %v1353_v60 }
 0xcd5   :  { %1372 = vmatpush.msra.mxu3 %v1350_v59 }
 0xcd7   :  { %1373 = vmatpush.msra.mxu3 %v1347_v56  ;;  %v4061_v56 = vld [vmem:[%s4383_s3 + $0xa0] sm:$0xff] }
 0xcd9   :  { %1374 = vmatpush.msra.mxu3 %v1344_v41  ;;  %v4054_v41 = vld [vmem:[%s4383_s3 + $0xa8] sm:$0xff] }
 0xd29   :  { %v1257_v52 = vpop.xlane.xlu0 %1256 }
 0xd2a   :  { %v1258_v3 = vsub.f32 %v1253_v32, %v1257_v52 }
 0xd2c   :  { %v1259_v53 = vmul.f32 1.442695, %v1258_v3  ;;  %v4028_v3 = vld [vmem:[%s4386_s6 + $0x3] ss:$0 sm:$0xff] }
 0xd2e   :  { %2900 = vpow2.f32 %v1259_v53 }
 0xd34   :  { %v2901_v54 = vpop.eup %2900 }
 0xd35   :  { %v1261_v55 = vsel %vm1254_vm7, %v2901_v54, 0.0 }
 0xd36   :  { %1262 = vadd.xlane.f32.xlu1 %v1261_v55 }
 0xda9   :  { %v1263_v5 = vpop.xlane.xlu1 %1262 }
 0xdaa   :  { %2902 = vrcp.f32 %v1263_v5  ;;  %v1275_v42 = vand.u32 2147483648, %v1263_v5  ;;  %v1273_v33 = vand.u32 2147483647, %v1263_v5  ;;  %vm1269_vm9 = vweird.f32 %v1263_v5 }
 0xdac   :  { %v1276_v40 = vor.u32 1.1754944e-38, %v1275_v42  ;;  %vm1274_vm11 = vcmp.eq.f32.partialorder %v1273_v33, 8.507059e+37 }
 0xdb0   :  { %v2903_v29 = vpop.eup %2902 }
 0xdb1   :  { %v1265_v63 = vmul.f32 %v2903_v29, %v1263_v5  ;;  %vm1270_vm8 = vweird.f32 %v2903_v29 }
 0xdb2   :  { %vm1271_vm10 = vmor %vm1269_vm9, %vm1270_vm8 }
 0xdb3   :  { %v1266_v38 = vsub.f32 1.0, %v1265_v63 }
 0xdb5   :  { %v1267_v31 = vmul.f32 %v2903_v29, %v1266_v38 }
 0xdb7   :  { %v1268_v7 = vadd.f32 %v2903_v29, %v1267_v31 }
 0xdb9   :  { %v1272_v8 = vsel %vm1271_vm10, %v2903_v29, %v1268_v7 }
 0xdba   :  { %v1277_v9 = vsel %vm1274_vm11, %v1276_v40, %v1272_v8 }
 0xdbb   :  { %v1278_v43 = vmul.f32 %v2901_v54, %v1277_v9  ;;  %v2753_v54 = vld [vmem:[%s4381_s1 + $0x8] sm:$0x1f]  ;;  %v4087_v9 = vld [vmem:[%s4385_s5 + $0x70] sm:$0xff] }
 0xdbd   :  { %2697 = vmatmul.msk.f32.vlgmr.msrb.gmra.mxu3 %vm1279_vm12, %v1278_v43  ;;  %v4094_v43 = vld [vmem:[%s4385_s5 + $0x68] sm:$0xff] }
 0xdbe   :  { %2705 = vmatpush.xpose.msk.msrb.mxu3 %vm437_vm1, %v3863_v27 }
 0xdc2   :  { %2706 = vmatpush.xpose.msk.msrb.mxu3 %vm437_vm1, %v3815_v10 }
 0xe40   :  { %v3907_v11 = vpop.f32.mrf.mxu3 }
 0xe41   :  { %2704 = vmatmul.msk.f32.vlgmr.msra.gmra.mxu3 %vm437_vm1, %v3907_v11 }
 0xe42   :  { %2709 = vmatpush.xpose.msk.msra.mxu3 %vm437_vm1, %v3907_v11 }
 0xe49   :  { %2707 = vmatmul.msk.f32.vlgmr.msrb.gmra.mxu3 %vm437_vm1, %v3916_v12 }
 0xe51   :  { %2708 = vmatmul.msk.f32.gmra.mxu3 %vm437_vm1, %v3923_v13 }
 0xe59   :  { %2710 = vmatmul.msk.f32.vlgmr.msra.gmra.mxu3 %vm437_vm1, %v3930_v35 }
 0xe61   :  { %2711 = vmatmul.msk.f32.gmra.mxu3 %vm437_vm1, %v3937_v14 }
 0xec4   :  { %v1376_v1 = vpop.f32.mrf.mxu3 }
 0xec5   :  { %2904 = vtanh.f32 %v1376_v1 }
 0xecb   :  { %v2905_v0 = vpop.eup %2904 }
 0xecc   :  { %v1403_v48 = vpop.f32.mrf.mxu3  ;;  %2712 = vmatpush.msk.msrb.mxu2 %vm801_vm3, %v2905_v0  ;;  %2715 = vmatpush.xpose.msk.msrb.mxu0 %vm124_vm0, %v2905_v0 }
 0xece   :  { %2721 = vmatpush.xpose.msk.msra.mxu2 %vm437_vm1, %v3949_v50 }
 0xecf   :  { %2716 = vmatmul.msk.f32.vlgmr.msrb.gmra.mxu0 %vm124_vm0, %v1403_v48 }
 0xed0   :  { %2726 = vmatpush.xpose.msk.msra.mxu0 %vm437_vm1, %v3944_v49 }
 0xed2   :  { %2722 = vmatpush.xpose.msk.msra.mxu2 %vm437_vm1, %v3965_v15 }
 0xed4   :  { %2727 = vmatpush.xpose.msk.msra.mxu0 %vm437_vm1, %v3960_v51  ;;  %v1406_v17 = vpop.f32.mrf.mxu3 }
 0xed6   :  { %2723 = vmatpush.xpose.msk.msra.mxu2 %vm437_vm1, %v3980_v2 }
 0xed7   :  { %2717 = vmatmul.msk.f32.gmra.mxu0 %vm124_vm0, %v1406_v17 }
 0xed8   :  { %2728 = vmatpush.xpose.msk.msra.mxu0 %vm437_vm1, %v3975_v16 }
 0xeda   :  { %2724 = vmatpush.xpose.msk.msra.mxu2 %vm437_vm1, %v3994_v22 }
 0xedc   :  { %2729 = vmatpush.xpose.msk.msra.mxu0 %vm437_vm1, %v3989_v19  ;;  %v1432_v46 = vpop.f32.mrf.mxu3 }
 0xedd   :  { %2713 = vmatmul.msk.f32.vlgmr.msrb.gmra.mxu2 %vm1279_vm12, %v1432_v46 }
 0xede   :  { %1881 = vmatpush.msrb.mxu2 %v3758_v45  ;;  %v1866_v45 = vpop.permute.xlu2 %1865 }
 0xedf   :  { %2730 = vmatmul.msk.f32.vlgmr.msra.gmra.mxu0 %vm437_vm1, %v1639_v25 }
 0xee0   :  { %1882 = vmatpush.msrb.mxu2 %v3763_v23 }
 0xee2   :  { %1883 = vmatpush.msrb.mxu2 %v3769_v58 }
 0xee4   :  { %v1435_v47 = vpop.f32.mrf.mxu3  ;;  %1884 = vmatpush.msrb.mxu2 %v3775_v24 }
 0xee5   :  { %2714 = vmatmul.msk.f32.gmra.mxu2 %vm1279_vm12, %v1435_v47 }
 0xeed   :  { %2725 = vmatmul.msk.f32.vlgmr.msra.gmra.mxu2 %vm437_vm1, %v1639_v25 }
 0xeee   :  { %1931 = vmatpush.msra.mxu2 %v3839_v6  ;;  %v4017_v6 = vld [vmem:[%s4386_s6 + $0x2] ss:$0 sm:$0xff] }
 0xef0   :  { %1932 = vmatpush.msra.mxu2 %v3844_v21 }
 0xef2   :  { %1933 = vmatpush.msra.mxu2 %v3850_v26 }
 0xef4   :  { %1934 = vmatpush.msra.mxu2 %v3856_v57 }
 0xef5   :  { %2754 = vmatmul.msk.f32.vlgmr.msrb.gmra.mxu2 %vm437_vm1, %v1866_v45 }
 0xf4c   :  { %v1499_v23 = vpop.f32.mrf.mxu0 }
 0xf4d   :  { %v1505_v61 = vadd.f32 %v1499_v23, %v1432_v46 }
 0xf54   :  { %v1502_v58 = vpop.f32.mrf.mxu0 }
 0xf55   :  { %v1506_v62 = vadd.f32 %v1502_v58, %v1435_v47 }
 0xf57   :  { %2906 = vtanh.f32 %v1506_v62 }
 0xf58   :  { %2908 = vtanh.f32 %v1505_v61  ;;  %v4115_v61 = vld [vmem:[%s4385_s5 + $0x58] sm:$0xff] }
 0xf5c   :  { %v4067_v5 = vpop.f32.mrf.mxu0 }
 0xf5d   :  { %v2907_v24 = vpop.eup %2906 }
 0xf5e   :  { %1526 = vmatpush.msrb.mxu1 %v2907_v24  ;;  %v2909_v21 = vpop.eup %2908 }
 0xf60   :  { %v1464_v26 = vpop.f32.mrf.mxu2  ;;  %1527 = vmatpush.msrb.mxu1 %v2909_v21  ;;  %v4125_v21 = vld [vmem:[%s4385_s5 + $0x50] sm:$0xff] }
 0xf61   :  { %2718 = vmatmul.msk.f32.vlgmr.msrb.gmra.mxu1 %vm124_vm0, %v4017_v6  ;;  %v1470_v39 = vadd.f32 %v1464_v26, %v1403_v48  ;;  %v4101_v48 = vld [vmem:[%s4385_s5 + $0x60] sm:$0xff] }
 0xf62   :  { %1624 = vmatpush.msra.mxu1 %v3863_v27  ;;  %v4033_v27 = vld [vmem:[%s4383_s3 + $0xb8] sm:$0xff] }
 0xf64   :  { %1625 = vmatpush.msra.mxu1 %v3815_v10  ;;  %v4042_v10 = vld [vmem:[%s4383_s3 + $0xb0] sm:$0xff] }
 0xf68   :  { %v1467_v57 = vpop.f32.mrf.mxu2 }
 0xf69   :  { %v1471_v32 = vadd.f32 %v1467_v57, %v1406_v17 }
 0xf6b   :  { %2910 = vtanh.f32 %v1471_v32 }
 0xf6c   :  { %2912 = vtanh.f32 %v1470_v39  ;;  %v4132_v39 = vld [vmem:[%s4385_s5 + $0x48] sm:$0xff] }
 0xf70   :  { %v4023_v34 = vpop.f32.mrf.mxu2 }
 0xf71   :  { %v2911_v52 = vpop.eup %2910  ;;  %v1740_v23 = vrot.slane %v4023_v34, 4 }
 0xf72   :  { %1574 = vmatpush.msrb.mxu3 %v2911_v52  ;;  %v2913_v53 = vpop.eup %2912 }
 0xf73   :  { %v1741_v62 = vsel %vm1739_vm2, %v1740_v23, %v4023_v34 }
 0xf74   :  { %1575 = vmatpush.msrb.mxu3 %v2913_v53  ;;  %v1742_v26 = vrot.slane %v1741_v62, 4  ;;  %v4142_v53 = vld [vmem:[%s4385_s5 + $0x40] sm:$0xff] }
 0xf75   :  { %2719 = vmatmul.msk.f32.vlgmr.msrb.gmra.mxu3 %vm124_vm0, %v4028_v3 }
 0xf76   :  { %2731 = vmatpush.xpose.msk.msra.mxu3 %vm437_vm1, %v4033_v27  ;;  %v1743_v32 = vsel %vm1739_vm2, %v1742_v26, %v4023_v34 }
 0xf78   :  { %v1886_v55 = vpop.f32.mrf.mxu2 }
 0xf79   :  { %2755 = vmatpush.msk.msrb.mxu0 %vm1157_vm5, %v1886_v55  ;;  %v2979_v55 = vmov 3  }
 0xf7a   :  { %2732 = vmatpush.xpose.msk.msra.mxu3 %vm437_vm1, %v4042_v10  ;;  %2756 = vmatmul.msk.f32.vlgmr.msrb.gmra.mxu0 %vm1153_vm6, %v2753_v54 }
 0xf7b   :  { %2830 = vset.pattern.permute.xlu1 %v2979_v55  ;;  %2831 = vset.pattern.permute.xlu0 %v2979_v55 }
 0xf7e   :  { %2733 = vmatpush.xpose.msk.msra.mxu3 %vm437_vm1, %v4054_v41 }
 0xf82   :  { %2734 = vmatpush.xpose.msk.msra.mxu3 %vm437_vm1, %v4061_v56 }
 0xf85   :  { %2735 = vmatmul.msk.f32.vlgmr.msra.gmra.mxu3 %vm437_vm1, %v1639_v25 }
 0xfde   :  { %v1529_v59 = vpop.f32.mrf.mxu1 }
 0xfdf   :  { %v1533_v60 = vsel %vm1532_vm13, %v1529_v59, -inf }
 0xfe0   :  { %1534 = vmax.xlane.f32.xlu2 %v1533_v60 }
 0xff7   :  { %v1912_v29 = vpop.f32.mrf.mxu0 }
 0xff8   :  { %2914 = vtanh.f32 %v1912_v29  ;;  %v1577_v63 = vpop.f32.mrf.mxu3  ;;  %2041 = vrot.lane.b32.xlu2 %v3834_v20, %s2978_s27  ;;  %v4080_v20 = vld [vmem:[%s4385_s5 + $0x78] sm:$0xff] }
 0xff9   :  { %v1581_v38 = vsel %vm1580_vm14, %v1577_v63, -inf  ;;  %2736 = vmatpush.xpose.msk.msrb.mxu1 %vm1780_vm15, %v4080_v20 }
 0xffa   :  { %1582 = vmax.xlane.f32.xlu0 %v1581_v38  ;;  %v4163_v38 = vld [vmem:[%s4385_s5 + $0x30] sm:$0xff] }
 0xffd   :  { %2737 = vmatpush.xpose.msk.msrb.mxu1 %vm1780_vm15, %v4087_v9 }
 0xffe   :  { %v2915_v42 = vpop.eup %2914 }
 0xfff   :  { %2757 = vmatmul.msk.f32.vlgmr.msra.gmra.mxu2 %vm437_vm1, %v2915_v42 }
0x1001   :  { %2738 = vmatpush.xpose.msk.msrb.mxu1 %vm1780_vm15, %v4094_v43 }
0x1005   :  { %2739 = vmatpush.xpose.msk.msrb.mxu1 %vm1780_vm15, %v4101_v48 }
0x1008   :  { %v1735_v45 = vpop.f32.mrf.mxu3 }
0x1009   :  { %v1749_v58 = vrot.slane %v1735_v45, 4  ;;  %2740 = vmatpush.xpose.msk.msrb.mxu1 %vm1780_vm15, %v4115_v61 }
0x100b   :  { %v1750_v24 = vsel %vm1739_vm2, %v1749_v58, %v1735_v45 }
0x100c   :  { %v1751_v57 = vrot.slane %v1750_v24, 4 }
0x100d   :  { %2741 = vmatpush.xpose.msk.msrb.mxu1 %vm1780_vm15, %v4125_v21 }
0x100e   :  { %v1752_v52 = vsel %vm1739_vm2, %v1751_v57, %v1735_v45  ;;  %v4205_v57 = vld [vmem:[%s4385_s5 + $0x8] sm:$0xff] }
0x100f   :  { %v1754_v34 = vrot.slane %v1752_v52, 1  ;;  %v4212_v52 = vld [vmem:[%s4385_s5] sm:$0xff] }
0x1011   :  { %2742 = vmatpush.xpose.msk.msrb.mxu1 %vm1780_vm15, %v4132_v39 }
0x1015   :  { %2743 = vmatpush.xpose.msk.msrb.mxu1 %vm1780_vm15, %v4142_v53 }
0x1053   :  { %v1535_v31 = vpop.xlane.xlu2 %1534 }
0x1054   :  { %v1536_v33 = vsub.f32 %v1529_v59, %v1535_v31  ;;  %v4150_v59 = vld [vmem:[%s4385_s5 + $0x38] sm:$0xff]  ;;  %v4170_v31 = vld [vmem:[%s4386_s6 + $0x4] ss:$0 sm:$0xff] }
0x1055   :  { %2744 = vmatpush.xpose.msk.msrb.mxu1 %vm1780_vm15, %v4150_v59 }
0x1056   :  { %v1537_v7 = vmul.f32 1.442695, %v1536_v33  ;;  %v4175_v33 = vld [vmem:[%s4385_s5 + $0x28] sm:$0xff] }
0x1058   :  { %2916 = vpow2.f32 %v1537_v7  ;;  %v4183_v7 = vld [vmem:[%s4385_s5 + $0x20] sm:$0xff] }
0x1059   :  { %2745 = vmatpush.xpose.msk.msrb.mxu1 %vm1780_vm15, %v4163_v38 }
0x105d   :  { %2746 = vmatpush.xpose.msk.msrb.mxu1 %vm1780_vm15, %v4175_v33 }
0x105e   :  { %v4073_v40 = vpop.eup %2916 }
0x105f   :  { %v1539_v8 = vsel %vm1532_vm13, %v4073_v40, 0.0 }
0x1060   :  { %1540 = vadd.xlane.f32.xlu1 %v1539_v8 }
0x1061   :  { %2747 = vmatpush.xpose.msk.msrb.mxu1 %vm1780_vm15, %v4183_v7 }
0x106d   :  { %v1583_v1 = vpop.xlane.xlu0 %1582 }
0x106e   :  { %v1584_v0 = vsub.f32 %v1577_v63, %v1583_v1 }
0x1070   :  { %v1585_v17 = vmul.f32 1.442695, %v1584_v0  ;;  %v4190_v0 = vld [vmem:[%s4385_s5 + $0x18] sm:$0xff] }
0x1071   :  { %2748 = vmatpush.xpose.msk.msrb.mxu1 %vm1780_vm15, %v4190_v0 }
0x1072   :  { %2918 = vpow2.f32 %v1585_v17 }
0x1078   :  { %v4105_v46 = vpop.eup %2918 }
0x1079   :  { %v1587_v25 = vsel %vm1580_vm14, %v4105_v46, 0.0 }
0x107a   :  { %1588 = vadd.xlane.f32.xlu0 %v1587_v25 }
0x1082   :  { %v1936_v47 = vpop.f32.mrf.mxu2 }
0x1083   :  { %2758 = vmatpush.msk.msrb.mxu3 %vm1157_vm5, %v1936_v47  ;;  %vm1748_vm5 = vcmp.le.s32.totalorder %v3513_v4, 2  ;;  %v4198_v47 = vld [vmem:[%s4385_s5 + $0x10] sm:$0xff] }
0x1084   :  { %2759 = vmatmul.msk.f32.vlgmr.msrb.gmra.mxu3 %vm1153_vm6, %v2753_v54  ;;  %v1745_v54 = vrot.slane %v1743_v32, 3  ;;  %v1756_v29 = vsel %vm1748_vm5, %v1754_v34, 0.0  ;;  %vm1761_vm6 = vcmask 257024   ;;  %2749 = vmatpush.xpose.msk.msrb.mxu1 %vm1780_vm15, %v4198_v47 }
0x1086   :  { %v1747_v60 = vsel %vm1738_vm4, %v1745_v54, 0.0 }
0x1087   :  { %v1757_v63 = vadd.f32 %v1747_v60, %v4067_v5 }
0x1088   :  { %2750 = vmatpush.xpose.msk.msrb.mxu1 %vm1780_vm15, %v4205_v57 }
0x1089   :  { %v1758_v42 = vadd.f32 %v1757_v63, %v1756_v29 }
0x108b   :  { %v1759_v5 = vadd.f32 %v1758_v42, %v4170_v31 }
0x108c   :  { %2751 = vmatpush.xpose.msk.msrb.mxu1 %vm1780_vm15, %v4212_v52 }
0x108d   :  { %v1760_v8 = vmax.f32 %v1759_v5, 0.0 }
0x108f   :  { %v1762_v17 = vsel %vm1761_vm6, %v1760_v8, -inf }
0x1090   :  { %v1763_v25 = vrot.slane %v1762_v17, 4 }
0x1092   :  { %v1764_v62 = vmax.f32 %v1762_v17, %v1763_v25 }
0x1094   :  { %v1765_v34 = vrot.slane %v1764_v62, 2 }
0x1096   :  { %v1766_v42 = vmax.f32 %v1764_v62, %v1765_v34 }
0x1098   :  { %v1767_v5 = vrot.slane %v1766_v42, 1 }
0x10d3   :  { %v1541_v1 = vpop.xlane.xlu1 %1540 }
0x10d4   :  { %2920 = vrcp.f32 %v1541_v1  ;;  %v1553_v58 = vand.u32 2147483648, %v1541_v1  ;;  %vm1547_vm8 = vweird.f32 %v1541_v1  ;;  %v1551_v26 = vand.u32 2147483647, %v1541_v1 }
0x10d6   :  { %v1554_v54 = vor.u32 1.1754944e-38, %v1553_v58  ;;  %vm1552_vm11 = vcmp.eq.f32.partialorder %v1551_v26, 8.507059e+37 }
0x10da   :  { %v2921_v45 = vpop.eup %2920 }
0x10db   :  { %v1543_v23 = vmul.f32 %v2921_v45, %v1541_v1  ;;  %vm1548_vm9 = vweird.f32 %v2921_v45  ;;  %v1768_v1 = vmax.f32 %v1766_v42, %v1767_v5 }
0x10dc   :  { %vm1549_vm10 = vmor %vm1547_vm8, %vm1548_vm9 }
0x10dd   :  { %v1544_v24 = vsub.f32 1.0, %v1543_v23 }
0x10df   :  { %v1545_v32 = vmul.f32 %v2921_v45, %v1544_v24 }
0x10e1   :  { %v1546_v55 = vadd.f32 %v2921_v45, %v1545_v32 }
0x10e3   :  { %v1550_v60 = vsel %vm1549_vm10, %v2921_v45, %v1546_v55  ;;  %v4223_v55 = vpop.permute.xlu2 %2041 }
0x10e4   :  { %v1555_v29 = vsel %vm1552_vm11, %v1554_v54, %v1550_v60 }
0x10e5   :  { %v1556_v63 = vmul.f32 %v4073_v40, %v1555_v29 }
0x10e7   :  { %1632 = vperm.xlu1 %2830, %v1556_v63  }
0x10ed   :  { %v1589_v8 = vpop.xlane.xlu0 %1588 }
0x10ee   :  { %2922 = vrcp.f32 %v1589_v8  ;;  %v1601_v23 = vand.u32 2147483648, %v1589_v8  ;;  %vm1595_vm8 = vweird.f32 %v1589_v8  ;;  %v1599_v24 = vand.u32 2147483647, %v1589_v8 }
0x10ef   :  { %1774 = vrot.lane.b32.xlu1 %v1768_v1, %s2977_s26 }
0x10f0   :  { %v1602_v40 = vor.u32 1.1754944e-38, %v1601_v23  ;;  %vm1600_vm11 = vcmp.eq.f32.partialorder %v1599_v24, 8.507059e+37 }
0x10f4   :  { %v2923_v17 = vpop.eup %2922 }
0x10f5   :  { %v1591_v25 = vmul.f32 %v2923_v17, %v1589_v8  ;;  %vm1596_vm9 = vweird.f32 %v2923_v17 }
0x10f6   :  { %vm1597_vm10 = vmor %vm1595_vm8, %vm1596_vm9 }
0x10f7   :  { %v1592_v58 = vsub.f32 1.0, %v1591_v25  ;;  %2039 = vrot.lane.b32.xlu1 %v3810_v37, %s2978_s27 }
0x10f9   :  { %v1593_v45 = vmul.f32 %v2923_v17, %v1592_v58  ;;  %v1635_v58 = vrot.slane %v3907_v11, 3 }
0x10fb   :  { %v1594_v62 = vadd.f32 %v2923_v17, %v1593_v45 }
0x10fd   :  { %v1598_v26 = vsel %vm1597_vm10, %v2923_v17, %v1594_v62 }
0x10fe   :  { %v1603_v32 = vsel %vm1600_vm11, %v1602_v40, %v1598_v26  ;;  %vm1778_vm11 = vcmask 523264  }
0x10ff   :  { %2340 = vrot.lane.b32.xlu1 %v3830_v18, %s2978_s27  ;;  %v1604_v54 = vmul.f32 %v4105_v46, %v1603_v32 }
0x1101   :  { %2720 = vmatmul.msk.f32.vlgmr.msra.gmra.mxu1 %vm124_vm0, %v1604_v54 }
0x1102   :  { %2819 = vmatpush.xpose.msk.msra.mxu1 %vm437_vm1, %v4223_v55 }
0x1107   :  { %v1959_v37 = vpop.f32.mrf.mxu3 }
0x1108   :  { %2924 = vtanh.f32 %v1959_v37 }
0x110e   :  { %v2925_v34 = vpop.eup %2924 }
0x110f   :  { %v1964_v60 = vrot.slane %v2925_v34, 1 }
0x1111   :  { %2760 = vmatpush.xpose.msk.msra.mxu0 %vm437_vm1, %v1964_v60  ;;  %2762 = vmatpush.msk.msrb.mxu2 %vm801_vm3, %v1964_v60 }
0x1113   :  { %2771 = vmatpush.xpose.msk.msra.mxu2 %vm437_vm1, %v4223_v55 }
0x1114   :  { %2761 = vmatmul.msk.f32.vlgmr.msra.gmra.mxu0 %vm437_vm1, %v1964_v60 }
0x1115   :  { %2764 = vmatpush.xpose.msk.msrb.mxu0 %vm437_vm1, %v4223_v55 }
0x1159   :  { %v1633_v18 = vpop.permute.xlu1 %1632 }
0x115a   :  { %v1637_v24 = vmul.f32 %v1635_v58, %v1633_v18 }
0x1161   :  { %v1775_v46 = vpop.permute.xlu1 %1774 }
0x1169   :  { %v4235_v29 = vpop.permute.xlu1 %2039 }
0x116a   :  { %2765 = vmatpush.xpose.msk.msrb.mxu0 %vm437_vm1, %v4235_v29  ;;  %2820 = vmatpush.xpose.msk.msra.mxu1 %vm437_vm1, %v4235_v29 }
0x116b   :  { %2772 = vmatpush.xpose.msk.msra.mxu2 %vm437_vm1, %v4235_v29 }
0x116d   :  { %2766 = vmatmul.msk.f32.vlgmr.msrb.gmra.mxu0 %vm437_vm1, %v3875_v28 }
0x1175   :  { %2767 = vmatmul.msk.f32.gmra.mxu0 %vm437_vm1, %v3882_v30 }
0x117e   :  { %v1627_v18 = vpop.f32.mrf.mxu1 }
0x1191   :  { %v1984_v63 = vpop.f32.mrf.mxu0 }
0x1192   :  { %v1987_v42 = vmul.f32 0.057735026, %v1984_v63 }
0x1194   :  { %v1988_v5 = vsel %vm1254_vm7, %v1987_v42, -inf }
0x1195   :  { %1989 = vmax.xlane.f32.xlu0 %v1988_v5 }
0x1208   :  { %v1990_v8 = vpop.xlane.xlu0 %1989 }
0x1209   :  { %v1991_v1 = vsub.f32 %v1987_v42, %v1990_v8 }
0x120b   :  { %v1992_v17 = vmul.f32 1.442695, %v1991_v1 }
0x120d   :  { %2926 = vpow2.f32 %v1992_v17 }
0x1213   :  { %v2927_v25 = vpop.eup %2926 }
0x1214   :  { %v1994_v23 = vsel %vm1254_vm7, %v2927_v25, 0.0 }
0x1215   :  { %1995 = vadd.xlane.f32.xlu0 %v1994_v23 }
0x1229   :  { %1770 = vrot.lane.b32.xlu0 %v1637_v24, %s2978_s27 }
0x1288   :  { %v1996_v28 = vpop.xlane.xlu0 %1995 }
0x1289   :  { %2928 = vrcp.f32 %v1996_v28  ;;  %v2008_v62 = vand.u32 2147483648, %v1996_v28  ;;  %v2006_v32 = vand.u32 2147483647, %v1996_v28  ;;  %vm2002_vm9 = vweird.f32 %v1996_v28 }
0x128b   :  { %v2009_v37 = vor.u32 1.1754944e-38, %v2008_v62  ;;  %vm2007_vm7 = vcmp.eq.f32.partialorder %v2006_v32, 8.507059e+37 }
0x128f   :  { %v2929_v30 = vpop.eup %2928 }
0x1290   :  { %v1998_v45 = vmul.f32 %v2929_v30, %v1996_v28  ;;  %vm2003_vm8 = vweird.f32 %v2929_v30 }
0x1291   :  { %vm2004_vm10 = vmor %vm2002_vm9, %vm2003_vm8 }
0x1292   :  { %v1999_v40 = vsub.f32 1.0, %v1998_v45 }
0x1294   :  { %v2000_v26 = vmul.f32 %v2929_v30, %v1999_v40 }
0x1296   :  { %v2001_v54 = vadd.f32 %v2929_v30, %v2000_v26 }
0x1298   :  { %v2005_v34 = vsel %vm2004_vm10, %v2929_v30, %v2001_v54 }
0x1299   :  { %v2010_v60 = vsel %vm2007_vm7, %v2009_v37, %v2005_v34 }
0x129a   :  { %v2011_v11 = vmul.f32 %v2927_v25, %v2010_v60 }
0x129b   :  { %v1771_v63 = vpop.permute.xlu0 %1770 }
0x129c   :  { %v1777_v42 = vsel %vm437_vm1, %v1627_v18, %v1771_v63  ;;  %2763 = vmatmul.msk.f32.vlgmr.msrb.gmra.mxu2 %vm1279_vm12, %v2011_v11 }
0x129d   :  { %v1779_v5 = vsel %vm1778_vm11, %v1777_v42, %v1775_v46 }
0x129e   :  { %2752 = vmatmul.msk.f32.vlgmr.msrb.gmra.mxu1 %vm1780_vm15, %v1779_v5 }
0x129f   :  { %2792 = vmatpush.xpose.msk.msrb.mxu1 %vm437_vm1, %v3944_v49  ;;  %v4271_v49 = vpop.permute.xlu1 %2340 }
0x12a3   :  { %2793 = vmatpush.xpose.msk.msrb.mxu1 %vm437_vm1, %v3960_v51 }
0x12a4   :  { %2773 = vmatmul.msk.f32.vlgmr.msra.gmra.mxu2 %vm437_vm1, %v3916_v12 }
0x12a6   :  { %2768 = vmatmul.msk.f32.vlgmr.msra.gmra.mxu1 %vm437_vm1, %v3890_v36  ;;  %v4278_v36 = vld [vmem:[%s4386_s6 + $0x1] ss:$0 sm:$0xff]  ;;  %s2980_s6 = smov [#allocation2]  }
0x12a7   :  { %2794 = vmatpush.xpose.msk.msrb.mxu1 %vm437_vm1, %v3975_v16 }
0x12ab   :  { %2795 = vmatpush.xpose.msk.msrb.mxu1 %vm437_vm1, %v3989_v19  ;;  %v2064_v19 = vpop.f32.mrf.mxu0 }
0x12ac   :  { %2774 = vmatmul.msk.f32.gmra.mxu2 %vm437_vm1, %v3923_v13 }
0x12ae   :  { %2769 = vmatmul.msk.f32.gmra.mxu1 %vm437_vm1, %v3897_v44 }
0x12b3   :  { %v2067_v46 = vpop.f32.mrf.mxu0 }
0x12b6   :  { %2796 = vmatmul.msk.f32.vlgmr.msrb.gmra.mxu1 %vm437_vm1, %v4271_v49 }
0x131b   :  { %v1849_v12 = vpop.f32.mrf.mxu1 }
0x131c   :  { %v1850_v51 = vadd.f32 %v1849_v12, %v4278_v36 }
0x131e   :  { %1852 = vst [vmem:[#allocation2] sm:$0x1] %v1850_v51 }
0x131f   :  { %v4281_v44 = vpop.f32.mrf.mxu2 }
0x1323   :  { %v2070_v16 = vpop.f32.mrf.mxu1 }
0x1327   :  { %v2117_v1 = vpop.f32.mrf.mxu2 }
0x132b   :  { %v2073_v13 = vpop.f32.mrf.mxu1 }
0x132c   :  { %2091 = vmatpush.msra.mxu0 %v2073_v13 }
0x132e   :  { %2092 = vmatpush.msra.mxu0 %v2070_v16 }
0x1330   :  { %2093 = vmatpush.msra.mxu0 %v2067_v46 }
0x1332   :  { %2094 = vmatpush.msra.mxu0 %v2064_v19 }
0x1333   :  { %2770 = vmatmul.msk.f32.vlgmr.msra.gmra.mxu0 %vm437_vm1, %v4281_v44 }
0x1334   :  { %2775 = vmatpush.xpose.msk.msrb.mxu0 %vm437_vm1, %v4281_v44 }
0x133b   :  { %2776 = vmatmul.msk.f32.vlgmr.msrb.gmra.mxu0 %vm437_vm1, %v3930_v35 }
0x1343   :  { %2777 = vmatmul.msk.f32.gmra.mxu0 %vm437_vm1, %v3937_v14  ;;  %v2120_v14 = vpop.f32.mrf.mxu2 }
0x13b0   :  { %v2096_v8 = vpop.f32.mrf.mxu0 }
0x13b1   :  { %2930 = vtanh.f32 %v2096_v8 }
0x13b7   :  { %v2931_v17 = vpop.eup %2930 }
0x13b8   :  { %v2140_v25 = vpop.f32.mrf.mxu0  ;;  %2778 = vmatpush.msk.msrb.mxu2 %vm801_vm3, %v2931_v17  ;;  %2781 = vmatpush.xpose.msk.msra.mxu0 %vm124_vm0, %v2931_v17 }
0x13b9   :  { %2779 = vmatmul.msk.f32.vlgmr.msrb.gmra.mxu2 %vm1279_vm12, %v2140_v25 }
0x13bb   :  { %2782 = vmatmul.msk.f32.vlgmr.msra.gmra.mxu0 %vm124_vm0, %v2117_v1 }
0x13bc   :  { %2787 = vmatpush.xpose.msk.msrb.mxu0 %vm437_vm1, %v3949_v50 }
0x13c0   :  { %2788 = vmatpush.xpose.msk.msrb.mxu0 %vm437_vm1, %v3965_v15  ;;  %v2143_v35 = vpop.f32.mrf.mxu0 }
0x13c1   :  { %2780 = vmatmul.msk.f32.gmra.mxu2 %vm1279_vm12, %v2143_v35 }
0x13c3   :  { %2783 = vmatmul.msk.f32.gmra.mxu0 %vm124_vm0, %v2120_v14 }
0x13c4   :  { %2789 = vmatpush.xpose.msk.msrb.mxu0 %vm437_vm1, %v3980_v2 }
0x13c8   :  { %2790 = vmatpush.xpose.msk.msrb.mxu0 %vm437_vm1, %v3994_v22 }
0x13cb   :  { %2791 = vmatmul.msk.f32.vlgmr.msrb.gmra.mxu0 %vm437_vm1, %v4271_v49 }
0x1438   :  { %v2207_v50 = vpop.f32.mrf.mxu0 }
0x1439   :  { %v2213_v24 = vadd.f32 %v2207_v50, %v2140_v25 }
0x143c   :  { %v2172_v23 = vpop.f32.mrf.mxu2 }
0x143d   :  { %v2178_v30 = vadd.f32 %v2172_v23, %v2117_v1 }
0x1440   :  { %v2210_v58 = vpop.f32.mrf.mxu0 }
0x1441   :  { %v2214_v15 = vadd.f32 %v2210_v58, %v2143_v35 }
0x1443   :  { %2932 = vtanh.f32 %v2214_v15 }
0x1444   :  { %v2175_v28 = vpop.f32.mrf.mxu2  ;;  %2934 = vtanh.f32 %v2213_v24 }
0x1445   :  { %v2179_v45 = vadd.f32 %v2175_v28, %v2120_v14 }
0x1447   :  { %2936 = vtanh.f32 %v2179_v45 }
0x1448   :  { %2938 = vtanh.f32 %v2178_v30 }
0x1449   :  { %v2933_v2 = vpop.eup %2932 }
0x144a   :  { %2231 = vmatpush.msra.mxu3 %v2933_v2  ;;  %v2935_v40 = vpop.eup %2934 }
0x144c   :  { %2232 = vmatpush.msra.mxu3 %v2935_v40 }
0x144d   :  { %v2937_v22 = vpop.eup %2936  ;;  %2784 = vmatmul.msk.f32.vlgmr.msra.gmra.mxu3 %vm124_vm0, %v4017_v6 }
0x144e   :  { %2324 = vmatpush.msrb.mxu3 %v4223_v55  ;;  %2275 = vmatpush.msra.mxu2 %v2937_v22  ;;  %v2939_v62 = vpop.eup %2938 }
0x1450   :  { %2325 = vmatpush.msrb.mxu3 %v4235_v29  ;;  %2276 = vmatpush.msra.mxu2 %v2939_v62 }
0x1451   :  { %2785 = vmatmul.msk.f32.vlgmr.msra.gmra.mxu2 %vm124_vm0, %v4028_v3 }
0x1452   :  { %2802 = vmatpush.xpose.msk.msra.mxu3 %vm1780_vm15, %v4080_v20  ;;  %2797 = vmatpush.xpose.msk.msrb.mxu2 %vm437_vm1, %v4033_v27 }
0x1456   :  { %2803 = vmatpush.xpose.msk.msra.mxu3 %vm1780_vm15, %v4087_v9  ;;  %2798 = vmatpush.xpose.msk.msrb.mxu2 %vm437_vm1, %v4042_v10 }
0x145a   :  { %2804 = vmatpush.xpose.msk.msra.mxu3 %vm1780_vm15, %v4094_v43  ;;  %2799 = vmatpush.xpose.msk.msrb.mxu2 %vm437_vm1, %v4054_v41  ;;  %v2361_v41 = vpop.f32.mrf.mxu0 }
0x145b   :  { %v2404_v20 = vrot.slane %v2361_v41, 4 }
0x145d   :  { %v2405_v43 = vsel %vm1739_vm2, %v2404_v20, %v2361_v41 }
0x145e   :  { %2805 = vmatpush.xpose.msk.msra.mxu3 %vm1780_vm15, %v4101_v48  ;;  %2800 = vmatpush.xpose.msk.msrb.mxu2 %vm437_vm1, %v4061_v56 }
0x1461   :  { %2801 = vmatmul.msk.f32.vlgmr.msrb.gmra.mxu2 %vm437_vm1, %v4271_v49 }
0x1462   :  { %2806 = vmatpush.xpose.msk.msra.mxu3 %vm1780_vm15, %v4115_v61  ;;  %v2406_v61 = vrot.slane %v2405_v43, 4 }
0x1466   :  { %2807 = vmatpush.xpose.msk.msra.mxu3 %vm1780_vm15, %v4125_v21 }
0x146a   :  { %2808 = vmatpush.xpose.msk.msra.mxu3 %vm1780_vm15, %v4132_v39  ;;  %v2407_v39 = vsel %vm1739_vm2, %v2406_v61, %v2361_v41 }
0x146e   :  { %2809 = vmatpush.xpose.msk.msra.mxu3 %vm1780_vm15, %v4142_v53 }
0x1472   :  { %2810 = vmatpush.xpose.msk.msra.mxu3 %vm1780_vm15, %v4150_v59  ;;  %v2409_v59 = vrot.slane %v2407_v39, 3 }
0x1476   :  { %2811 = vmatpush.xpose.msk.msra.mxu3 %vm1780_vm15, %v4163_v38 }
0x147a   :  { %2812 = vmatpush.xpose.msk.msra.mxu3 %vm1780_vm15, %v4175_v33  ;;  %v2411_v33 = vsel %vm1738_vm4, %v2409_v59, 0.0 }
0x147e   :  { %2813 = vmatpush.xpose.msk.msra.mxu3 %vm1780_vm15, %v4183_v7 }
0x1482   :  { %2814 = vmatpush.xpose.msk.msra.mxu3 %vm1780_vm15, %v4190_v0  ;;  %v2381_v0 = vpop.f32.mrf.mxu1 }
0x1486   :  { %2815 = vmatpush.xpose.msk.msra.mxu3 %vm1780_vm15, %v4198_v47 }
0x148a   :  { %2816 = vmatpush.xpose.msk.msra.mxu3 %vm1780_vm15, %v4205_v57 }
0x148e   :  { %2817 = vmatpush.xpose.msk.msra.mxu3 %vm1780_vm15, %v4212_v52  ;;  %v2420_v52 = vadd.f32 %v2411_v33, %v2381_v0 }
0x14d0   :  { %v2234_v6 = vpop.f32.mrf.mxu3 }
0x14d1   :  { %v2237_v3 = vsel %vm1532_vm13, %v2234_v6, -inf }
0x14d2   :  { %2238 = vmax.xlane.f32.xlu1 %v2237_v3 }
0x14d4   :  { %v2278_v27 = vpop.f32.mrf.mxu2 }
0x14d5   :  { %v2281_v10 = vsel %vm1580_vm14, %v2278_v27, -inf }
0x14d6   :  { %2282 = vmax.xlane.f32.xlu0 %v2281_v10 }
0x14e4   :  { %v2401_v56 = vpop.f32.mrf.mxu2 }
0x14e5   :  { %v2412_v9 = vrot.slane %v2401_v56, 4 }
0x14e7   :  { %v2413_v48 = vsel %vm1739_vm2, %v2412_v9, %v2401_v56 }
0x14e8   :  { %v2414_v21 = vrot.slane %v2413_v48, 4 }
0x14ea   :  { %v2415_v53 = vsel %vm1739_vm2, %v2414_v21, %v2401_v56 }
0x14eb   :  { %v2417_v38 = vrot.slane %v2415_v53, 1 }
0x14ed   :  { %v2419_v47 = vsel %vm1748_vm5, %v2417_v38, 0.0 }
0x14ee   :  { %v2421_v29 = vadd.f32 %v2420_v52, %v2419_v47 }
0x14f0   :  { %v2422_v37 = vadd.f32 %v2421_v29, %v4170_v31 }
0x14f2   :  { %v2423_v60 = vmax.f32 %v2422_v37, 0.0 }
0x14f4   :  { %v2424_v63 = vsel %vm1761_vm6, %v2423_v60, -inf }
0x14f5   :  { %v2425_v42 = vrot.slane %v2424_v63, 4 }
0x14f7   :  { %v2426_v5 = vmax.f32 %v2424_v63, %v2425_v42 }
0x14f9   :  { %v2427_v49 = vrot.slane %v2426_v5, 2 }
0x14fb   :  { %v2428_v12 = vmax.f32 %v2426_v5, %v2427_v49 }
0x14fd   :  { %v2429_v51 = vrot.slane %v2428_v12, 1 }
0x14ff   :  { %v2430_v16 = vmax.f32 %v2428_v12, %v2429_v51 }
0x1545   :  { %v2239_v7 = vpop.xlane.xlu1 %2238 }
0x1546   :  { %v2240_v57 = vsub.f32 %v2234_v6, %v2239_v7 }
0x1548   :  { %v2241_v55 = vmul.f32 1.442695, %v2240_v57 }
0x1549   :  { %v2283_v26 = vpop.xlane.xlu0 %2282 }
0x154a   :  { %2940 = vpow2.f32 %v2241_v55  ;;  %v2284_v32 = vsub.f32 %v2278_v27, %v2283_v26  ;;  %v2335_v27 = vrot.slane %v4281_v44, 3 }
0x154c   :  { %v2285_v54 = vmul.f32 1.442695, %v2284_v32 }
0x154e   :  { %2942 = vpow2.f32 %v2285_v54 }
0x1550   :  { %v2941_v34 = vpop.eup %2940 }
0x1551   :  { %v2243_v11 = vsel %vm1532_vm13, %v2941_v34, 0.0 }
0x1552   :  { %2244 = vadd.xlane.f32.xlu0 %v2243_v11 }
0x1554   :  { %v2943_v18 = vpop.eup %2942 }
0x1555   :  { %v2287_v4 = vsel %vm1580_vm14, %v2943_v18, 0.0 }
0x1556   :  { %2288 = vadd.xlane.f32.xlu2 %v2287_v4 }
0x156e   :  { %2436 = vrot.lane.b32.xlu2 %v2430_v16, %s2977_s26  ;;  %s2470_s26 = sshll.u32 %s2980_s6, 4  ;;  %s2471_s26 = int_to_ptr.vmem [resolvable:$true] %s2470_s26 }
0x15c5   :  { %v2245_v31 = vpop.xlane.xlu0 %2244 }
0x15c6   :  { %2944 = vrcp.f32 %v2245_v31  ;;  %v2257_v17 = vand.u32 2147483648, %v2245_v31  ;;  %v2255_v25 = vand.u32 2147483647, %v2245_v31  ;;  %vm2251_vm12 = vweird.f32 %v2245_v31 }
0x15c8   :  { %v2258_v58 = vor.u32 1.1754944e-38, %v2257_v17  ;;  %vm2256_vm14 = vcmp.eq.f32.partialorder %v2255_v25, 8.507059e+37 }
0x15c9   :  { %v2289_v19 = vpop.xlane.xlu2 %2288 }
0x15ca   :  { %2946 = vrcp.f32 %v2289_v19  ;;  %v2301_v24 = vand.u32 2147483648, %v2289_v19  ;;  %v2299_v28 = vand.u32 2147483647, %v2289_v19  ;;  %vm2295_vm4 = vweird.f32 %v2289_v19 }
0x15cc   :  { %v2945_v13 = vpop.eup %2944  ;;  %v2302_v22 = vor.u32 1.1754944e-38, %v2301_v24  ;;  %vm2300_vm6 = vcmp.eq.f32.partialorder %v2299_v28, 8.507059e+37 }
0x15cd   :  { %v2247_v46 = vmul.f32 %v2945_v13, %v2245_v31  ;;  %vm2252_vm3 = vweird.f32 %v2945_v13 }
0x15ce   :  { %vm2253_vm13 = vmor %vm2251_vm12, %vm2252_vm3 }
0x15cf   :  { %v2248_v8 = vsub.f32 1.0, %v2247_v46 }
0x15d0   :  { %v2947_v1 = vpop.eup %2946 }
0x15d1   :  { %v2249_v35 = vmul.f32 %v2945_v13, %v2248_v8  ;;  %v2291_v14 = vmul.f32 %v2947_v1, %v2289_v19  ;;  %vm2296_vm2 = vweird.f32 %v2947_v1  ;;  %v2437_v9 = vpop.permute.xlu2 %2436 }
0x15d2   :  { %vm2297_vm5 = vmor %vm2295_vm4, %vm2296_vm2 }
0x15d3   :  { %v2292_v50 = vsub.f32 1.0, %v2291_v14  ;;  %v2250_v23 = vadd.f32 %v2945_v13, %v2249_v35 }
0x15d5   :  { %v2293_v15 = vmul.f32 %v2947_v1, %v2292_v50  ;;  %v2254_v30 = vsel %vm2253_vm13, %v2945_v13, %v2250_v23 }
0x15d6   :  { %v2259_v45 = vsel %vm2256_vm14, %v2258_v58, %v2254_v30 }
0x15d7   :  { %v2294_v2 = vadd.f32 %v2947_v1, %v2293_v15  ;;  %v2260_v40 = vmul.f32 %v2941_v34, %v2259_v45 }
0x15d9   :  { %v2298_v62 = vsel %vm2297_vm5, %v2947_v1, %v2294_v2  ;;  %2332 = vperm.xlu0 %2831, %v2260_v40  }
0x15da   :  { %v2303_v6 = vsel %vm2300_vm6, %v2302_v22, %v2298_v62 }
0x15db   :  { %v2304_v3 = vmul.f32 %v2943_v18, %v2303_v6 }
0x15dd   :  { %2786 = vmatmul.msk.f32.vlgmr.msrb.gmra.mxu3 %vm124_vm0, %v2304_v3 }
0x164b   :  { %v2333_v10 = vpop.permute.xlu0 %2332 }
0x164c   :  { %v2337_v41 = vmul.f32 %v2335_v27, %v2333_v10 }
0x164e   :  { %2432 = vrot.lane.b32.xlu1 %v2337_v41, %s2978_s27  ;;  %s2981_s27 = smov 16  }
0x1660   :  { %v2327_v56 = vpop.f32.mrf.mxu3 }
0x16c0   :  { %v2433_v20 = vpop.permute.xlu1 %2432 }
0x16c1   :  { %v2439_v43 = vsel %vm437_vm1, %v2327_v56, %v2433_v20 }
0x16c2   :  { %v2440_v48 = vsel %vm1778_vm11, %v2439_v43, %v2437_v9 }
0x16c3   :  { %2818 = vmatmul.msk.f32.vlgmr.msra.gmra.mxu3 %vm1780_vm15, %v2440_v48 }
0x1746   :  { %v2461_v44 = vpop.f32.mrf.mxu3 }
0x1747   :  { %v2462_v61 = vadd.f32 %v2461_v44, %v4278_v36 }
0x1749   :  { %2465 = vst [vmem:[#allocation2 + $0x1] sm:$0x1] %v2462_v61 }
0x174a   :  { %2478 = dma.vmem_to_hbm [thread:$0]  %s2471_s26, 32, %s2473_s13, [#allocation3], %s2981_s27, %s2981_s27, %s2982_s14  }
0x174b   :  { %2972 = dma.done.wait [#allocation3], 32  }
0x174c   :  { %2973 = vsyncadd [#allocation3], 4294967264 }
0x174d   :  { %2483 = vsyncpa [#allocation3], 1 }

</bundles_post_ra>
